<compile_context>
chip_gen: v5e
topology: v5e:2x2
jax: 0.10.0
libtpu: 0.0.40
codegen_flags: <defaults>
</compile_context>

<pallas_src>
import jax
import jax.numpy as jnp
from jax.experimental import pallas as pl
from jax.experimental.pallas import tpu as pltpu

CZ = 32       # controller feature size
M = 20        # memory word width
NSLOT = 128   # number of memory slots (N in the reference)
B_BLK = 8     # sequences per grid block (f32 sublane count)

# packed parameter row layout (lane dim padded to NSLOT=128)
_ROW_MEMT = 0            # rows [0, M):   memory transposed  (M, N)
_ROW_MNORM = M           # row M:         per-slot L2 norms  (1, N)
_ROW_MWO = M + 1         # row M+1:       mem @ wo           (1, N)
_ROW_W0 = M + 2          # row M+2:       initial read-head address w0 (1, N)
_ROW_WX0 = M + 3         # row M+3:       fused ctl weight for x[..., 0] (lanes 0:26)
_ROW_WX1 = M + 4         # row M+4:       fused ctl weight for x[..., 1]
_ROW_BC = M + 5          # row M+5:       fused ctl bias
_ROW_BO = M + 6          # row M+6:       cout bias (lane 0)
PRM_ROWS = M + 7


def _sigmoid(x):
    return 1.0 / (1.0 + jnp.exp(-x))


def _softplus(x):
    # torch F.softplus (beta=1, threshold=20)
    return jnp.where(x > 20.0, x, jnp.log1p(jnp.exp(jnp.minimum(x, 20.0))))


def _softmax_lanes(x):
    m = jnp.max(x, axis=-1, keepdims=True)
    e = jnp.exp(x - m)
    return e / jnp.sum(e, axis=-1, keepdims=True)


def ntm_kernel(xs_ref, prm_ref, out_ref):
    """One grid step = B_BLK independent sequences batched on sublanes.

    xs_ref : (T*B_BLK, 2)     t-major: row = t*B_BLK + b
    prm_ref: (PRM_ROWS, 128)  packed parameters, see _ROW_* layout
    out_ref: (T*B_BLK, 1)     sigmoid read-outs, t-major
    """
    TB = xs_ref.shape[0]
    T = TB // B_BLK

    memT = prm_ref[_ROW_MEMT:_ROW_MEMT + M, :]          # (M, N)
    mem_norm = prm_ref[_ROW_MNORM:_ROW_MNORM + 1, :]    # (1, N)
    mem_wo = prm_ref[_ROW_MWO:_ROW_MWO + 1, :]          # (1, N)
    w0 = prm_ref[_ROW_W0:_ROW_W0 + 1, :]                # (1, N)
    wx0 = prm_ref[_ROW_WX0:_ROW_WX0 + 1, :]             # (1, N) lanes 0:26 valid
    wx1 = prm_ref[_ROW_WX1:_ROW_WX1 + 1, :]             # (1, N)
    bct = prm_ref[_ROW_BC:_ROW_BC + 1, :]               # (1, N)
    bo = prm_ref[_ROW_BO:_ROW_BO + 1, 0:1]              # (1, 1)

    xs = xs_ref[...]                                    # (TB, 2)

    # --------------- hoisted, batched-over-(T, batch) work -------------------
    # Entire controller + head-control decode is affine (no activation between
    # the stacked Linears) -> fused offline to (2, 26); two VPU broadcast-FMAs.
    ctl = xs[:, 0:1] * wx0 + xs[:, 1:2] * wx1 + bct                     # (TB, 128)
    k_all = ctl[:, 0:M]                                                 # (TB, M)
    b_all = _softplus(ctl[:, M:M + 1])                                  # (TB, 1)
    g_all = _sigmoid(ctl[:, M + 1:M + 2])                               # (TB, 1)
    s_all = _softmax_lanes(ctl[:, M + 2:M + 5])                         # (TB, 3)
    y_all = _softplus(ctl[:, M + 5:M + 6]) + 1.0                        # (TB, 1)

    # content addressing: cosine similarity + sharpened softmax for all (t, b)
    num = jnp.dot(k_all, memT, preferred_element_type=jnp.float32)      # (TB, N)
    k_norm = jnp.sqrt(jnp.sum(k_all * k_all, axis=-1, keepdims=True))   # (TB, 1)
    wc_all = num / jnp.maximum(mem_norm * k_norm, 1e-8)  # cosine_similarity eps
    wc_all = _softmax_lanes(wc_all * b_all)                             # (TB, N)

    s0 = s_all[:, 0:1]
    s1 = s_all[:, 1:2]
    s2 = s_all[:, 2:3]
    omg = 1.0 - g_all                                                   # (TB, 1)

    # distribute the 3-tap circular shift over the interpolation:
    #   wt_t = A_t + (1 - g_t)/Z_{t-1} * S(wty_{t-1})
    # A_t depends only on per-step data -> precompute for all T, batched.
    wcg = wc_all * g_all
    A_all = (s0 * pltpu.roll(wcg, NSLOT - 1, axis=1)     # == roll(wcg, -1)
             + s1 * wcg
             + s2 * pltpu.roll(wcg, 1, axis=1))          # == roll(wcg, +1)

    # --------------- recurrence: only the w-carry chain stays in-loop --------
    # carry the UNnormalized sharpened weight wty and 1/Z; the lane reduce +
    # reciprocal of step t-1 overlaps with the rolls of step t (XLU/EUP slots),
    # and the read-out is hoisted below the loop.
    wty_prev = w0                      # (1, N), broadcasts against (B_BLK, 1)
    invz_prev = 1.0                    # w0 enters un-normalized, like torch
    wty_steps = []
    invz_steps = []
    for t in range(T):                 # static T -> fully unrolled
        sl = slice(t * B_BLK, (t + 1) * B_BLK)
        c_t = omg[sl] * invz_prev                                       # (B, 1)
        shifted = (s0[sl] * pltpu.roll(wty_prev, NSLOT - 1, axis=1)
                   + s1[sl] * wty_prev
                   + s2[sl] * pltpu.roll(wty_prev, 1, axis=1))          # (B, N)
        wt = A_all[sl] + c_t * shifted                                  # (B, N)
        # wt ** y  (wt >= 0 by construction; guard log against exact 0)
        wty = jnp.exp(y_all[sl] * jnp.log(jnp.maximum(wt, 1e-30)))      # (B, N)
        z = jnp.sum(wty, axis=-1, keepdims=True)                        # (B, 1)
        # EUP approx reciprocal: ~1e-4 relative error vs exact divide
        invz = pl.reciprocal(jnp.maximum(z, 1e-12), approx=True)        # (B, 1)
        wty_steps.append(wty)
        invz_steps.append(invz)
        wty_prev = wty
        invz_prev = invz
    # TODO(synk): the write head (erase/add + its own address carry) never
    # reaches the output in the reference forward (memory update is applied to
    # a local copy never written back to self.M) -- elided as dead code.

    # --------------- hoisted read-out: one batched dot + sigmoid -------------
    wty_all = jnp.concatenate(wty_steps, axis=0)                        # (TB, N)
    invz_all = jnp.concatenate(invz_steps, axis=0)                      # (TB, 1)
    r = jnp.sum(wty_all * mem_wo, axis=-1, keepdims=True)               # (TB, 1)
    out_ref[...] = _sigmoid(r * invz_all + bo)


def _pad_lanes(x, width=NSLOT):
    return jnp.pad(x, ((0, 0), (0, width - x.shape[-1])))


@jax.jit
def ntm_forward_batched(xs, MM, w1, b1, w2, b2, wo, bo, wc_r, bc_r, w0_r):
    """xs: (B, T, 2) batch of independent sequences -> (B, T) read-outs.

    All sequences share the module parameters and the reset() state
    (self.M = MM, self.rh.w = w0_r); per-sequence semantics match NTMFF.forward.
    """
    B, T, _ = xs.shape

    # offline affine fusion: x(2) -> [k(20)|b(1)|g(1)|s(3)|y(1)] pre-activations
    W_all = w1 @ w2 @ wc_r                                  # (2, 26)
    bc_all = (b1 @ w2 + b2) @ wc_r + bc_r                   # (1, 26)

    memT = MM.T                                             # (M, N)
    mem_norm = jnp.sqrt(jnp.sum(memT * memT, axis=0, keepdims=True))    # (1, N)
    mem_wo = wo @ memT                                      # (1, N)

    prm = jnp.concatenate([
        memT,                        # rows 0 .. M-1
        mem_norm,                    # row M
        mem_wo,                      # row M+1
        w0_r,                        # row M+2
        _pad_lanes(W_all),           # rows M+3, M+4
        _pad_lanes(bc_all),          # row M+5
        _pad_lanes(bo.reshape(1, 1)),  # row M+6 (lane 0)
    ], axis=0).astype(jnp.float32)                          # (PRM_ROWS, N)

    # pad batch to a multiple of B_BLK, lay out t-major inside each block
    nb = -(-B // B_BLK)
    Bpad = nb * B_BLK
    xs_p = jnp.pad(xs.astype(jnp.float32), ((0, Bpad - B), (0, 0), (0, 0)))
    xs_k = (xs_p.reshape(nb, B_BLK, T, 2)
            .transpose(0, 2, 1, 3)
            .reshape(nb * T * B_BLK, 2))

    out = pl.pallas_call(
        ntm_kernel,
        out_shape=jax.ShapeDtypeStruct((nb * T * B_BLK, 1), jnp.float32),
        grid=(nb,),
        in_specs=[
            pl.BlockSpec((T * B_BLK, 2), lambda i: (i, 0)),
            pl.BlockSpec((PRM_ROWS, NSLOT), lambda i: (0, 0)),
        ],
        out_specs=pl.BlockSpec((T * B_BLK, 1), lambda i: (i, 0)),
        compiler_params=pltpu.CompilerParams(
            dimension_semantics=("parallel",)),  # blocks shard across v7x's 2 TCs
    )(xs_k, prm)

    out = (out.reshape(nb, T, B_BLK)
           .transpose(0, 2, 1)
           .reshape(Bpad, T))
    return out[:B]


def ntm_forward(xs_single, *params):
    """Single-sequence entry point matching NTMFF.forward: (T, 2) -> (T,)."""
    return ntm_forward_batched(xs_single[None], *params)[0]


def linear_init(key, fan_in, fan_out):
    """Deterministic nn.Linear-style init: W (fan_in, fan_out), b (1, fan_out)."""
    kw, kb = jax.random.split(key)
    lim = 1.0 / (fan_in ** 0.5)
    w = jax.random.uniform(kw, (fan_in, fan_out), jnp.float32, -lim, lim)
    b = jax.random.uniform(kb, (1, fan_out), jnp.float32, -lim, lim)
    return w, b


if __name__ == "__main__":
    key = jax.random.PRNGKey(0)
    keys = jax.random.split(key, 10)
    T = 8       # sequence length
    B = 16      # independent sequences -> 2 sublane blocks -> 2 parallel grid steps

    xs = jax.random.normal(keys[0], (B, T, 2), jnp.float32)

    # controller self.cin: Linear(2, 64) -> Linear(64, CZ) (no activation between)
    w1, b1 = linear_init(keys[1], 2, 64)
    w2, b2 = linear_init(keys[2], 64, CZ)

    # self.cout: Linear(M, 1) + Sigmoid (weight passed transposed as (1, M))
    wo_full, bo = linear_init(keys[3], M, 1)
    wo = wo_full.T

    # read head: fused control Linear CZ -> [k(20) | b(1) | g(1) | s(3) | y(1)]
    wc_r, bc_r = linear_init(keys[4], CZ, M + 6)
    # write-head parameters exist in the module but are dead code w.r.t. the
    # forward output; created only for structural parity, not passed down.
    wc_w, bc_w = linear_init(keys[5], CZ, M + 6)                    # unused
    w0_w = jax.random.uniform(keys[7], (1, NSLOT), jnp.float32)     # unused

    w0_r = jax.random.uniform(keys[6], (1, NSLOT), jnp.float32)     # self.rh.ww
    MM = jax.random.uniform(keys[8], (NSLOT, M), jnp.float32)       # self.MM

    params = (MM, w1, b1, w2, b2, wo, bo, wc_r, bc_r, w0_r)

    out_b = ntm_forward_batched(xs, *params)          # (B, T)
    jax.block_until_ready(out_b)
    assert out_b.shape == (B, T)
    assert bool(jnp.all(jnp.isfinite(out_b)))

    out_1 = ntm_forward(xs[0], *params)               # (T,) module-equivalent path
    jax.block_until_ready(out_1)
    assert out_1.shape == (T,)
    assert bool(jnp.allclose(out_b[0], out_1, rtol=1e-5, atol=1e-6))

    print("KERNEL_OK")
</pallas_src>

<mosaic_0001>
module attributes {stable_mosaic.version = 11 : i64} {
  func.func @ntm_kernel(%arg0: i32, %arg1: memref<64x2xf32, #tpu.memory_space<vmem>>, %arg2: memref<27x128xf32, #tpu.memory_space<vmem>>, %arg3: memref<64x1xf32, #tpu.memory_space<vmem>>) attributes {dimension_semantics = [#tpu.dimension_semantics<parallel>], iteration_bounds = array<i64: 2>, scalar_prefetch = 0 : i64, scratch_operands = 0 : i64, tpu.core_type = #tpu.core_type<tc>, window_params = [{transform_indices = @transform_0, window_bounds = array<i64: 64, 2>}, {pipeline_mode = #tpu.pipeline_mode<synchronous>, transform_indices = @transform_1, window_bounds = array<i64: 27, 128>}, {transform_indices = @transform_2, window_bounds = array<i64: 64, 1>}]} {
    %c0 = arith.constant 0 : index
    %c0_0 = arith.constant 0 : index
    %0 = vector.load %arg2[%c0, %c0_0] : memref<27x128xf32, #tpu.memory_space<vmem>>, vector<20x128xf32>
    %c20 = arith.constant 20 : index
    %c0_1 = arith.constant 0 : index
    %1 = vector.load %arg2[%c20, %c0_1] : memref<27x128xf32, #tpu.memory_space<vmem>>, vector<1x128xf32>
    %c21 = arith.constant 21 : index
    %c0_2 = arith.constant 0 : index
    %2 = vector.load %arg2[%c21, %c0_2] : memref<27x128xf32, #tpu.memory_space<vmem>>, vector<1x128xf32>
    %c22 = arith.constant 22 : index
    %c0_3 = arith.constant 0 : index
    %3 = vector.load %arg2[%c22, %c0_3] : memref<27x128xf32, #tpu.memory_space<vmem>>, vector<1x128xf32>
    %c23 = arith.constant 23 : index
    %c0_4 = arith.constant 0 : index
    %4 = vector.load %arg2[%c23, %c0_4] : memref<27x128xf32, #tpu.memory_space<vmem>>, vector<1x128xf32>
    %c24 = arith.constant 24 : index
    %c0_5 = arith.constant 0 : index
    %5 = vector.load %arg2[%c24, %c0_5] : memref<27x128xf32, #tpu.memory_space<vmem>>, vector<1x128xf32>
    %c25 = arith.constant 25 : index
    %c0_6 = arith.constant 0 : index
    %6 = vector.load %arg2[%c25, %c0_6] : memref<27x128xf32, #tpu.memory_space<vmem>>, vector<1x128xf32>
    %c26 = arith.constant 26 : index
    %c0_7 = arith.constant 0 : index
    %7 = vector.load %arg2[%c26, %c0_7] : memref<27x128xf32, #tpu.memory_space<vmem>>, vector<1x1xf32>
    %c0_8 = arith.constant 0 : index
    %c0_9 = arith.constant 0 : index
    %8 = vector.load %arg1[%c0_8, %c0_9] : memref<64x2xf32, #tpu.memory_space<vmem>>, vector<64x2xf32>
    %9 = vector.extract_strided_slice %8 {offsets = [0, 0], sizes = [64, 1], strides = [1, 1]} : vector<64x2xf32> to vector<64x1xf32>
    %10 = vector.broadcast %9 : vector<64x1xf32> to vector<64x128xf32>
    %11 = vector.broadcast %4 : vector<1x128xf32> to vector<64x128xf32>
    %12 = arith.mulf %10, %11 : vector<64x128xf32>
    %13 = vector.extract_strided_slice %8 {offsets = [0, 1], sizes = [64, 1], strides = [1, 1]} : vector<64x2xf32> to vector<64x1xf32>
    %14 = vector.broadcast %13 : vector<64x1xf32> to vector<64x128xf32>
    %15 = vector.broadcast %5 : vector<1x128xf32> to vector<64x128xf32>
    %16 = arith.mulf %14, %15 : vector<64x128xf32>
    %17 = arith.addf %12, %16 : vector<64x128xf32>
    %18 = vector.broadcast %6 : vector<1x128xf32> to vector<64x128xf32>
    %19 = arith.addf %17, %18 : vector<64x128xf32>
    %20 = vector.extract_strided_slice %19 {offsets = [0, 0], sizes = [64, 20], strides = [1, 1]} : vector<64x128xf32> to vector<64x20xf32>
    %21 = vector.extract_strided_slice %19 {offsets = [0, 20], sizes = [64, 1], strides = [1, 1]} : vector<64x128xf32> to vector<64x1xf32>
    %cst = arith.constant 2.000000e+01 : f32
    %22 = vector.broadcast %cst : f32 to vector<64x1xf32>
    %23 = arith.cmpf ogt, %21, %22 : vector<64x1xf32>
    %cst_10 = arith.constant 2.000000e+01 : f32
    %24 = vector.broadcast %cst_10 : f32 to vector<64x1xf32>
    %25 = arith.minimumf %21, %24 : vector<64x1xf32>
    %26 = math.exp %25 : vector<64x1xf32>
    %27 = math.log1p %26 : vector<64x1xf32>
    %28 = arith.select %23, %21, %27 : vector<64x1xi1>, vector<64x1xf32>
    %29 = vector.extract_strided_slice %19 {offsets = [0, 21], sizes = [64, 1], strides = [1, 1]} : vector<64x128xf32> to vector<64x1xf32>
    %cst_11 = arith.constant 0.000000e+00 : f32
    %30 = vector.broadcast %cst_11 : f32 to vector<64x1xf32>
    %31 = arith.subf %30, %29 : vector<64x1xf32>
    %32 = math.exp %31 : vector<64x1xf32>
    %cst_12 = arith.constant 1.000000e+00 : f32
    %33 = vector.broadcast %cst_12 : f32 to vector<64x1xf32>
    %34 = arith.addf %33, %32 : vector<64x1xf32>
    %cst_13 = arith.constant 1.000000e+00 : f32
    %35 = vector.broadcast %cst_13 : f32 to vector<64x1xf32>
    %36 = arith.divf %35, %34 : vector<64x1xf32>
    %37 = vector.extract_strided_slice %19 {offsets = [0, 22], sizes = [64, 3], strides = [1, 1]} : vector<64x128xf32> to vector<64x3xf32>
    %cst_14 = arith.constant dense<0xFF800000> : vector<64xf32>
    %38 = vector.multi_reduction <maximumf>, %37, %cst_14 [1] : vector<64x3xf32> to vector<64xf32>
    %39 = vector.shape_cast %38 : vector<64xf32> to vector<64x1xf32>
    %40 = vector.broadcast %39 : vector<64x1xf32> to vector<64x3xf32>
    %41 = arith.subf %37, %40 : vector<64x3xf32>
    %42 = math.exp %41 : vector<64x3xf32>
    %cst_15 = arith.constant dense<0.000000e+00> : vector<64xf32>
    %43 = vector.multi_reduction <add>, %42, %cst_15 [1] : vector<64x3xf32> to vector<64xf32>
    %44 = vector.shape_cast %43 : vector<64xf32> to vector<64x1xf32>
    %45 = vector.broadcast %44 : vector<64x1xf32> to vector<64x3xf32>
    %46 = arith.divf %42, %45 : vector<64x3xf32>
    %47 = vector.extract_strided_slice %19 {offsets = [0, 25], sizes = [64, 1], strides = [1, 1]} : vector<64x128xf32> to vector<64x1xf32>
    %cst_16 = arith.constant 2.000000e+01 : f32
    %48 = vector.broadcast %cst_16 : f32 to vector<64x1xf32>
    %49 = arith.cmpf ogt, %47, %48 : vector<64x1xf32>
    %cst_17 = arith.constant 2.000000e+01 : f32
    %50 = vector.broadcast %cst_17 : f32 to vector<64x1xf32>
    %51 = arith.minimumf %47, %50 : vector<64x1xf32>
    %52 = math.exp %51 : vector<64x1xf32>
    %53 = math.log1p %52 : vector<64x1xf32>
    %54 = arith.select %49, %47, %53 : vector<64x1xi1>, vector<64x1xf32>
    %cst_18 = arith.constant 1.000000e+00 : f32
    %55 = vector.broadcast %cst_18 : f32 to vector<64x1xf32>
    %56 = arith.addf %54, %55 : vector<64x1xf32>
    %cst_19 = arith.constant dense<0.000000e+00> : vector<64x128xf32>
    %57 = tpu.matmul %20, %0, %cst_19 {dimension_numbers = #tpu.dot_dimension_numbers<[1], [0], [0], [1], [0, 0, 1, 1], [], []>} : vector<64x20xf32>, vector<20x128xf32>, vector<64x128xf32> -> vector<64x128xf32>
    %58 = arith.mulf %20, %20 : vector<64x20xf32>
    %cst_20 = arith.constant dense<0.000000e+00> : vector<64xf32>
    %59 = vector.multi_reduction <add>, %58, %cst_20 [1] : vector<64x20xf32> to vector<64xf32>
    %60 = vector.shape_cast %59 : vector<64xf32> to vector<64x1xf32>
    %61 = math.sqrt %60 : vector<64x1xf32>
    %62 = vector.broadcast %1 : vector<1x128xf32> to vector<64x128xf32>
    %63 = vector.broadcast %61 : vector<64x1xf32> to vector<64x128xf32>
    %64 = arith.mulf %62, %63 : vector<64x128xf32>
    %cst_21 = arith.constant 9.99999993E-9 : f32
    %65 = vector.broadcast %cst_21 : f32 to vector<64x128xf32>
    %66 = arith.maximumf %64, %65 : vector<64x128xf32>
    %67 = arith.divf %57, %66 : vector<64x128xf32>
    %68 = vector.broadcast %28 : vector<64x1xf32> to vector<64x128xf32>
    %69 = arith.mulf %67, %68 : vector<64x128xf32>
    %cst_22 = arith.constant dense<0xFF800000> : vector<64xf32>
    %70 = vector.multi_reduction <maximumf>, %69, %cst_22 [1] : vector<64x128xf32> to vector<64xf32>
    %71 = vector.shape_cast %70 : vector<64xf32> to vector<64x1xf32>
    %72 = vector.broadcast %71 : vector<64x1xf32> to vector<64x128xf32>
    %73 = arith.subf %69, %72 : vector<64x128xf32>
    %74 = math.exp %73 : vector<64x128xf32>
    %cst_23 = arith.constant dense<0.000000e+00> : vector<64xf32>
    %75 = vector.multi_reduction <add>, %74, %cst_23 [1] : vector<64x128xf32> to vector<64xf32>
    %76 = vector.shape_cast %75 : vector<64xf32> to vector<64x1xf32>
    %77 = vector.broadcast %76 : vector<64x1xf32> to vector<64x128xf32>
    %78 = arith.divf %74, %77 : vector<64x128xf32>
    %79 = vector.extract_strided_slice %46 {offsets = [0, 0], sizes = [64, 1], strides = [1, 1]} : vector<64x3xf32> to vector<64x1xf32>
    %80 = vector.extract_strided_slice %46 {offsets = [0, 1], sizes = [64, 1], strides = [1, 1]} : vector<64x3xf32> to vector<64x1xf32>
    %81 = vector.extract_strided_slice %46 {offsets = [0, 2], sizes = [64, 1], strides = [1, 1]} : vector<64x3xf32> to vector<64x1xf32>
    %cst_24 = arith.constant 1.000000e+00 : f32
    %82 = vector.broadcast %cst_24 : f32 to vector<64x1xf32>
    %83 = arith.subf %82, %36 : vector<64x1xf32>
    %84 = vector.broadcast %36 : vector<64x1xf32> to vector<64x128xf32>
    %85 = arith.mulf %78, %84 : vector<64x128xf32>
    %c127_i32 = arith.constant 127 : i32
    %86 = tpu.dynamic_rotate %85 by %c127_i32 dim 1 : vector<64x128xf32>, i32 -> vector<64x128xf32>
    %87 = vector.broadcast %79 : vector<64x1xf32> to vector<64x128xf32>
    %88 = arith.mulf %87, %86 : vector<64x128xf32>
    %89 = vector.broadcast %80 : vector<64x1xf32> to vector<64x128xf32>
    %90 = arith.mulf %89, %85 : vector<64x128xf32>
    %91 = arith.addf %88, %90 : vector<64x128xf32>
    %c1_i32 = arith.constant 1 : i32
    %92 = tpu.dynamic_rotate %85 by %c1_i32 dim 1 : vector<64x128xf32>, i32 -> vector<64x128xf32>
    %93 = vector.broadcast %81 : vector<64x1xf32> to vector<64x128xf32>
    %94 = arith.mulf %93, %92 : vector<64x128xf32>
    %95 = arith.addf %91, %94 : vector<64x128xf32>
    %96 = vector.extract_strided_slice %83 {offsets = [0, 0], sizes = [8, 1], strides = [1, 1]} : vector<64x1xf32> to vector<8x1xf32>
    %cst_25 = arith.constant 1.000000e+00 : f32
    %97 = vector.broadcast %cst_25 : f32 to vector<8x1xf32>
    %98 = arith.mulf %96, %97 : vector<8x1xf32>
    %99 = vector.extract_strided_slice %79 {offsets = [0, 0], sizes = [8, 1], strides = [1, 1]} : vector<64x1xf32> to vector<8x1xf32>
    %c127_i32_26 = arith.constant 127 : i32
    %100 = tpu.dynamic_rotate %3 by %c127_i32_26 dim 1 : vector<1x128xf32>, i32 -> vector<1x128xf32>
    %101 = vector.broadcast %99 : vector<8x1xf32> to vector<8x128xf32>
    %102 = vector.broadcast %100 : vector<1x128xf32> to vector<8x128xf32>
    %103 = arith.mulf %101, %102 : vector<8x128xf32>
    %104 = vector.extract_strided_slice %80 {offsets = [0, 0], sizes = [8, 1], strides = [1, 1]} : vector<64x1xf32> to vector<8x1xf32>
    %105 = vector.broadcast %104 : vector<8x1xf32> to vector<8x128xf32>
    %106 = vector.broadcast %3 : vector<1x128xf32> to vector<8x128xf32>
    %107 = arith.mulf %105, %106 : vector<8x128xf32>
    %108 = arith.addf %103, %107 : vector<8x128xf32>
    %109 = vector.extract_strided_slice %81 {offsets = [0, 0], sizes = [8, 1], strides = [1, 1]} : vector<64x1xf32> to vector<8x1xf32>
    %c1_i32_27 = arith.constant 1 : i32
    %110 = tpu.dynamic_rotate %3 by %c1_i32_27 dim 1 : vector<1x128xf32>, i32 -> vector<1x128xf32>
    %111 = vector.broadcast %109 : vector<8x1xf32> to vector<8x128xf32>
    %112 = vector.broadcast %110 : vector<1x128xf32> to vector<8x128xf32>
    %113 = arith.mulf %111, %112 : vector<8x128xf32>
    %114 = arith.addf %108, %113 : vector<8x128xf32>
    %115 = vector.extract_strided_slice %95 {offsets = [0, 0], sizes = [8, 128], strides = [1, 1]} : vector<64x128xf32> to vector<8x128xf32>
    %116 = vector.broadcast %98 : vector<8x1xf32> to vector<8x128xf32>
    %117 = arith.mulf %116, %114 : vector<8x128xf32>
    %118 = arith.addf %115, %117 : vector<8x128xf32>
    %119 = vector.extract_strided_slice %56 {offsets = [0, 0], sizes = [8, 1], strides = [1, 1]} : vector<64x1xf32> to vector<8x1xf32>
    %cst_28 = arith.constant 1.000000e-30 : f32
    %120 = vector.broadcast %cst_28 : f32 to vector<8x128xf32>
    %121 = arith.maximumf %118, %120 : vector<8x128xf32>
    %122 = math.log %121 : vector<8x128xf32>
    %123 = vector.broadcast %119 : vector<8x1xf32> to vector<8x128xf32>
    %124 = arith.mulf %123, %122 : vector<8x128xf32>
    %125 = math.exp %124 : vector<8x128xf32>
    %cst_29 = arith.constant dense<0.000000e+00> : vector<8xf32>
    %126 = vector.multi_reduction <add>, %125, %cst_29 [1] : vector<8x128xf32> to vector<8xf32>
    %127 = vector.shape_cast %126 : vector<8xf32> to vector<8x1xf32>
    %cst_30 = arith.constant 9.99999996E-13 : f32
    %128 = vector.broadcast %cst_30 : f32 to vector<8x1xf32>
    %129 = arith.maximumf %127, %128 : vector<8x1xf32>
    %130 = tpu.reciprocal %129 {approx = true} : vector<8x1xf32> -> vector<8x1xf32>
    %131 = vector.extract_strided_slice %83 {offsets = [8, 0], sizes = [8, 1], strides = [1, 1]} : vector<64x1xf32> to vector<8x1xf32>
    %132 = arith.mulf %131, %130 : vector<8x1xf32>
    %133 = vector.extract_strided_slice %79 {offsets = [8, 0], sizes = [8, 1], strides = [1, 1]} : vector<64x1xf32> to vector<8x1xf32>
    %c127_i32_31 = arith.constant 127 : i32
    %134 = tpu.dynamic_rotate %125 by %c127_i32_31 dim 1 : vector<8x128xf32>, i32 -> vector<8x128xf32>
    %135 = vector.broadcast %133 : vector<8x1xf32> to vector<8x128xf32>
    %136 = arith.mulf %135, %134 : vector<8x128xf32>
    %137 = vector.extract_strided_slice %80 {offsets = [8, 0], sizes = [8, 1], strides = [1, 1]} : vector<64x1xf32> to vector<8x1xf32>
    %138 = vector.broadcast %137 : vector<8x1xf32> to vector<8x128xf32>
    %139 = arith.mulf %138, %125 : vector<8x128xf32>
    %140 = arith.addf %136, %139 : vector<8x128xf32>
    %141 = vector.extract_strided_slice %81 {offsets = [8, 0], sizes = [8, 1], strides = [1, 1]} : vector<64x1xf32> to vector<8x1xf32>
    %c1_i32_32 = arith.constant 1 : i32
    %142 = tpu.dynamic_rotate %125 by %c1_i32_32 dim 1 : vector<8x128xf32>, i32 -> vector<8x128xf32>
    %143 = vector.broadcast %141 : vector<8x1xf32> to vector<8x128xf32>
    %144 = arith.mulf %143, %142 : vector<8x128xf32>
    %145 = arith.addf %140, %144 : vector<8x128xf32>
    %146 = vector.extract_strided_slice %95 {offsets = [8, 0], sizes = [8, 128], strides = [1, 1]} : vector<64x128xf32> to vector<8x128xf32>
    %147 = vector.broadcast %132 : vector<8x1xf32> to vector<8x128xf32>
    %148 = arith.mulf %147, %145 : vector<8x128xf32>
    %149 = arith.addf %146, %148 : vector<8x128xf32>
    %150 = vector.extract_strided_slice %56 {offsets = [8, 0], sizes = [8, 1], strides = [1, 1]} : vector<64x1xf32> to vector<8x1xf32>
    %cst_33 = arith.constant 1.000000e-30 : f32
    %151 = vector.broadcast %cst_33 : f32 to vector<8x128xf32>
    %152 = arith.maximumf %149, %151 : vector<8x128xf32>
    %153 = math.log %152 : vector<8x128xf32>
    %154 = vector.broadcast %150 : vector<8x1xf32> to vector<8x128xf32>
    %155 = arith.mulf %154, %153 : vector<8x128xf32>
    %156 = math.exp %155 : vector<8x128xf32>
    %cst_34 = arith.constant dense<0.000000e+00> : vector<8xf32>
    %157 = vector.multi_reduction <add>, %156, %cst_34 [1] : vector<8x128xf32> to vector<8xf32>
    %158 = vector.shape_cast %157 : vector<8xf32> to vector<8x1xf32>
    %cst_35 = arith.constant 9.99999996E-13 : f32
    %159 = vector.broadcast %cst_35 : f32 to vector<8x1xf32>
    %160 = arith.maximumf %158, %159 : vector<8x1xf32>
    %161 = tpu.reciprocal %160 {approx = true} : vector<8x1xf32> -> vector<8x1xf32>
    %162 = vector.extract_strided_slice %83 {offsets = [16, 0], sizes = [8, 1], strides = [1, 1]} : vector<64x1xf32> to vector<8x1xf32>
    %163 = arith.mulf %162, %161 : vector<8x1xf32>
    %164 = vector.extract_strided_slice %79 {offsets = [16, 0], sizes = [8, 1], strides = [1, 1]} : vector<64x1xf32> to vector<8x1xf32>
    %c127_i32_36 = arith.constant 127 : i32
    %165 = tpu.dynamic_rotate %156 by %c127_i32_36 dim 1 : vector<8x128xf32>, i32 -> vector<8x128xf32>
    %166 = vector.broadcast %164 : vector<8x1xf32> to vector<8x128xf32>
    %167 = arith.mulf %166, %165 : vector<8x128xf32>
    %168 = vector.extract_strided_slice %80 {offsets = [16, 0], sizes = [8, 1], strides = [1, 1]} : vector<64x1xf32> to vector<8x1xf32>
    %169 = vector.broadcast %168 : vector<8x1xf32> to vector<8x128xf32>
    %170 = arith.mulf %169, %156 : vector<8x128xf32>
    %171 = arith.addf %167, %170 : vector<8x128xf32>
    %172 = vector.extract_strided_slice %81 {offsets = [16, 0], sizes = [8, 1], strides = [1, 1]} : vector<64x1xf32> to vector<8x1xf32>
    %c1_i32_37 = arith.constant 1 : i32
    %173 = tpu.dynamic_rotate %156 by %c1_i32_37 dim 1 : vector<8x128xf32>, i32 -> vector<8x128xf32>
    %174 = vector.broadcast %172 : vector<8x1xf32> to vector<8x128xf32>
    %175 = arith.mulf %174, %173 : vector<8x128xf32>
    %176 = arith.addf %171, %175 : vector<8x128xf32>
    %177 = vector.extract_strided_slice %95 {offsets = [16, 0], sizes = [8, 128], strides = [1, 1]} : vector<64x128xf32> to vector<8x128xf32>
    %178 = vector.broadcast %163 : vector<8x1xf32> to vector<8x128xf32>
    %179 = arith.mulf %178, %176 : vector<8x128xf32>
    %180 = arith.addf %177, %179 : vector<8x128xf32>
    %181 = vector.extract_strided_slice %56 {offsets = [16, 0], sizes = [8, 1], strides = [1, 1]} : vector<64x1xf32> to vector<8x1xf32>
    %cst_38 = arith.constant 1.000000e-30 : f32
    %182 = vector.broadcast %cst_38 : f32 to vector<8x128xf32>
    %183 = arith.maximumf %180, %182 : vector<8x128xf32>
    %184 = math.log %183 : vector<8x128xf32>
    %185 = vector.broadcast %181 : vector<8x1xf32> to vector<8x128xf32>
    %186 = arith.mulf %185, %184 : vector<8x128xf32>
    %187 = math.exp %186 : vector<8x128xf32>
    %cst_39 = arith.constant dense<0.000000e+00> : vector<8xf32>
    %188 = vector.multi_reduction <add>, %187, %cst_39 [1] : vector<8x128xf32> to vector<8xf32>
    %189 = vector.shape_cast %188 : vector<8xf32> to vector<8x1xf32>
    %cst_40 = arith.constant 9.99999996E-13 : f32
    %190 = vector.broadcast %cst_40 : f32 to vector<8x1xf32>
    %191 = arith.maximumf %189, %190 : vector<8x1xf32>
    %192 = tpu.reciprocal %191 {approx = true} : vector<8x1xf32> -> vector<8x1xf32>
    %193 = vector.extract_strided_slice %83 {offsets = [24, 0], sizes = [8, 1], strides = [1, 1]} : vector<64x1xf32> to vector<8x1xf32>
    %194 = arith.mulf %193, %192 : vector<8x1xf32>
    %195 = vector.extract_strided_slice %79 {offsets = [24, 0], sizes = [8, 1], strides = [1, 1]} : vector<64x1xf32> to vector<8x1xf32>
    %c127_i32_41 = arith.constant 127 : i32
    %196 = tpu.dynamic_rotate %187 by %c127_i32_41 dim 1 : vector<8x128xf32>, i32 -> vector<8x128xf32>
    %197 = vector.broadcast %195 : vector<8x1xf32> to vector<8x128xf32>
    %198 = arith.mulf %197, %196 : vector<8x128xf32>
    %199 = vector.extract_strided_slice %80 {offsets = [24, 0], sizes = [8, 1], strides = [1, 1]} : vector<64x1xf32> to vector<8x1xf32>
    %200 = vector.broadcast %199 : vector<8x1xf32> to vector<8x128xf32>
    %201 = arith.mulf %200, %187 : vector<8x128xf32>
    %202 = arith.addf %198, %201 : vector<8x128xf32>
    %203 = vector.extract_strided_slice %81 {offsets = [24, 0], sizes = [8, 1], strides = [1, 1]} : vector<64x1xf32> to vector<8x1xf32>
    %c1_i32_42 = arith.constant 1 : i32
    %204 = tpu.dynamic_rotate %187 by %c1_i32_42 dim 1 : vector<8x128xf32>, i32 -> vector<8x128xf32>
    %205 = vector.broadcast %203 : vector<8x1xf32> to vector<8x128xf32>
    %206 = arith.mulf %205, %204 : vector<8x128xf32>
    %207 = arith.addf %202, %206 : vector<8x128xf32>
    %208 = vector.extract_strided_slice %95 {offsets = [24, 0], sizes = [8, 128], strides = [1, 1]} : vector<64x128xf32> to vector<8x128xf32>
    %209 = vector.broadcast %194 : vector<8x1xf32> to vector<8x128xf32>
    %210 = arith.mulf %209, %207 : vector<8x128xf32>
    %211 = arith.addf %208, %210 : vector<8x128xf32>
    %212 = vector.extract_strided_slice %56 {offsets = [24, 0], sizes = [8, 1], strides = [1, 1]} : vector<64x1xf32> to vector<8x1xf32>
    %cst_43 = arith.constant 1.000000e-30 : f32
    %213 = vector.broadcast %cst_43 : f32 to vector<8x128xf32>
    %214 = arith.maximumf %211, %213 : vector<8x128xf32>
    %215 = math.log %214 : vector<8x128xf32>
    %216 = vector.broadcast %212 : vector<8x1xf32> to vector<8x128xf32>
    %217 = arith.mulf %216, %215 : vector<8x128xf32>
    %218 = math.exp %217 : vector<8x128xf32>
    %cst_44 = arith.constant dense<0.000000e+00> : vector<8xf32>
    %219 = vector.multi_reduction <add>, %218, %cst_44 [1] : vector<8x128xf32> to vector<8xf32>
    %220 = vector.shape_cast %219 : vector<8xf32> to vector<8x1xf32>
    %cst_45 = arith.constant 9.99999996E-13 : f32
    %221 = vector.broadcast %cst_45 : f32 to vector<8x1xf32>
    %222 = arith.maximumf %220, %221 : vector<8x1xf32>
    %223 = tpu.reciprocal %222 {approx = true} : vector<8x1xf32> -> vector<8x1xf32>
    %224 = vector.extract_strided_slice %83 {offsets = [32, 0], sizes = [8, 1], strides = [1, 1]} : vector<64x1xf32> to vector<8x1xf32>
    %225 = arith.mulf %224, %223 : vector<8x1xf32>
    %226 = vector.extract_strided_slice %79 {offsets = [32, 0], sizes = [8, 1], strides = [1, 1]} : vector<64x1xf32> to vector<8x1xf32>
    %c127_i32_46 = arith.constant 127 : i32
    %227 = tpu.dynamic_rotate %218 by %c127_i32_46 dim 1 : vector<8x128xf32>, i32 -> vector<8x128xf32>
    %228 = vector.broadcast %226 : vector<8x1xf32> to vector<8x128xf32>
    %229 = arith.mulf %228, %227 : vector<8x128xf32>
    %230 = vector.extract_strided_slice %80 {offsets = [32, 0], sizes = [8, 1], strides = [1, 1]} : vector<64x1xf32> to vector<8x1xf32>
    %231 = vector.broadcast %230 : vector<8x1xf32> to vector<8x128xf32>
    %232 = arith.mulf %231, %218 : vector<8x128xf32>
    %233 = arith.addf %229, %232 : vector<8x128xf32>
    %234 = vector.extract_strided_slice %81 {offsets = [32, 0], sizes = [8, 1], strides = [1, 1]} : vector<64x1xf32> to vector<8x1xf32>
    %c1_i32_47 = arith.constant 1 : i32
    %235 = tpu.dynamic_rotate %218 by %c1_i32_47 dim 1 : vector<8x128xf32>, i32 -> vector<8x128xf32>
    %236 = vector.broadcast %234 : vector<8x1xf32> to vector<8x128xf32>
    %237 = arith.mulf %236, %235 : vector<8x128xf32>
    %238 = arith.addf %233, %237 : vector<8x128xf32>
    %239 = vector.extract_strided_slice %95 {offsets = [32, 0], sizes = [8, 128], strides = [1, 1]} : vector<64x128xf32> to vector<8x128xf32>
    %240 = vector.broadcast %225 : vector<8x1xf32> to vector<8x128xf32>
    %241 = arith.mulf %240, %238 : vector<8x128xf32>
    %242 = arith.addf %239, %241 : vector<8x128xf32>
    %243 = vector.extract_strided_slice %56 {offsets = [32, 0], sizes = [8, 1], strides = [1, 1]} : vector<64x1xf32> to vector<8x1xf32>
    %cst_48 = arith.constant 1.000000e-30 : f32
    %244 = vector.broadcast %cst_48 : f32 to vector<8x128xf32>
    %245 = arith.maximumf %242, %244 : vector<8x128xf32>
    %246 = math.log %245 : vector<8x128xf32>
    %247 = vector.broadcast %243 : vector<8x1xf32> to vector<8x128xf32>
    %248 = arith.mulf %247, %246 : vector<8x128xf32>
    %249 = math.exp %248 : vector<8x128xf32>
    %cst_49 = arith.constant dense<0.000000e+00> : vector<8xf32>
    %250 = vector.multi_reduction <add>, %249, %cst_49 [1] : vector<8x128xf32> to vector<8xf32>
    %251 = vector.shape_cast %250 : vector<8xf32> to vector<8x1xf32>
    %cst_50 = arith.constant 9.99999996E-13 : f32
    %252 = vector.broadcast %cst_50 : f32 to vector<8x1xf32>
    %253 = arith.maximumf %251, %252 : vector<8x1xf32>
    %254 = tpu.reciprocal %253 {approx = true} : vector<8x1xf32> -> vector<8x1xf32>
    %255 = vector.extract_strided_slice %83 {offsets = [40, 0], sizes = [8, 1], strides = [1, 1]} : vector<64x1xf32> to vector<8x1xf32>
    %256 = arith.mulf %255, %254 : vector<8x1xf32>
    %257 = vector.extract_strided_slice %79 {offsets = [40, 0], sizes = [8, 1], strides = [1, 1]} : vector<64x1xf32> to vector<8x1xf32>
    %c127_i32_51 = arith.constant 127 : i32
    %258 = tpu.dynamic_rotate %249 by %c127_i32_51 dim 1 : vector<8x128xf32>, i32 -> vector<8x128xf32>
    %259 = vector.broadcast %257 : vector<8x1xf32> to vector<8x128xf32>
    %260 = arith.mulf %259, %258 : vector<8x128xf32>
    %261 = vector.extract_strided_slice %80 {offsets = [40, 0], sizes = [8, 1], strides = [1, 1]} : vector<64x1xf32> to vector<8x1xf32>
    %262 = vector.broadcast %261 : vector<8x1xf32> to vector<8x128xf32>
    %263 = arith.mulf %262, %249 : vector<8x128xf32>
    %264 = arith.addf %260, %263 : vector<8x128xf32>
    %265 = vector.extract_strided_slice %81 {offsets = [40, 0], sizes = [8, 1], strides = [1, 1]} : vector<64x1xf32> to vector<8x1xf32>
    %c1_i32_52 = arith.constant 1 : i32
    %266 = tpu.dynamic_rotate %249 by %c1_i32_52 dim 1 : vector<8x128xf32>, i32 -> vector<8x128xf32>
    %267 = vector.broadcast %265 : vector<8x1xf32> to vector<8x128xf32>
    %268 = arith.mulf %267, %266 : vector<8x128xf32>
    %269 = arith.addf %264, %268 : vector<8x128xf32>
    %270 = vector.extract_strided_slice %95 {offsets = [40, 0], sizes = [8, 128], strides = [1, 1]} : vector<64x128xf32> to vector<8x128xf32>
    %271 = vector.broadcast %256 : vector<8x1xf32> to vector<8x128xf32>
    %272 = arith.mulf %271, %269 : vector<8x128xf32>
    %273 = arith.addf %270, %272 : vector<8x128xf32>
    %274 = vector.extract_strided_slice %56 {offsets = [40, 0], sizes = [8, 1], strides = [1, 1]} : vector<64x1xf32> to vector<8x1xf32>
    %cst_53 = arith.constant 1.000000e-30 : f32
    %275 = vector.broadcast %cst_53 : f32 to vector<8x128xf32>
    %276 = arith.maximumf %273, %275 : vector<8x128xf32>
    %277 = math.log %276 : vector<8x128xf32>
    %278 = vector.broadcast %274 : vector<8x1xf32> to vector<8x128xf32>
    %279 = arith.mulf %278, %277 : vector<8x128xf32>
    %280 = math.exp %279 : vector<8x128xf32>
    %cst_54 = arith.constant dense<0.000000e+00> : vector<8xf32>
    %281 = vector.multi_reduction <add>, %280, %cst_54 [1] : vector<8x128xf32> to vector<8xf32>
    %282 = vector.shape_cast %281 : vector<8xf32> to vector<8x1xf32>
    %cst_55 = arith.constant 9.99999996E-13 : f32
    %283 = vector.broadcast %cst_55 : f32 to vector<8x1xf32>
    %284 = arith.maximumf %282, %283 : vector<8x1xf32>
    %285 = tpu.reciprocal %284 {approx = true} : vector<8x1xf32> -> vector<8x1xf32>
    %286 = vector.extract_strided_slice %83 {offsets = [48, 0], sizes = [8, 1], strides = [1, 1]} : vector<64x1xf32> to vector<8x1xf32>
    %287 = arith.mulf %286, %285 : vector<8x1xf32>
    %288 = vector.extract_strided_slice %79 {offsets = [48, 0], sizes = [8, 1], strides = [1, 1]} : vector<64x1xf32> to vector<8x1xf32>
    %c127_i32_56 = arith.constant 127 : i32
    %289 = tpu.dynamic_rotate %280 by %c127_i32_56 dim 1 : vector<8x128xf32>, i32 -> vector<8x128xf32>
    %290 = vector.broadcast %288 : vector<8x1xf32> to vector<8x128xf32>
    %291 = arith.mulf %290, %289 : vector<8x128xf32>
    %292 = vector.extract_strided_slice %80 {offsets = [48, 0], sizes = [8, 1], strides = [1, 1]} : vector<64x1xf32> to vector<8x1xf32>
    %293 = vector.broadcast %292 : vector<8x1xf32> to vector<8x128xf32>
    %294 = arith.mulf %293, %280 : vector<8x128xf32>
    %295 = arith.addf %291, %294 : vector<8x128xf32>
    %296 = vector.extract_strided_slice %81 {offsets = [48, 0], sizes = [8, 1], strides = [1, 1]} : vector<64x1xf32> to vector<8x1xf32>
    %c1_i32_57 = arith.constant 1 : i32
    %297 = tpu.dynamic_rotate %280 by %c1_i32_57 dim 1 : vector<8x128xf32>, i32 -> vector<8x128xf32>
    %298 = vector.broadcast %296 : vector<8x1xf32> to vector<8x128xf32>
    %299 = arith.mulf %298, %297 : vector<8x128xf32>
    %300 = arith.addf %295, %299 : vector<8x128xf32>
    %301 = vector.extract_strided_slice %95 {offsets = [48, 0], sizes = [8, 128], strides = [1, 1]} : vector<64x128xf32> to vector<8x128xf32>
    %302 = vector.broadcast %287 : vector<8x1xf32> to vector<8x128xf32>
    %303 = arith.mulf %302, %300 : vector<8x128xf32>
    %304 = arith.addf %301, %303 : vector<8x128xf32>
    %305 = vector.extract_strided_slice %56 {offsets = [48, 0], sizes = [8, 1], strides = [1, 1]} : vector<64x1xf32> to vector<8x1xf32>
    %cst_58 = arith.constant 1.000000e-30 : f32
    %306 = vector.broadcast %cst_58 : f32 to vector<8x128xf32>
    %307 = arith.maximumf %304, %306 : vector<8x128xf32>
    %308 = math.log %307 : vector<8x128xf32>
    %309 = vector.broadcast %305 : vector<8x1xf32> to vector<8x128xf32>
    %310 = arith.mulf %309, %308 : vector<8x128xf32>
    %311 = math.exp %310 : vector<8x128xf32>
    %cst_59 = arith.constant dense<0.000000e+00> : vector<8xf32>
    %312 = vector.multi_reduction <add>, %311, %cst_59 [1] : vector<8x128xf32> to vector<8xf32>
    %313 = vector.shape_cast %312 : vector<8xf32> to vector<8x1xf32>
    %cst_60 = arith.constant 9.99999996E-13 : f32
    %314 = vector.broadcast %cst_60 : f32 to vector<8x1xf32>
    %315 = arith.maximumf %313, %314 : vector<8x1xf32>
    %316 = tpu.reciprocal %315 {approx = true} : vector<8x1xf32> -> vector<8x1xf32>
    %317 = vector.extract_strided_slice %83 {offsets = [56, 0], sizes = [8, 1], strides = [1, 1]} : vector<64x1xf32> to vector<8x1xf32>
    %318 = arith.mulf %317, %316 : vector<8x1xf32>
    %319 = vector.extract_strided_slice %79 {offsets = [56, 0], sizes = [8, 1], strides = [1, 1]} : vector<64x1xf32> to vector<8x1xf32>
    %c127_i32_61 = arith.constant 127 : i32
    %320 = tpu.dynamic_rotate %311 by %c127_i32_61 dim 1 : vector<8x128xf32>, i32 -> vector<8x128xf32>
    %321 = vector.broadcast %319 : vector<8x1xf32> to vector<8x128xf32>
    %322 = arith.mulf %321, %320 : vector<8x128xf32>
    %323 = vector.extract_strided_slice %80 {offsets = [56, 0], sizes = [8, 1], strides = [1, 1]} : vector<64x1xf32> to vector<8x1xf32>
    %324 = vector.broadcast %323 : vector<8x1xf32> to vector<8x128xf32>
    %325 = arith.mulf %324, %311 : vector<8x128xf32>
    %326 = arith.addf %322, %325 : vector<8x128xf32>
    %327 = vector.extract_strided_slice %81 {offsets = [56, 0], sizes = [8, 1], strides = [1, 1]} : vector<64x1xf32> to vector<8x1xf32>
    %c1_i32_62 = arith.constant 1 : i32
    %328 = tpu.dynamic_rotate %311 by %c1_i32_62 dim 1 : vector<8x128xf32>, i32 -> vector<8x128xf32>
    %329 = vector.broadcast %327 : vector<8x1xf32> to vector<8x128xf32>
    %330 = arith.mulf %329, %328 : vector<8x128xf32>
    %331 = arith.addf %326, %330 : vector<8x128xf32>
    %332 = vector.extract_strided_slice %95 {offsets = [56, 0], sizes = [8, 128], strides = [1, 1]} : vector<64x128xf32> to vector<8x128xf32>
    %333 = vector.broadcast %318 : vector<8x1xf32> to vector<8x128xf32>
    %334 = arith.mulf %333, %331 : vector<8x128xf32>
    %335 = arith.addf %332, %334 : vector<8x128xf32>
    %336 = vector.extract_strided_slice %56 {offsets = [56, 0], sizes = [8, 1], strides = [1, 1]} : vector<64x1xf32> to vector<8x1xf32>
    %cst_63 = arith.constant 1.000000e-30 : f32
    %337 = vector.broadcast %cst_63 : f32 to vector<8x128xf32>
    %338 = arith.maximumf %335, %337 : vector<8x128xf32>
    %339 = math.log %338 : vector<8x128xf32>
    %340 = vector.broadcast %336 : vector<8x1xf32> to vector<8x128xf32>
    %341 = arith.mulf %340, %339 : vector<8x128xf32>
    %342 = math.exp %341 : vector<8x128xf32>
    %cst_64 = arith.constant dense<0.000000e+00> : vector<8xf32>
    %343 = vector.multi_reduction <add>, %342, %cst_64 [1] : vector<8x128xf32> to vector<8xf32>
    %344 = vector.shape_cast %343 : vector<8xf32> to vector<8x1xf32>
    %cst_65 = arith.constant 9.99999996E-13 : f32
    %345 = vector.broadcast %cst_65 : f32 to vector<8x1xf32>
    %346 = arith.maximumf %344, %345 : vector<8x1xf32>
    %347 = tpu.reciprocal %346 {approx = true} : vector<8x1xf32> -> vector<8x1xf32>
    %348 = tpu.concatenate %125, %156, %187, %218, %249, %280, %311, %342 in 0 : vector<8x128xf32>, vector<8x128xf32>, vector<8x128xf32>, vector<8x128xf32>, vector<8x128xf32>, vector<8x128xf32>, vector<8x128xf32>, vector<8x128xf32> -> vector<64x128xf32>
    %349 = tpu.concatenate %130, %161, %192, %223, %254, %285, %316, %347 in 0 : vector<8x1xf32>, vector<8x1xf32>, vector<8x1xf32>, vector<8x1xf32>, vector<8x1xf32>, vector<8x1xf32>, vector<8x1xf32>, vector<8x1xf32> -> vector<64x1xf32>
    %350 = vector.broadcast %2 : vector<1x128xf32> to vector<64x128xf32>
    %351 = arith.mulf %348, %350 : vector<64x128xf32>
    %cst_66 = arith.constant dense<0.000000e+00> : vector<64xf32>
    %352 = vector.multi_reduction <add>, %351, %cst_66 [1] : vector<64x128xf32> to vector<64xf32>
    %353 = vector.shape_cast %352 : vector<64xf32> to vector<64x1xf32>
    %354 = arith.mulf %353, %349 : vector<64x1xf32>
    %355 = vector.broadcast %7 : vector<1x1xf32> to vector<64x1xf32>
    %356 = arith.addf %354, %355 : vector<64x1xf32>
    %cst_67 = arith.constant 0.000000e+00 : f32
    %357 = vector.broadcast %cst_67 : f32 to vector<64x1xf32>
    %358 = arith.subf %357, %356 : vector<64x1xf32>
    %359 = math.exp %358 : vector<64x1xf32>
    %cst_68 = arith.constant 1.000000e+00 : f32
    %360 = vector.broadcast %cst_68 : f32 to vector<64x1xf32>
    %361 = arith.addf %360, %359 : vector<64x1xf32>
    %cst_69 = arith.constant 1.000000e+00 : f32
    %362 = vector.broadcast %cst_69 : f32 to vector<64x1xf32>
    %363 = arith.divf %362, %361 : vector<64x1xf32>
    %c0_70 = arith.constant 0 : index
    %c0_71 = arith.constant 0 : index
    %364 = vector.load %arg3[%c0_70, %c0_71] : memref<64x1xf32, #tpu.memory_space<vmem>>, vector<64x1xf32>
    tpu.vector_store %arg3[%c0_70, %c0_71], %363 {strides = array<i32>} : memref<64x1xf32, #tpu.memory_space<vmem>>, vector<64x1xf32>,
    return
  }
  func.func @transform_0(%arg0: i32) -> (i32, i32) {
    %c0_i32 = arith.constant 0 : i32
    %c0_i32_0 = arith.constant 0 : i32
    return %arg0, %c0_i32 : i32, i32
  }
  func.func @transform_1(%arg0: i32) -> (i32, i32) {
    %c0_i32 = arith.constant 0 : i32
    %c0_i32_0 = arith.constant 0 : i32
    %c0_i32_1 = arith.constant 0 : i32
    return %c0_i32, %c0_i32_0 : i32, i32
  }
  func.func @transform_2(%arg0: i32) -> (i32, i32) {
    %c0_i32 = arith.constant 0 : i32
    %c0_i32_0 = arith.constant 0 : i32
    return %arg0, %c0_i32 : i32, i32
  }
}

</mosaic_0001>

<bundles_post_ra>
// kernel: ntm_forward_batched.1
= control target key start
LH: loop header
LB: loop body
LE: loop exit
PB: predicated region body
PF: predicated region fallthrough
CT: control target
= control target key end

     0   :  { %s2479_s9 = smov 0   ;;  %s3274_s0 = inlined_call_operand.vmem [shape: f32[128,2], index: 0, kind: input, shape index: {}]   ;;  %s3275_s1 = inlined_call_operand.vmem [shape: f32[27,128], index: 1, kind: input, shape index: {}]   ;;  %s3276_s2 = inlined_call_operand.vmem [shape: f32[128,1], index: 2, kind: output, shape index: {}]  }
   0x1 LB: > { %s2078_s10 = sadd.s32 4294967295, %s2451_s9   ;;  %p2082_p0 = scmp.ge.s32.totalorder %s2451_s9, 1  ;;  %s2451_s9 = sphi %s2479_s9, %s12_s9  }
   0x2   : > { %p113_p1 = scmp.lt.s32.totalorder %s2451_s9, 3 }
   0x4   : > { %p114_p2 = pnand %p2082_p0, %p113_p1 }
   0x5   : > { %s2083_s11 = sshll.u32 (!%p114_p2), %s2078_s10, 3  ;;  %s2455_s18 = smov (!%p114_p2), 1  }
   0x6   : > { %117 = sbr.rel (%p114_p2) target bundleno = 3430 (0xd66), region = 28  ;;  %p136_p3 = scmp.lt.s32.totalorder (!%p114_p2), %s2083_s11, 15 }
   0x7   : > { %s2456_s19 = smov (!%p114_p2), 127   ;;  %s2460_s4 = smov (!%p114_p2), 106  }
   0xb   : > { %v2453_v0 = vmov 0   ;;  %v2454_v1 = vmov 1   ;;  %s3280_s11 = smov (!%p136_p3, %s2083_s11), 15  ;;  %v152_v4 = vld [vmem:[%s3275_s1 + $0x16] sm:$0x1]  ;;  %vm795_vm0 = vcmask 1043456  }
   0xc   : > { %2126 = vset.pattern.permute.xlu0 %v2453_v0  ;;  %2128 = vset.pattern.permute.xlu1 %v2453_v0  ;;  %s2084_s12 = sshll.u32 %s3280_s11, 3  ;;  %v149_v6 = vld [vmem:[%s3275_s1 + $0x10] sm:$0xf]  ;;  %v148_v7 = vld [vmem:[%s3275_s1 + $0x8] sm:$0xff]  ;;  %v147_v8 = vld [vmem:[%s3275_s1] sm:$0xff]  ;;  %v2457_v10 = vmov 25  }
   0xd   : > { %2129 = vset.pattern.permute.xlu2 %v2454_v1  ;;  %s2498_s15 = scalar_lea.vmem %s3274_s0, %s2084_s12  ;;  %2087 = vmatpush.msk.msra.mxu0 %vm795_vm0, %v149_v6  ;;  %v2523_v11 = vld [vmem:[%s3275_s1 + $0x18] ss:$0 sm:$0xff]  ;;  %v2528_v12 = vld [vmem:[%s3275_s1 + $0x17] ss:$0 sm:$0xff]  ;;  %v2535_v17 = vld [vmem:[%s3275_s1 + $0x19] ss:$0 sm:$0xff]  ;;  %s3224_s28 = scalar_lea.vmem %s3276_s2, %s2084_s12 }
   0xe   : > { %v157_v2 = vld [vmem:[%s2498_s15] sm:$0xff]  ;;  %v158_v3 = vld [vmem:[%s2498_s15 + $0x8] sm:$0xff]  ;;  %v159_v5 = vld [vmem:[%s2498_s15 + $0x10] sm:$0xff]  ;;  %2098 = vmatpush.msk.msra.mxu1 %vm795_vm0, %v149_v6  ;;  %2099 = vmatpush.msk.msra.mxu2 %vm795_vm0, %v149_v6  ;;  %v2458_v25 = vmov 20   ;;  %vm770_vm1 = vcmask 162816   ;;  %vm536_vm2 = vcmask 203952  }
   0xf   : > { %167 = vperm.xlu0 %2126, %v157_v2   ;;  %172 = vperm.xlu1 %2128, %v158_v3  }
  0x10   : > { %219 = vperm.xlu2 %2129, %v158_v3   ;;  %2100 = vmatpush.msk.msra.mxu3 %vm795_vm0, %v149_v6 }
  0x11   : > { %813 = vmatpush.msra.mxu0 %v148_v7  ;;  %2101 = vmatpush.msra.mxu1 %v148_v7 }
  0x12   : > { %2102 = vmatpush.msra.mxu2 %v148_v7  ;;  %2103 = vmatpush.msra.mxu3 %v148_v7 }
  0x13   : > { %814 = vmatpush.msra.mxu0 %v147_v8  ;;  %2104 = vmatpush.msra.mxu1 %v147_v8 }
  0x14   : > { %2105 = vmatpush.msra.mxu2 %v147_v8  ;;  %2106 = vmatpush.msra.mxu3 %v147_v8 }
  0x17   : > { %2127 = vset.pattern.permute.xlu0 %v2454_v1  ;;  %1568 = vrot.lane.b32.xlu1 %v152_v4, %s2455_s18 }
  0x18   : > { %215 = vperm.xlu0 %2127, %v157_v2   ;;  %223 = vperm.xlu2 %2129, %v159_v5  }
  0x20   : > { %2130 = vset.pattern.permute.xlu0 %v2453_v0  ;;  %2131 = vset.pattern.permute.xlu2 %v2458_v25 }
  0x21   : > { %177 = vperm.xlu0 %2130, %v159_v5  }
  0x29   : > { %1561 = vrot.lane.b32.xlu0 %v152_v4, %s2456_s19 }
  0x2a   : > { %2134 = vset.pattern.permute.xlu0 %v2457_v10 }
  0x6a   : > { %v220_v9 = vpop.permute.xlu2 %219 }
  0x6b   : > { %v248_v13 = vmul.f32 %v2523_v11, %v220_v9 }
  0x72   : > { %v224_v28 = vpop.permute.xlu2 %223 }
  0x73   : > { %v249_v33 = vmul.f32 %v2523_v11, %v224_v28  ;;  %v160_v28 = vld [vmem:[%s2498_s15 + $0x18] sm:$0xff] }
  0x81   : > { %v168_v14 = vpop.permute.xlu0 %167  ;;  %v173_v15 = vpop.permute.xlu1 %172 }
  0x82   : > { %v207_v16 = vmul.f32 %v2528_v12, %v173_v15  ;;  %v206_v23 = vmul.f32 %v2528_v12, %v168_v14 }
  0x84   : > { %v256_v18 = vadd.f32 %v248_v13, %v207_v16 }
  0x86   : > { %v2538_v19 = vadd.f32 %v2535_v17, %v256_v18 }
  0x88   : > { %v385_v20 = vsub.f32 0.0, %v2538_v19  ;;  %v281_v39 = vmin.f32 %v2538_v19, 20.0  ;;  %v841_v41 = vmul.f32 %v2538_v19, %v2538_v19  ;;  %v540_v43 = vsel %vm536_vm2, %v2538_v19, -inf }
  0x89   : > { %vm273_vm13 = vcmp.gt.f32.partialorder %v2538_v19, 20.0 }
  0x8a   : > { %v216_v21 = vpop.permute.xlu0 %215  ;;  %v394_v22 = vmul.f32 1.442695, %v385_v20  ;;  %v290_v45 = vmul.f32 1.442695, %v281_v39  ;;  %v851_v47 = vsel %vm770_vm1, %v841_v41, 0.0 }
  0x8b   : > { %v247_v24 = vmul.f32 %v2523_v11, %v216_v21 }
  0x8c   : > { %2200 = vpow2.f32 %v394_v22 }
  0x8d   : > { %v255_v26 = vadd.f32 %v247_v24, %v206_v23 }
  0x8f   : > { %v2545_v27 = vadd.f32 %v2535_v17, %v255_v26 }
  0x91   : > { %v280_v29 = vmin.f32 %v2545_v27, 20.0  ;;  %2088 = vmatmul.msk.f32.vlgmr.msra.gmra.mxu0 %vm770_vm1, %v2545_v27  ;;  %v537_v30 = vsel %vm536_vm2, %v2545_v27, -inf  ;;  %v840_v31 = vmul.f32 %v2545_v27, %v2545_v27  ;;  %v384_v40 = vsub.f32 0.0, %v2545_v27 }
  0x92   : > { %v2201_v32 = vpop.eup %2200  ;;  %538 = vmax.xlane.f32.xlu2 %v537_v30  ;;  %vm272_vm4 = vcmp.gt.f32.partialorder %v2545_v27, 20.0 }
  0x93   : > { %v288_v34 = vmul.f32 1.442695, %v280_v29  ;;  %v848_v35 = vsel %vm770_vm1, %v840_v31, 0.0  ;;  %v178_v36 = vpop.permute.xlu0 %177  ;;  %v409_v37 = vadd.f32 1.0, %v2201_v32  ;;  %v392_v46 = vmul.f32 1.442695, %v384_v40 }
  0x94   : > { %849 = vadd.xlane.f32.xlu1 %v848_v35  ;;  %v208_v38 = vmul.f32 %v2528_v12, %v178_v36  ;;  %v2459_v32 = vmov 21  }
  0x95   : > { %2202 = vpow2.f32 %v288_v34  ;;  %vm436_vm5 = vweird.f32 %v409_v37  ;;  %v442_v6 = vand.u32 2147483648, %v409_v37  ;;  %v440_v8 = vand.u32 2147483647, %v409_v37 }
  0x96   : > { %v257_v42 = vadd.f32 %v249_v33, %v208_v38  ;;  %2204 = vrcp.f32 %v409_v37 }
  0x97   : > { %2206 = vpow2.f32 %v392_v46  ;;  %v443_v15 = vor.u32 1.1754944e-38, %v442_v6  ;;  %vm441_vm8 = vcmp.eq.f32.partialorder %v440_v8, 8.507059e+37 }
  0x98   : > { %v2564_v44 = vadd.f32 %v2535_v17, %v257_v42  ;;  %2208 = vpow2.f32 %v290_v45 }
  0x99   : > { %2089 = vmatmul.msk.f32.gmra.mxu0 %vm770_vm1, %v2538_v19 }
  0x9a   : > { %541 = vmax.xlane.f32.xlu2 %v540_v43  ;;  %2090 = vmatmul.msk.f32.vlgmr.msra.gmra.mxu1 %vm770_vm1, %v2564_v44  ;;  %v842_v39 = vmul.f32 %v2564_v44, %v2564_v44  ;;  %v282_v40 = vmin.f32 %v2564_v44, 20.0  ;;  %vm274_vm0 = vcmp.gt.f32.partialorder %v2564_v44, 20.0 }
  0x9b   : > { %v2203_v48 = vpop.eup %2202 }
  0x9c   : > { %v2205_v49 = vpop.eup %2204  ;;  %852 = vadd.xlane.f32.xlu1 %v851_v47  ;;  %v304_v50 = vadd.f32 1.0, %v2203_v48  ;;  %v307_v51 = vmul.f32 -0.5, %v2203_v48  ;;  %v310_v57 = vand.u32 2147483647, %v2203_v48  ;;  %v854_v41 = vsel %vm770_vm1, %v842_v39, 0.0 }
  0x9d   : > { %v432_v52 = vmul.f32 %v2205_v49, %v409_v37  ;;  %v2207_v53 = vpop.eup %2206  ;;  %vm437_vm6 = vweird.f32 %v2205_v49  ;;  %v292_v42 = vmul.f32 1.442695, %v282_v40 }
  0x9e   : > { %2210 = vlog2.f32 %v304_v50  ;;  %v308_v54 = vadd.f32 1.0, %v307_v51  ;;  %v408_v55 = vadd.f32 1.0, %v2207_v53  ;;  %v2209_v56 = vpop.eup %2208  ;;  %vm311_vm3 = vcmp.lt.f32.partialorder %v310_v57, 0.0004427343  ;;  %vm438_vm7 = vmor %vm436_vm5, %vm437_vm6 }
  0x9f   : > { %v433_v58 = vsub.f32 1.0, %v432_v52  ;;  %v313_v62 = vadd.f32 1.0, %v2209_v56  ;;  %v316_v9 = vmul.f32 -0.5, %v2209_v56  ;;  %v319_v22 = vand.u32 2147483647, %v2209_v56  ;;  %v2591_v52 = vpop.permute.xlu1 %1568 }
  0xa0   : > { %2212 = vrcp.f32 %v408_v55  ;;  %v309_v61 = vmul.f32 %v2203_v48, %v308_v54  ;;  %v427_v26 = vand.u32 2147483648, %v408_v55  ;;  %vm421_vm10 = vweird.f32 %v408_v55 }
  0xa1   : > { %v434_v63 = vmul.f32 %v2205_v49, %v433_v58  ;;  %2214 = vlog2.f32 %v313_v62  ;;  %v317_v18 = vadd.f32 1.0, %v316_v9  ;;  %v425_v31 = vand.u32 2147483647, %v408_v55 }
  0xa2   : > { %vm320_vm11 = vcmp.lt.f32.partialorder %v319_v22, 0.0004427343  ;;  %v428_v34 = vor.u32 1.1754944e-38, %v427_v26  ;;  %2216 = vpow2.f32 %v292_v42 }
  0xa3   : > { %v435_v7 = vadd.f32 %v2205_v49, %v434_v63  ;;  %v318_v30 = vmul.f32 %v2209_v56, %v317_v18  ;;  %vm426_vm14 = vcmp.eq.f32.partialorder %v425_v31, 8.507059e+37 }
  0xa4   : > { %v2211_v59 = vpop.eup %2210 }
  0xa5   : > { %v306_v60 = vmul.f32 0.6931472, %v2211_v59  ;;  %v439_v16 = vsel %vm438_vm7, %v2205_v49, %v435_v7 }
  0xa6   : > { %v2213_v4 = vpop.eup %2212  ;;  %v2573_v24 = vsel %vm441_vm8, %v443_v15, %v439_v16 }
  0xa7   : > { %v312_v2 = vsel %vm311_vm3, %v309_v61, %v306_v60  ;;  %v417_v13 = vmul.f32 %v2213_v4, %v408_v55  ;;  %v2215_v21 = vpop.eup %2214  ;;  %vm422_vm9 = vweird.f32 %v2213_v4 }
  0xa8   : > { %v376_v3 = vsel %vm272_vm4, %v2545_v27, %v312_v2  ;;  %v315_v29 = vmul.f32 0.6931472, %v2215_v21  ;;  %vm423_vm12 = vmor %vm421_vm10, %vm422_vm9  ;;  %v2217_v43 = vpop.eup %2216 }
  0xa9   : > { %v762_v5 = vadd.f32 1.0, %v376_v3  ;;  %v418_v14 = vsub.f32 1.0, %v417_v13  ;;  %v322_v45 = vadd.f32 1.0, %v2217_v43  ;;  %v325_v46 = vmul.f32 -0.5, %v2217_v43  ;;  %v2611_v13 = vld [vmem:[%s3275_s1 + $0x14] ss:$0 sm:$0xff] }
  0xaa   : > { %v321_v35 = vsel %vm320_vm11, %v318_v30, %v315_v29  ;;  %v328_v49 = vand.u32 2147483647, %v2217_v43 }
  0xab   : > { %1585 = vperm.xlu0 %2134, %v762_v5   ;;  %v419_v20 = vmul.f32 %v2213_v4, %v418_v14  ;;  %v2580_v37 = vsel %vm273_vm13, %v2538_v19, %v321_v35  ;;  %2218 = vlog2.f32 %v322_v45  ;;  %v326_v47 = vadd.f32 1.0, %v325_v46 }
  0xac   : > { %vm329_vm15 = vcmp.lt.f32.partialorder %v328_v49, 0.0004427343 }
  0xad   : > { %v420_v23 = vadd.f32 %v2213_v4, %v419_v20  ;;  %v327_v51 = vmul.f32 %v2217_v43, %v326_v47 }
  0xaf   : > { %v424_v33 = vsel %vm423_vm12, %v2213_v4, %v420_v23 }
  0xb0   : > { %v429_v36 = vsel %vm426_vm14, %v428_v34, %v424_v33 }
  0xb1   : > { %v1329_v38 = vsub.f32 1.0, %v429_v36  ;;  %v2219_v48 = vpop.eup %2218 }
  0xb2   : > { %1107 = vperm.xlu2 %2131, %v376_v3   ;;  %v324_v50 = vmul.f32 0.6931472, %v2219_v48 }
  0xb3   : > { %2136 = vset.pattern.permute.xlu0 %v2459_v32 }
  0xb4   : > { %1344 = vperm.xlu0 %2136, %v2573_v24   ;;  %v330_v53 = vsel %vm329_vm15, %v327_v51, %v324_v50 }
  0xb5   : > { %182 = vperm.xlu1 %2128, %v160_v28   ;;  %v2596_v54 = vsel %vm274_vm0, %v2564_v44, %v330_v53 }
  0xba   : > { %1112 = vperm.xlu2 %2131, %v2580_v37  }
  0xbc   : > { %1575 = vperm.xlu0 %2136, %v1329_v38  }
  0xbd   : > { %2135 = vset.pattern.permute.xlu1 %v2459_v32 }
  0xbe   : > { %1339 = vperm.xlu1 %2135, %v429_v36  }
  0xc2   : > { %2132 = vset.pattern.permute.xlu2 %v2454_v1 }
  0xc4   : > { %2137 = vset.pattern.permute.xlu0 %v2457_v10 }
  0xc6   : > { %2139 = vset.pattern.permute.xlu1 %v2454_v1 }
  0xe3   : > { %855 = vadd.xlane.f32.xlu2 %v854_v41 }
  0xfb   : > { %227 = vperm.xlu2 %2132, %v160_v28  }
 0x103   : > { %2133 = vset.pattern.permute.xlu2 %v2458_v25 }
 0x104   : > { %1117 = vperm.xlu2 %2133, %v2596_v54  }
 0x105   : > { %v539_v55 = vpop.xlane.xlu2 %538 }
 0x106   : > { %v561_v56 = vsub.f32 %v2545_v27, %v539_v55 }
 0x107   : > { %v850_v57 = vpop.xlane.xlu1 %849 }
 0x108   : > { %v569_v58 = vmul.f32 1.442695, %v561_v56  ;;  %2220 = vrsqrt.f32 %v850_v57  ;;  %vm879_vm3 = vcmp.eq.f32.partialorder %v850_v57, inf  ;;  %v882_v15 = vand.u32 2147483648, %v850_v57 }
 0x109   : > { %vm881_vm4 = vcmp.eq.f32.partialorder %v850_v57, 0.0 }
 0x10a   : > { %2222 = vpow2.f32 %v569_v58 }
 0x10c   : > { %2143 = vset.pattern.permute.xlu2 %v2459_v32 }
 0x10d   : > { %v542_v59 = vpop.xlane.xlu2 %541 }
 0x10e   : > { %v2221_v60 = vpop.eup %2220  ;;  %v562_v61 = vsub.f32 %v2538_v19, %v542_v59  ;;  %v816_v47 = vpop.f32.mrf.mxu0 }
 0x10f   : > { %v873_v62 = vmul.f32 %v2221_v60, %v850_v57  ;;  %v853_v63 = vpop.xlane.xlu1 %852 }
 0x110   : > { %v2602_v2 = vpop.eup %2222  ;;  %v571_v3 = vmul.f32 1.442695, %v562_v61  ;;  %2224 = vrsqrt.f32 %v853_v63  ;;  %vm891_vm5 = vcmp.eq.f32.partialorder %v853_v63, inf  ;;  %v894_v28 = vand.u32 2147483648, %v853_v63 }
 0x111   : > { %v874_v4 = vmul.f32 %v2221_v60, %v873_v62  ;;  %593 = vrot.lane.b32.xlu1 %v2602_v2, %s2460_s4  ;;  %vm893_vm6 = vcmp.eq.f32.partialorder %v853_v63, 0.0 }
 0x112   : > { %2226 = vpow2.f32 %v571_v3 }
 0x113   : > { %v875_v27 = vmul.f32 0.5, %v874_v4 }
 0x115   : > { %v876_v5 = vsub.f32 1.5, %v875_v27  ;;  %v1108_v51 = vpop.permute.xlu2 %1107 }
 0x116   : > { %v2225_v6 = vpop.eup %2224  ;;  %v819_v62 = vpop.f32.mrf.mxu0 }
 0x117   : > { %v877_v7 = vmul.f32 %v2221_v60, %v876_v5  ;;  %v885_v8 = vmul.f32 %v2225_v6, %v853_v63 }
 0x118   : > { %v2606_v9 = vpop.eup %2226 }
 0x119   : > { %v878_v19 = vmul.f32 %v877_v7, %v850_v57  ;;  %v886_v14 = vmul.f32 %v2225_v6, %v885_v8  ;;  %595 = vrot.lane.b32.xlu2 %v2606_v9, %s2460_s4 }
 0x11b   : > { %v880_v16 = vsel %vm879_vm3, %v850_v57, %v878_v19  ;;  %v887_v18 = vmul.f32 0.5, %v886_v14  ;;  %vm617_vm3 = vcmask 23552  }
 0x11c   : > { %v883_v20 = vsel %vm881_vm4, %v882_v15, %v880_v16 }
 0x11d   : > { %v969_v21 = vmul.f32 %v2611_v13, %v883_v20  ;;  %v888_v22 = vsub.f32 1.5, %v887_v18  ;;  %v1113_v4 = vpop.permute.xlu2 %1112 }
 0x11f   : > { %v977_v23 = vmax.f32 %v969_v21, 1e-08  ;;  %v889_v26 = vmul.f32 %v2225_v6, %v888_v22 }
 0x121   : > { %2228 = vrcp.f32 %v977_v23  ;;  %v890_v29 = vmul.f32 %v889_v26, %v853_v63  ;;  %v996_v39 = vand.u32 2147483648, %v977_v23  ;;  %v994_v41 = vand.u32 2147483647, %v977_v23 }
 0x122   : > { %vm990_vm8 = vweird.f32 %v977_v23 }
 0x123   : > { %v892_v30 = vsel %vm891_vm5, %v853_v63, %v890_v29  ;;  %v997_v43 = vor.u32 1.1754944e-38, %v996_v39  ;;  %vm995_vm10 = vcmp.eq.f32.partialorder %v994_v41, 8.507059e+37 }
 0x124   : > { %v895_v31 = vsel %vm893_vm6, %v894_v28, %v892_v30 }
 0x125   : > { %v970_v33 = vmul.f32 %v2611_v13, %v895_v31 }
 0x127   : > { %v2229_v34 = vpop.eup %2228  ;;  %v978_v36 = vmax.f32 %v970_v33, 1e-08  ;;  %v183_v6 = vpop.permute.xlu1 %182 }
 0x128   : > { %v986_v35 = vmul.f32 %v2229_v34, %v977_v23  ;;  %vm991_vm7 = vweird.f32 %v2229_v34  ;;  %v209_v14 = vmul.f32 %v2528_v12, %v183_v6 }
 0x129   : > { %2230 = vrcp.f32 %v978_v36  ;;  %vm992_vm9 = vmor %vm990_vm8, %vm991_vm7  ;;  %v1011_v53 = vand.u32 2147483648, %v978_v36  ;;  %vm1005_vm11 = vweird.f32 %v978_v36  ;;  %v1009_v58 = vand.u32 2147483647, %v978_v36 }
 0x12a   : > { %v987_v38 = vsub.f32 1.0, %v986_v35 }
 0x12b   : > { %v1012_v59 = vor.u32 1.1754944e-38, %v1011_v53  ;;  %vm1010_vm14 = vcmp.eq.f32.partialorder %v1009_v58, 8.507059e+37  ;;  %v2634_v53 = vpop.permute.xlu0 %1561 }
 0x12c   : > { %v988_v40 = vmul.f32 %v2229_v34, %v987_v38 }
 0x12e   : > { %v989_v42 = vadd.f32 %v2229_v34, %v988_v40 }
 0x12f   : > { %v2231_v45 = vpop.eup %2230 }
 0x130   : > { %v993_v46 = vsel %vm992_vm9, %v2229_v34, %v989_v42  ;;  %v1001_v49 = vmul.f32 %v2231_v45, %v978_v36  ;;  %vm1006_vm12 = vweird.f32 %v2231_v45  ;;  %v2632_v42 = vpop.permute.xlu1 %1339 }
 0x131   : > { %v998_v48 = vsel %vm995_vm10, %v997_v43, %v993_v46  ;;  %vm1007_vm13 = vmor %vm1005_vm11, %vm1006_vm12 }
 0x132   : > { %v999_v50 = vmul.f32 %v998_v48, %v816_v47  ;;  %v1002_v55 = vsub.f32 1.0, %v1001_v49  ;;  %v822_v49 = vpop.f32.mrf.mxu1 }
 0x134   : > { %v2617_v56 = vmul.f32 %v1108_v51, %v999_v50  ;;  %v1003_v57 = vmul.f32 %v2231_v45, %v1002_v55 }
 0x136   : > { %1153 = vmax.xlane.f32.xlu0 %v2617_v56  ;;  %v1004_v60 = vadd.f32 %v2231_v45, %v1003_v57 }
 0x138   : > { %v1008_v61 = vsel %vm1007_vm13, %v2231_v45, %v1004_v60  ;;  %v2641_v60 = vpop.permute.xlu0 %1585 }
 0x139   : > { %v1013_v63 = vsel %vm1010_vm14, %v1012_v59, %v1008_v61  ;;  %v763_v59 = vadd.f32 1.0, %v2580_v37  ;;  %v161_v61 = vld [vmem:[%s2498_s15 + $0x20] sm:$0xff] }
 0x13a   : > { %v1014_v3 = vmul.f32 %v1013_v63, %v819_v62 }
 0x13c   : > { %v2620_v27 = vmul.f32 %v1113_v4, %v1014_v3 }
 0x13e   : > { %1155 = vmax.xlane.f32.xlu1 %v2620_v27 }
 0x140   : > { %v2645_v62 = vpop.permute.xlu0 %1344 }
 0x148   : > { %v2647_v63 = vpop.permute.xlu0 %1575 }
 0x156   : > { %v856_v5 = vpop.xlane.xlu2 %855 }
 0x157   : > { %2232 = vrsqrt.f32 %v856_v5  ;;  %vm903_vm15 = vcmp.eq.f32.partialorder %v856_v5, inf  ;;  %v906_v28 = vand.u32 2147483648, %v856_v5  ;;  %vm905_vm0 = vcmp.eq.f32.partialorder %v856_v5, 0.0 }
 0x15d   : > { %v2233_v7 = vpop.eup %2232 }
 0x15e   : > { %v897_v8 = vmul.f32 %v2233_v7, %v856_v5  ;;  %v228_v19 = vpop.permute.xlu2 %227 }
 0x15f   : > { %v250_v15 = vmul.f32 %v2523_v11, %v228_v19 }
 0x160   : > { %v898_v16 = vmul.f32 %v2233_v7, %v897_v8  ;;  %v543_v8 = vsel %vm536_vm2, %v2564_v44, -inf }
 0x161   : > { %v258_v18 = vadd.f32 %v250_v15, %v209_v14  ;;  %v2462_v15 = vmov 23  }
 0x162   : > { %v899_v20 = vmul.f32 0.5, %v898_v16 }
 0x163   : > { %v2626_v21 = vadd.f32 %v2535_v17, %v258_v18 }
 0x164   : > { %v900_v22 = vsub.f32 1.5, %v899_v20 }
 0x165   : > { %2091 = vmatmul.msk.f32.gmra.mxu1 %vm770_vm1, %v2626_v21 }
 0x166   : > { %v901_v23 = vmul.f32 %v2233_v7, %v900_v22  ;;  %v1118_v30 = vpop.permute.xlu2 %1117 }
 0x168   : > { %v902_v26 = vmul.f32 %v901_v23, %v856_v5 }
 0x16a   : > { %v904_v29 = vsel %vm903_vm15, %v856_v5, %v902_v26 }
 0x16b   : > { %v907_v31 = vsel %vm905_vm0, %v906_v28, %v904_v29 }
 0x16c   : > { %v971_v33 = vmul.f32 %v2611_v13, %v907_v31 }
 0x16e   : > { %v979_v34 = vmax.f32 %v971_v33, 1e-08 }
 0x170   : > { %2234 = vrcp.f32 %v979_v34  ;;  %v1026_v41 = vand.u32 2147483648, %v979_v34  ;;  %v1024_v45 = vand.u32 2147483647, %v979_v34  ;;  %vm1020_vm5 = vweird.f32 %v979_v34 }
 0x172   : > { %v1027_v47 = vor.u32 1.1754944e-38, %v1026_v41  ;;  %vm1025_vm7 = vcmp.eq.f32.partialorder %v1024_v45, 8.507059e+37 }
 0x173   : > { %v596_v35 = vpop.permute.xlu2 %595 }
 0x174   : > { %v621_v36 = vsel %vm617_vm3, %v596_v35, 0.0 }
 0x175   : > { %622 = vadd.xlane.f32.xlu0 %v621_v36 }
 0x176   : > { %v2235_v38 = vpop.eup %2234 }
 0x177   : > { %v1016_v39 = vmul.f32 %v2235_v38, %v979_v34  ;;  %vm1021_vm4 = vweird.f32 %v2235_v38 }
 0x178   : > { %vm1022_vm6 = vmor %vm1020_vm5, %vm1021_vm4 }
 0x179   : > { %v1017_v40 = vsub.f32 1.0, %v1016_v39 }
 0x17b   : > { %v1018_v43 = vmul.f32 %v2235_v38, %v1017_v40 }
 0x17d   : > { %v1019_v46 = vadd.f32 %v2235_v38, %v1018_v43 }
 0x17f   : > { %v1023_v48 = vsel %vm1022_vm6, %v2235_v38, %v1019_v46 }
 0x180   : > { %v1028_v50 = vsel %vm1025_vm7, %v1027_v47, %v1023_v48 }
 0x181   : > { %v1029_v51 = vmul.f32 %v1028_v50, %v822_v49  ;;  %v2463_v49 = vmov 24  }
 0x183   : > { %v594_v55 = vpop.permute.xlu1 %593  ;;  %v2636_v57 = vmul.f32 %v1118_v30, %v1029_v51 }
 0x184   : > { %v618_v58 = vsel %vm617_vm3, %v594_v55, 0.0 }
 0x185   : > { %619 = vadd.xlane.f32.xlu2 %v618_v58  ;;  %1157 = vmax.xlane.f32.xlu1 %v2636_v57 }
 0x189   : > { %1617 = vperm.xlu0 %2137, %v763_v59  }
 0x191   : > { %2138 = vset.pattern.permute.xlu0 %v2453_v0 }
 0x192   : > { %187 = vperm.xlu0 %2138, %v161_v61  }
 0x19a   : > { %2141 = vset.pattern.permute.xlu0 %v2462_v15 }
 0x19e   : > { %231 = vperm.xlu1 %2139, %v161_v61  }
 0x1a9   : > { %v1154_v3 = vpop.xlane.xlu0 %1153 }
 0x1aa   : > { %v1169_v4 = vsub.f32 %v2617_v56, %v1154_v3  ;;  %v2461_v56 = vmov 22  }
 0x1ab   : > { %2140 = vset.pattern.permute.xlu1 %v2461_v56 }
 0x1ac   : > { %v1177_v5 = vmul.f32 1.442695, %v1169_v4 }
 0x1ae   : > { %2236 = vpow2.f32 %v1177_v5 }
 0x1b1   : > { %v1156_v37 = vpop.xlane.xlu1 %1155 }
 0x1b2   : > { %v1170_v7 = vsub.f32 %v2620_v27, %v1156_v37 }
 0x1b4   : > { %v2650_v6 = vpop.eup %2236  ;;  %v1179_v19 = vmul.f32 1.442695, %v1170_v7 }
 0x1b5   : > { %1193 = vadd.xlane.f32.xlu2 %v2650_v6 }
 0x1b6   : > { %2238 = vpow2.f32 %v1179_v19 }
 0x1bc   : > { %v2656_v14 = vpop.eup %2238 }
 0x1bd   : > { %544 = vmax.xlane.f32.xlu2 %v543_v8 }
 0x1c8   : > { %1195 = vadd.xlane.f32.xlu1 %v2656_v14 }
 0x1e8   : > { %v623_v16 = vpop.xlane.xlu0 %622 }
 0x1e9   : > { %2240 = vrcp.f32 %v623_v16  ;;  %v668_v39 = vand.u32 2147483648, %v623_v16  ;;  %vm662_vm13 = vweird.f32 %v623_v16  ;;  %v666_v43 = vand.u32 2147483647, %v623_v16 }
 0x1eb   : > { %v669_v46 = vor.u32 1.1754944e-38, %v668_v39  ;;  %vm667_vm15 = vcmp.eq.f32.partialorder %v666_v43, 8.507059e+37 }
 0x1ef   : > { %v2241_v27 = vpop.eup %2240 }
 0x1f0   : > { %v658_v20 = vmul.f32 %v2241_v27, %v623_v16  ;;  %vm663_vm12 = vweird.f32 %v2241_v27 }
 0x1f1   : > { %vm664_vm14 = vmor %vm662_vm13, %vm663_vm12 }
 0x1f2   : > { %v659_v23 = vsub.f32 1.0, %v658_v20 }
 0x1f4   : > { %v660_v30 = vmul.f32 %v2241_v27, %v659_v23 }
 0x1f6   : > { %v661_v38 = vadd.f32 %v2241_v27, %v660_v30 }
 0x1f8   : > { %v620_v18 = vpop.xlane.xlu2 %619  ;;  %v665_v45 = vsel %vm664_vm14, %v2241_v27, %v661_v38 }
 0x1f9   : > { %2242 = vrcp.f32 %v620_v18  ;;  %v653_v29 = vand.u32 2147483648, %v620_v18  ;;  %v651_v33 = vand.u32 2147483647, %v620_v18  ;;  %vm647_vm9 = vweird.f32 %v620_v18 }
 0x1fa   : > { %v670_v47 = vsel %vm667_vm15, %v669_v46, %v665_v45  ;;  %v843_v46 = vmul.f32 %v2626_v21, %v2626_v21 }
 0x1fb   : > { %v654_v35 = vor.u32 1.1754944e-38, %v653_v29  ;;  %vm652_vm11 = vcmp.eq.f32.partialorder %v651_v33, 8.507059e+37  ;;  %v2663_v48 = vmul.f32 %v2606_v9, %v670_v47  ;;  %v2669_v50 = vpop.permute.xlu0 %1617 }
 0x1ff   : > { %v2243_v22 = vpop.eup %2242 }
 0x200   : > { %v643_v26 = vmul.f32 %v2243_v22, %v620_v18  ;;  %vm648_vm8 = vweird.f32 %v2243_v22 }
 0x201   : > { %vm649_vm10 = vmor %vm647_vm9, %vm648_vm8 }
 0x202   : > { %v644_v28 = vsub.f32 1.0, %v643_v26 }
 0x204   : > { %v645_v31 = vmul.f32 %v2243_v22, %v644_v28  ;;  %v188_v9 = vpop.permute.xlu0 %187 }
 0x205   : > { %v210_v59 = vmul.f32 %v2528_v12, %v188_v9 }
 0x206   : > { %v646_v34 = vadd.f32 %v2243_v22, %v645_v31 }
 0x208   : > { %v650_v36 = vsel %vm649_vm10, %v2243_v22, %v646_v34 }
 0x209   : > { %v655_v40 = vsel %vm652_vm11, %v654_v35, %v650_v36 }
 0x20a   : > { %v656_v41 = vmul.f32 %v2602_v2, %v655_v40  ;;  %v1158_v2 = vpop.xlane.xlu1 %1157 }
 0x20b   : > { %v1171_v45 = vsub.f32 %v2636_v57, %v1158_v2 }
 0x20c   : > { %1450 = vperm.xlu0 %2141, %v656_v41   ;;  %1403 = vperm.xlu1 %2140, %v656_v41  }
 0x212   : > { %v232_v51 = vpop.permute.xlu1 %231 }
 0x213   : > { %v251_v58 = vmul.f32 %v2523_v11, %v232_v51 }
 0x214   : > { %2142 = vset.pattern.permute.xlu0 %v2463_v49  ;;  %1408 = vperm.xlu1 %2140, %v2663_v48  }
 0x215   : > { %1514 = vperm.xlu0 %2142, %v656_v41   ;;  %v259_v61 = vadd.f32 %v251_v58, %v210_v59  ;;  %v386_v41 = vsub.f32 0.0, %v2564_v44 }
 0x217   : > { %v2674_v3 = vadd.f32 %v2535_v17, %v259_v61  ;;  %v396_v43 = vmul.f32 1.442695, %v386_v41 }
 0x219   : > { %2092 = vmatmul.msk.f32.vlgmr.msra.gmra.mxu2 %vm770_vm1, %v2674_v3 }
 0x21c   : > { %2154 = vset.pattern.permute.xlu1 %v2458_v25 }
 0x21d   : > { %2145 = vset.pattern.permute.xlu0 %v2462_v15 }
 0x228   : > { %v1194_v55 = vpop.xlane.xlu2 %1193 }
 0x229   : > { %2244 = vrcp.f32 %v1194_v55  ;;  %v1220_v19 = vand.u32 2147483648, %v1194_v55  ;;  %v1218_v18 = vand.u32 2147483647, %v1194_v55  ;;  %vm1214_vm4 = vweird.f32 %v1194_v55 }
 0x22b   : > { %v1221_v17 = vor.u32 1.1754944e-38, %v1220_v19  ;;  %vm1219_vm6 = vcmp.eq.f32.partialorder %v1218_v18, 8.507059e+37 }
 0x22f   : > { %v2245_v4 = vpop.eup %2244 }
 0x230   : > { %v1210_v5 = vmul.f32 %v2245_v4, %v1194_v55  ;;  %v545_v37 = vpop.xlane.xlu2 %544  ;;  %vm1215_vm0 = vweird.f32 %v2245_v4 }
 0x231   : > { %v563_v7 = vsub.f32 %v2564_v44, %v545_v37  ;;  %vm1216_vm5 = vmor %vm1214_vm4, %vm1215_vm0  ;;  %v283_v44 = vmin.f32 %v2626_v21, 20.0  ;;  %vm275_vm0 = vcmp.gt.f32.partialorder %v2626_v21, 20.0 }
 0x232   : > { %v1211_v8 = vsub.f32 1.0, %v1210_v5 }
 0x233   : > { %v573_v16 = vmul.f32 1.442695, %v563_v7  ;;  %v294_v58 = vmul.f32 1.442695, %v283_v44 }
 0x234   : > { %v1212_v11 = vmul.f32 %v2245_v4, %v1211_v8 }
 0x235   : > { %2246 = vpow2.f32 %v573_v16 }
 0x236   : > { %v1213_v12 = vadd.f32 %v2245_v4, %v1212_v11 }
 0x238   : > { %v1217_v27 = vsel %vm1216_vm5, %v2245_v4, %v1213_v12 }
 0x239   : > { %v1222_v20 = vsel %vm1219_vm6, %v1221_v17, %v1217_v27 }
 0x23a   : > { %v1223_v22 = vmul.f32 %v2650_v6, %v1222_v20 }
 0x23b   : > { %v2680_v23 = vpop.eup %2246  ;;  %v1196_v26 = vpop.xlane.xlu1 %1195 }
 0x23c   : > { %2248 = vrcp.f32 %v1196_v26  ;;  %597 = vrot.lane.b32.xlu2 %v2680_v23, %s2460_s4  ;;  %v2685_v28 = vmul.f32 %v2632_v42, %v1223_v22  ;;  %v1235_v33 = vand.u32 2147483648, %v1196_v26  ;;  %v1233_v6 = vand.u32 2147483647, %v1196_v26 }
 0x23d   : > { %vm1229_vm8 = vweird.f32 %v1196_v26  ;;  %2250 = vpow2.f32 %v396_v43 }
 0x23e   : > { %1385 = vrot.lane.b32.xlu1 %v2685_v28, %s2456_s19  ;;  %v1236_v36 = vor.u32 1.1754944e-38, %v1235_v33  ;;  %vm1234_vm10 = vcmp.eq.f32.partialorder %v1233_v6, 8.507059e+37  ;;  %v2197_v6 = vld [vmem:[%s3275_s1 + $0x16] ss:$0 sm:$0xff] }
 0x242   : > { %v2249_v29 = vpop.eup %2248 }
 0x243   : > { %v1225_v30 = vmul.f32 %v2249_v29, %v1196_v26  ;;  %vm1230_vm7 = vweird.f32 %v2249_v29  ;;  %v2251_v47 = vpop.eup %2250 }
 0x244   : > { %vm1231_vm9 = vmor %vm1229_vm8, %vm1230_vm7  ;;  %v410_v51 = vadd.f32 1.0, %v2251_v47 }
 0x245   : > { %v1226_v31 = vsub.f32 1.0, %v1225_v30 }
 0x246   : > { %1497 = vrot.lane.b32.xlu1 %v2685_v28, %s2455_s18  ;;  %vm451_vm11 = vweird.f32 %v410_v51  ;;  %v457_v5 = vand.u32 2147483648, %v410_v51  ;;  %v455_v7 = vand.u32 2147483647, %v410_v51 }
 0x247   : > { %v1227_v34 = vmul.f32 %v2249_v29, %v1226_v31 }
 0x248   : > { %v458_v8 = vor.u32 1.1754944e-38, %v457_v5  ;;  %vm456_vm14 = vcmp.eq.f32.partialorder %v455_v7, 8.507059e+37 }
 0x249   : > { %v1228_v35 = vadd.f32 %v2249_v29, %v1227_v34 }
 0x24b   : > { %v1232_v42 = vsel %vm1231_vm9, %v2249_v29, %v1228_v35  ;;  %v1563_v35 = vperm.slane %v2634_v53, 0 }
 0x24c   : > { %v1237_v38 = vsel %vm1234_vm10, %v1236_v36, %v1232_v42 }
 0x24d   : > { %v1238_v39 = vmul.f32 %v2656_v14, %v1237_v38  ;;  %v1181_v14 = vmul.f32 1.442695, %v1171_v45  ;;  %v1570_v38 = vperm.slane %v2591_v52, 0 }
 0x24f   : > { %v2693_v40 = vmul.f32 %v2645_v62, %v1238_v39  ;;  %v857_v62 = vsel %vm770_vm1, %v843_v46, 0.0  ;;  %2252 = vpow2.f32 %v1181_v14 }
 0x250   : > { %2254 = vrcp.f32 %v410_v51 }
 0x251   : > { %1387 = vrot.lane.b32.xlu1 %v2693_v40, %s2456_s19  ;;  %2256 = vpow2.f32 %v294_v58 }
 0x255   : > { %v2705_v55 = vpop.eup %2252 }
 0x256   : > { %v2255_v9 = vpop.eup %2254 }
 0x257   : > { %v447_v57 = vmul.f32 %v2255_v9, %v410_v51  ;;  %v2257_v59 = vpop.eup %2256  ;;  %vm452_vm12 = vweird.f32 %v2255_v9 }
 0x258   : > { %v331_v4 = vadd.f32 1.0, %v2257_v59  ;;  %vm453_vm13 = vmor %vm451_vm11, %vm452_vm12  ;;  %v334_v19 = vmul.f32 -0.5, %v2257_v59  ;;  %v337_v17 = vand.u32 2147483647, %v2257_v59 }
 0x259   : > { %1499 = vrot.lane.b32.xlu1 %v2693_v40, %s2455_s18  ;;  %v448_v2 = vsub.f32 1.0, %v447_v57 }
 0x25a   : > { %2258 = vlog2.f32 %v331_v4  ;;  %v335_v12 = vadd.f32 1.0, %v334_v19  ;;  %vm338_vm15 = vcmp.lt.f32.partialorder %v337_v17, 0.0004427343 }
 0x25b   : > { %v449_v61 = vmul.f32 %v2255_v9, %v448_v2 }
 0x25c   : > { %v336_v20 = vmul.f32 %v2257_v59, %v335_v12 }
 0x25d   : > { %v450_v37 = vadd.f32 %v2255_v9, %v449_v61 }
 0x25f   : > { %v454_v16 = vsel %vm453_vm13, %v2255_v9, %v450_v37 }
 0x260   : > { %v2259_v11 = vpop.eup %2258  ;;  %v2708_v18 = vsel %vm456_vm14, %v458_v8, %v454_v16 }
 0x261   : > { %v333_v27 = vmul.f32 0.6931472, %v2259_v11 }
 0x263   : > { %v339_v22 = vsel %vm338_vm15, %v336_v20, %v333_v27 }
 0x264   : > { %v2714_v26 = vsel %vm275_vm0, %v2626_v21, %v339_v22 }
 0x265   : > { %858 = vadd.xlane.f32.xlu2 %v857_v62 }
 0x26d   : > { %1197 = vadd.xlane.f32.xlu2 %v2705_v55 }
 0x27e   : > { %v1404_v31 = vpop.permute.xlu1 %1403  ;;  %v1451_v33 = vpop.permute.xlu0 %1450 }
 0x27f   : > { %v1564_v39 = vmul.f32 %v1563_v35, %v1404_v31  ;;  %v1566_v41 = vmul.f32 %v2197_v6, %v1451_v33  ;;  %v1481_v47 = vmul.f32 %v1451_v33, %v2685_v28 }
 0x281   : > { %v1567_v45 = vadd.f32 %v1566_v41, %v1564_v39 }
 0x285   : > { %1349 = vperm.xlu2 %2143, %v2708_v18  }
 0x286   : > { %v2719_v34 = vpop.permute.xlu1 %1408 }
 0x287   : > { %v1515_v36 = vpop.permute.xlu0 %1514 }
 0x288   : > { %v1571_v43 = vmul.f32 %v1570_v38, %v1515_v36 }
 0x28a   : > { %v1572_v14 = vadd.f32 %v1571_v43, %v1567_v45 }
 0x28c   : > { %v1578_v53 = vmul.f32 %v2647_v63, %v1572_v14 }
 0x28d   : > { %2144 = vset.pattern.permute.xlu2 %v2458_v25 }
 0x28e   : > { %1122 = vperm.xlu2 %2144, %v2714_v26  }
 0x296   : > { %v598_v29 = vpop.permute.xlu2 %597  ;;  %2148 = vset.pattern.permute.xlu2 %v2461_v56 }
 0x297   : > { %v624_v30 = vsel %vm617_vm3, %v598_v29, 0.0 }
 0x298   : > { %625 = vadd.xlane.f32.xlu0 %v624_v30 }
 0x2ac   : > { %1454 = vperm.xlu0 %2145, %v2663_v48  }
 0x2b0   : > { %v1386_v42 = vpop.permute.xlu1 %1385 }
 0x2b1   : > { %v1441_v46 = vmul.f32 %v1404_v31, %v1386_v42 }
 0x2b3   : > { %v1489_v51 = vadd.f32 %v1481_v47, %v1441_v46 }
 0x2b4   : > { %2146 = vset.pattern.permute.xlu0 %v2463_v49 }
 0x2b5   : > { %1518 = vperm.xlu0 %2146, %v2663_v48  }
 0x2b8   : > { %v1498_v62 = vpop.permute.xlu1 %1497 }
 0x2b9   : > { %v1545_v44 = vmul.f32 %v1515_v36, %v1498_v62 }
 0x2bb   : > { %v1553_v58 = vadd.f32 %v1545_v44, %v1489_v51 }
 0x2bd   : > { %2147 = vset.pattern.permute.xlu0 %v2459_v32  ;;  %v1579_v52 = vadd.f32 %v1578_v53, %v1553_v58 }
 0x2bf   : > { %v1580_v9 = vmax.f32 %v1579_v52, 1e-30 }
 0x2c1   : > { %2260 = vlog2.f32 %v1580_v9 }
 0x2c7   : > { %v2261_v57 = vpop.eup %2260 }
 0x2c8   : > { %v1582_v2 = vmul.f32 0.6931472, %v2261_v57 }
 0x2ca   : > { %v1588_v48 = vmul.f32 %v2641_v60, %v1582_v2 }
 0x2cc   : > { %v1589_v59 = vmul.f32 1.442695, %v1588_v48 }
 0x2ce   : > { %2262 = vpow2.f32 %v1589_v59  ;;  %v825_v59 = vpop.f32.mrf.mxu1 }
 0x2d4   : > { %v2733_v61 = vpop.eup %2262 }
 0x2d5   : > { %1601 = vrot.lane.b32.xlu2 %v2733_v61, %s2455_s18  ;;  %1596 = vrot.lane.b32.xlu0 %v2733_v61, %s2456_s19 }
 0x2d6   : > { %1591 = vadd.xlane.f32.xlu1 %v2733_v61 }
 0x2d8   : > { %v859_v63 = vpop.xlane.xlu2 %858 }
 0x2d9   : > { %2264 = vrsqrt.f32 %v859_v63  ;;  %vm915_vm4 = vcmp.eq.f32.partialorder %v859_v63, inf  ;;  %v918_v29 = vand.u32 2147483648, %v859_v63  ;;  %vm917_vm7 = vcmp.eq.f32.partialorder %v859_v63, 0.0 }
 0x2df   : > { %v2265_v28 = vpop.eup %2264 }
 0x2e0   : > { %v909_v4 = vmul.f32 %v2265_v28, %v859_v63  ;;  %v1198_v5 = vpop.xlane.xlu2 %1197 }
 0x2e1   : > { %2266 = vrcp.f32 %v1198_v5  ;;  %v1250_v17 = vand.u32 2147483648, %v1198_v5  ;;  %v1248_v20 = vand.u32 2147483647, %v1198_v5  ;;  %vm1244_vm6 = vweird.f32 %v1198_v5 }
 0x2e2   : > { %v910_v37 = vmul.f32 %v2265_v28, %v909_v4 }
 0x2e3   : > { %v1251_v31 = vor.u32 1.1754944e-38, %v1250_v17  ;;  %vm1249_vm9 = vcmp.eq.f32.partialorder %v1248_v20, 8.507059e+37 }
 0x2e4   : > { %v911_v60 = vmul.f32 0.5, %v910_v37  ;;  %v1388_v37 = vpop.permute.xlu1 %1387 }
 0x2e6   : > { %v912_v7 = vsub.f32 1.5, %v911_v60 }
 0x2e7   : > { %v2267_v8 = vpop.eup %2266 }
 0x2e8   : > { %v913_v19 = vmul.f32 %v2265_v28, %v912_v7  ;;  %v1240_v16 = vmul.f32 %v2267_v8, %v1198_v5  ;;  %vm1245_vm5 = vweird.f32 %v2267_v8  ;;  %v1350_v38 = vpop.permute.xlu2 %1349 }
 0x2e9   : > { %vm1246_vm8 = vmor %vm1244_vm6, %vm1245_vm5  ;;  %vm276_vm6 = vcmp.gt.f32.partialorder %v2674_v3, 20.0 }
 0x2ea   : > { %v914_v11 = vmul.f32 %v913_v19, %v859_v63  ;;  %v1241_v12 = vsub.f32 1.0, %v1240_v16 }
 0x2ec   : > { %v1242_v27 = vmul.f32 %v2267_v8, %v1241_v12  ;;  %v916_v22 = vsel %vm915_vm4, %v859_v63, %v914_v11  ;;  %v1442_v11 = vmul.f32 %v2719_v34, %v1388_v37 }
 0x2ed   : > { %v919_v33 = vsel %vm917_vm7, %v918_v29, %v916_v22 }
 0x2ee   : > { %v1243_v30 = vadd.f32 %v2267_v8, %v1242_v27  ;;  %v972_v42 = vmul.f32 %v2611_v13, %v919_v33  ;;  %v1500_v27 = vpop.permute.xlu1 %1499 }
 0x2f0   : > { %v1247_v6 = vsel %vm1246_vm8, %v2267_v8, %v1243_v30  ;;  %v980_v41 = vmax.f32 %v972_v42, 1e-08  ;;  %v1123_v7 = vpop.permute.xlu2 %1122 }
 0x2f1   : > { %v1252_v35 = vsel %vm1249_vm9, %v1251_v31, %v1247_v6 }
 0x2f2   : > { %v1253_v36 = vmul.f32 %v2705_v55, %v1252_v35  ;;  %2268 = vrcp.f32 %v980_v41  ;;  %v1041_v51 = vand.u32 2147483648, %v980_v41  ;;  %vm1035_vm11 = vweird.f32 %v980_v41 }
 0x2f3   : > { %v1039_v13 = vand.u32 2147483647, %v980_v41 }
 0x2f4   : > { %v2742_v39 = vmul.f32 %v1350_v38, %v1253_v36  ;;  %v1042_v58 = vor.u32 1.1754944e-38, %v1041_v51 }
 0x2f5   : > { %vm1040_vm13 = vcmp.eq.f32.partialorder %v1039_v13, 8.507059e+37 }
 0x2f6   : > { %1389 = vrot.lane.b32.xlu1 %v2742_v39, %s2456_s19 }
 0x2f8   : > { %v2269_v43 = vpop.eup %2268 }
 0x2f9   : > { %v1031_v45 = vmul.f32 %v2269_v43, %v980_v41  ;;  %vm1036_vm10 = vweird.f32 %v2269_v43  ;;  %v1330_v41 = vsub.f32 1.0, %v2573_v24 }
 0x2fa   : > { %vm1037_vm12 = vmor %vm1035_vm11, %vm1036_vm10 }
 0x2fb   : > { %v1032_v46 = vsub.f32 1.0, %v1031_v45  ;;  %v546_v45 = vsel %vm536_vm2, %v2626_v21, -inf }
 0x2fd   : > { %v1033_v14 = vmul.f32 %v2269_v43, %v1032_v46  ;;  %v284_v46 = vmin.f32 %v2674_v3, 20.0 }
 0x2ff   : > { %v1034_v62 = vadd.f32 %v2269_v43, %v1033_v14  ;;  %v296_v51 = vmul.f32 1.442695, %v284_v46 }
 0x301   : > { %v1038_v53 = vsel %vm1037_vm12, %v2269_v43, %v1034_v62 }
 0x302   : > { %v1043_v57 = vsel %vm1040_vm13, %v1042_v58, %v1038_v53 }
 0x303   : > { %v1044_v28 = vmul.f32 %v1043_v57, %v825_v59 }
 0x305   : > { %v1148_v19 = vmul.f32 %v1123_v7, %v1044_v28 }
 0x30b   : > { %v626_v47 = vpop.xlane.xlu0 %625 }
 0x30c   : > { %2270 = vrcp.f32 %v626_v47  ;;  %v683_v9 = vand.u32 2147483648, %v626_v47  ;;  %v681_v48 = vand.u32 2147483647, %v626_v47  ;;  %vm677_vm15 = vweird.f32 %v626_v47 }
 0x30e   : > { %v684_v4 = vor.u32 1.1754944e-38, %v683_v9  ;;  %vm682_vm4 = vcmp.eq.f32.partialorder %v681_v48, 8.507059e+37 }
 0x312   : > { %v2271_v55 = vpop.eup %2270 }
 0x313   : > { %v673_v44 = vmul.f32 %v2271_v55, %v626_v47  ;;  %vm678_vm14 = vweird.f32 %v2271_v55 }
 0x314   : > { %vm679_vm0 = vmor %vm677_vm15, %vm678_vm14 }
 0x315   : > { %v674_v52 = vsub.f32 1.0, %v673_v44 }
 0x317   : > { %v675_v2 = vmul.f32 %v2271_v55, %v674_v52 }
 0x319   : > { %v676_v63 = vadd.f32 %v2271_v55, %v675_v2 }
 0x31b   : > { %v680_v5 = vsel %vm679_vm0, %v2271_v55, %v676_v63 }
 0x31c   : > { %v685_v60 = vsel %vm682_vm4, %v684_v4, %v680_v5 }
 0x31d   : > { %v686_v8 = vmul.f32 %v2680_v23, %v685_v60  ;;  %v764_v23 = vadd.f32 1.0, %v2596_v54 }
 0x31e   : > { %v1455_v16 = vpop.permute.xlu0 %1454 }
 0x31f   : > { %v1482_v12 = vmul.f32 %v1455_v16, %v2693_v40  ;;  %1413 = vperm.xlu2 %2148, %v686_v8   ;;  %v1599_v31 = vmul.f32 %v2733_v61, %v1455_v16 }
 0x320   : > { %1159 = vmax.xlane.f32.xlu1 %v1148_v19 }
 0x321   : > { %v1490_v17 = vadd.f32 %v1482_v12, %v1442_v11 }
 0x327   : > { %2150 = vset.pattern.permute.xlu2 %v2463_v49  ;;  %v1519_v20 = vpop.permute.xlu0 %1518 }
 0x328   : > { %v1546_v22 = vmul.f32 %v1519_v20, %v1500_v27  ;;  %1522 = vperm.xlu2 %2150, %v686_v8  }
 0x32a   : > { %v1554_v29 = vadd.f32 %v1546_v22, %v1490_v17 }
 0x32f   : > { %v1602_v40 = vpop.permute.xlu2 %1601 }
 0x330   : > { %1501 = vrot.lane.b32.xlu2 %v2742_v39, %s2455_s18  ;;  %v1603_v35 = vmul.f32 %v1602_v40, %v1519_v20  ;;  %v387_v20 = vsub.f32 0.0, %v2626_v21 }
 0x331   : > { %2151 = vset.pattern.permute.xlu2 %v2457_v10 }
 0x338   : > { %1649 = vperm.xlu2 %2151, %v764_v23  }
 0x340   : > { %2152 = vset.pattern.permute.xlu2 %v2453_v0 }
 0x347   : > { %v1597_v30 = vpop.permute.xlu0 %1596 }
 0x348   : > { %v1598_v33 = vmul.f32 %v1597_v30, %v2719_v34  ;;  %v2796_v30 = vld [vmem:[%s2498_s15 + $0x28] sm:$0xff] }
 0x349   : > { %v1592_v6 = vpop.xlane.xlu1 %1591  ;;  %192 = vperm.xlu2 %2152, %v2796_v30  }
 0x34a   : > { %v1600_v36 = vadd.f32 %v1599_v31, %v1598_v33  ;;  %v1593_v42 = vmax.f32 %v1592_v6, 1e-12  ;;  %v844_v31 = vmul.f32 %v2674_v3, %v2674_v3 }
 0x34c   : > { %2272 = vrcp.f32 %v1593_v42  ;;  %v1604_v38 = vadd.f32 %v1603_v35, %v1600_v36  ;;  %v860_v33 = vsel %vm770_vm1, %v844_v31, 0.0 }
 0x351   : > { %2156 = vset.pattern.permute.xlu2 %v2462_v15 }
 0x352   : > { %v2758_v43 = vpop.eup %2272 }
 0x353   : > { %v1595_v54 = vmul.f32 %v2758_v43, %v1330_v41 }
 0x355   : > { %1607 = vperm.xlu0 %2147, %v1595_v54  }
 0x35d   : > { %2149 = vset.pattern.permute.xlu0 %v2462_v15 }
 0x368   : > { %v1390_v34 = vpop.permute.xlu1 %1389 }
 0x379   : > { %v2777_v4 = vpop.permute.xlu2 %1413 }
 0x37a   : > { %v1443_v11 = vmul.f32 %v2777_v4, %v1390_v34 }
 0x37f   : > { %547 = vmax.xlane.f32.xlu0 %v546_v45 }
 0x382   : > { %v2780_v7 = vpop.permute.xlu2 %1522 }
 0x393   : > { %v1160_v47 = vpop.xlane.xlu1 %1159  ;;  %1458 = vperm.xlu0 %2149, %v686_v8  }
 0x394   : > { %v1172_v14 = vsub.f32 %v1148_v19, %v1160_v47  ;;  %v1502_v19 = vpop.permute.xlu2 %1501  ;;  %v549_v47 = vsel %vm536_vm2, %v2674_v3, -inf }
 0x395   : > { %v1547_v17 = vmul.f32 %v2780_v7, %v1502_v19 }
 0x396   : > { %v1183_v62 = vmul.f32 1.442695, %v1172_v14 }
 0x398   : > { %2274 = vpow2.f32 %v1183_v62 }
 0x399   : > { %2276 = vpow2.f32 %v296_v51 }
 0x39b   : > { %2153 = vset.pattern.permute.xlu0 %v2459_v32 }
 0x39e   : > { %v2766_v24 = vpop.eup %2274 }
 0x39f   : > { %1199 = vadd.xlane.f32.xlu1 %v2766_v24  ;;  %v2277_v55 = vpop.eup %2276 }
 0x3a0   : > { %v340_v13 = vadd.f32 1.0, %v2277_v55  ;;  %v343_v44 = vmul.f32 -0.5, %v2277_v55  ;;  %v346_v52 = vand.u32 2147483647, %v2277_v55 }
 0x3a2   : > { %2278 = vlog2.f32 %v340_v13  ;;  %v344_v53 = vadd.f32 1.0, %v343_v44  ;;  %vm347_vm5 = vcmp.lt.f32.partialorder %v346_v52, 0.0004427343 }
 0x3a4   : > { %v345_v57 = vmul.f32 %v2277_v55, %v344_v53 }
 0x3a8   : > { %v2279_v58 = vpop.eup %2278 }
 0x3a9   : > { %v342_v9 = vmul.f32 0.6931472, %v2279_v58 }
 0x3ab   : > { %v348_v2 = vsel %vm347_vm5, %v345_v57, %v342_v9 }
 0x3ac   : > { %v2771_v48 = vsel %vm276_vm6, %v2674_v3, %v348_v2 }
 0x3b8   : > { %1127 = vperm.xlu1 %2154, %v2771_v48  }
 0x3c0   : > { %2155 = vset.pattern.permute.xlu1 %v2461_v56 }
 0x3c7   : > { %v1608_v59 = vpop.permute.xlu0 %1607 }
 0x3c8   : > { %v1610_v63 = vmul.f32 %v1608_v59, %v1604_v38 }
 0x3ca   : > { %v2775_v28 = vadd.f32 %v1610_v63, %v1554_v29  ;;  %v398_v29 = vmul.f32 1.442695, %v387_v20 }
 0x3f2   : > { %v548_v5 = vpop.xlane.xlu0 %547 }
 0x3f3   : > { %v564_v37 = vsub.f32 %v2626_v21, %v548_v5 }
 0x3f5   : > { %v575_v60 = vmul.f32 1.442695, %v564_v37  ;;  %v765_v37 = vadd.f32 1.0, %v2714_v26 }
 0x3f7   : > { %2280 = vpow2.f32 %v575_v60  ;;  %v2819_v60 = vpop.permute.xlu2 %1649 }
 0x3f8   : > { %2282 = vpow2.f32 %v398_v29 }
 0x3fd   : > { %v2782_v8 = vpop.eup %2280 }
 0x3fe   : > { %599 = vrot.lane.b32.xlu0 %v2782_v8, %s2460_s4  ;;  %v2283_v23 = vpop.eup %2282 }
 0x3ff   : > { %v411_v40 = vadd.f32 1.0, %v2283_v23  ;;  %v2821_v19 = vpop.permute.xlu2 %192 }
 0x401   : > { %2284 = vrcp.f32 %v411_v40  ;;  %v472_v42 = vand.u32 2147483648, %v411_v40  ;;  %vm466_vm8 = vweird.f32 %v411_v40  ;;  %v470_v38 = vand.u32 2147483647, %v411_v40 }
 0x403   : > { %v473_v54 = vor.u32 1.1754944e-38, %v472_v42  ;;  %vm471_vm10 = vcmp.eq.f32.partialorder %v470_v38, 8.507059e+37 }
 0x405   : > { %v2786_v16 = vpop.permute.xlu0 %1458 }
 0x406   : > { %v1483_v12 = vmul.f32 %v2786_v16, %v2742_v39 }
 0x407   : > { %v2285_v39 = vpop.eup %2284 }
 0x408   : > { %v1491_v27 = vadd.f32 %v1483_v12, %v1443_v11  ;;  %v462_v21 = vmul.f32 %v2285_v39, %v411_v40  ;;  %vm467_vm7 = vweird.f32 %v2285_v39  ;;  %v1612_v11 = vmax.f32 %v2775_v28, 1e-30 }
 0x409   : > { %vm468_vm9 = vmor %vm466_vm8, %vm467_vm7 }
 0x40a   : > { %v2793_v22 = vadd.f32 %v1547_v17, %v1491_v27  ;;  %v463_v6 = vsub.f32 1.0, %v462_v21 }
 0x40c   : > { %v464_v35 = vmul.f32 %v2285_v39, %v463_v6 }
 0x40e   : > { %v465_v36 = vadd.f32 %v2285_v39, %v464_v35 }
 0x410   : > { %v469_v41 = vsel %vm468_vm9, %v2285_v39, %v465_v36 }
 0x411   : > { %v2803_v45 = vsel %vm471_vm10, %v473_v54, %v469_v41 }
 0x412   : > { %v1200_v14 = vpop.xlane.xlu1 %1199 }
 0x413   : > { %2286 = vrcp.f32 %v1200_v14  ;;  %v1265_v53 = vand.u32 2147483648, %v1200_v14  ;;  %vm1259_vm12 = vweird.f32 %v1200_v14  ;;  %v1263_v58 = vand.u32 2147483647, %v1200_v14 }
 0x414   : > { %2288 = vlog2.f32 %v1612_v11 }
 0x415   : > { %v1266_v57 = vor.u32 1.1754944e-38, %v1265_v53  ;;  %vm1264_vm14 = vcmp.eq.f32.partialorder %v1263_v58, 8.507059e+37 }
 0x419   : > { %v2287_v62 = vpop.eup %2286 }
 0x41a   : > { %v1255_v51 = vmul.f32 %v2287_v62, %v1200_v14  ;;  %vm1260_vm11 = vweird.f32 %v2287_v62 }
 0x41b   : > { %vm1261_vm13 = vmor %vm1259_vm12, %vm1260_vm11 }
 0x41c   : > { %v1256_v55 = vsub.f32 1.0, %v1255_v51 }
 0x41e   : > { %v1257_v13 = vmul.f32 %v2287_v62, %v1256_v55 }
 0x420   : > { %v1258_v44 = vadd.f32 %v2287_v62, %v1257_v13 }
 0x422   : > { %v1262_v9 = vsel %vm1261_vm13, %v2287_v62, %v1258_v44 }
 0x423   : > { %v1267_v2 = vsel %vm1264_vm14, %v1266_v57, %v1262_v9 }
 0x424   : > { %v1268_v59 = vmul.f32 %v2766_v24, %v1267_v2  ;;  %v2289_v24 = vpop.eup %2288 }
 0x425   : > { %v1614_v20 = vmul.f32 0.6931472, %v2289_v24 }
 0x427   : > { %v1620_v31 = vmul.f32 %v2669_v50, %v1614_v20 }
 0x428   : > { %861 = vadd.xlane.f32.xlu0 %v860_v33 }
 0x429   : > { %v1621_v28 = vmul.f32 1.442695, %v1620_v31 }
 0x42a   : > { %v1128_v41 = vpop.permute.xlu1 %1127 }
 0x43c   : > { %1354 = vperm.xlu0 %2153, %v2803_v45  }
 0x444   : > { %2160 = vset.pattern.permute.xlu0 %v2457_v10 }
 0x470   : > { %v600_v34 = vpop.permute.xlu0 %599 }
 0x471   : > { %v627_v46 = vsel %vm617_vm3, %v600_v34, 0.0 }
 0x472   : > { %628 = vadd.xlane.f32.xlu2 %v627_v46 }
 0x47a   : > { %550 = vmax.xlane.f32.xlu2 %v549_v47 }
 0x49b   : > { %v2810_v52 = vpop.xlane.xlu0 %861 }
 0x49c   : > { %vm927_vm6 = vcmp.eq.f32.partialorder %v2810_v52, inf  ;;  %v930_v57 = vand.u32 2147483648, %v2810_v52  ;;  %vm929_vm7 = vcmp.eq.f32.partialorder %v2810_v52, 0.0 }
 0x4ae   : > { %v1355_v63 = vpop.permute.xlu0 %1354 }
 0x4af   : > { %v2813_v5 = vmul.f32 %v1355_v63, %v1268_v59  ;;  %v1331_v59 = vsub.f32 1.0, %v2708_v18  ;;  %v2860_v63 = vld [vmem:[%s3275_s1 + $0x14] ss:$0 sm:$0xff] }
 0x4b1   : > { %1391 = vrot.lane.b32.xlu0 %v2813_v5, %s2456_s19 }
 0x4b9   : > { %1681 = vperm.xlu0 %2160, %v765_v37  }
 0x4c1   : > { %2161 = vset.pattern.permute.xlu0 %v2453_v0 }
 0x4e5   : > { %v629_v12 = vpop.xlane.xlu2 %628 }
 0x4e6   : > { %2290 = vrcp.f32 %v629_v12  ;;  %v698_v23 = vand.u32 2147483648, %v629_v12  ;;  %v696_v26 = vand.u32 2147483647, %v629_v12  ;;  %vm692_vm0 = vweird.f32 %v629_v12 }
 0x4e7   : > { %2292 = vpow2.f32 %v1621_v28 }
 0x4e8   : > { %v699_v33 = vor.u32 1.1754944e-38, %v698_v23  ;;  %vm697_vm5 = vcmp.eq.f32.partialorder %v696_v26, 8.507059e+37 }
 0x4ec   : > { %v2291_v17 = vpop.eup %2290 }
 0x4ed   : > { %v688_v27 = vmul.f32 %v2291_v17, %v629_v12  ;;  %vm693_vm15 = vweird.f32 %v2291_v17  ;;  %v2826_v36 = vpop.eup %2292  ;;  %v551_v50 = vpop.xlane.xlu2 %550 }
 0x4ee   : > { %vm694_vm4 = vmor %vm692_vm0, %vm693_vm15 }
 0x4ef   : > { %v689_v29 = vsub.f32 1.0, %v688_v27 }
 0x4f1   : > { %v690_v40 = vmul.f32 %v2291_v17, %v689_v29 }
 0x4f3   : > { %v691_v39 = vadd.f32 %v2291_v17, %v690_v40 }
 0x4f5   : > { %v695_v21 = vsel %vm694_vm4, %v2291_v17, %v691_v39 }
 0x4f6   : > { %v700_v6 = vsel %vm697_vm5, %v699_v33, %v695_v21  ;;  %v388_v33 = vsub.f32 0.0, %v2674_v3  ;;  %v828_v21 = vpop.f32.mrf.mxu2 }
 0x4f7   : > { %v701_v35 = vmul.f32 %v2782_v8, %v700_v6  ;;  %v565_v8 = vsub.f32 %v2674_v3, %v551_v50 }
 0x4f8   : > { %v400_v6 = vmul.f32 1.442695, %v388_v33 }
 0x4f9   : > { %1462 = vperm.xlu2 %2156, %v701_v35   ;;  %1418 = vperm.xlu1 %2155, %v701_v35   ;;  %v577_v42 = vmul.f32 1.442695, %v565_v8 }
 0x4fb   : > { %2294 = vpow2.f32 %v577_v42 }
 0x4fc   : > { %2296 = vrsqrt.f32 %v2810_v52 }
 0x501   : > { %1628 = vrot.lane.b32.xlu2 %v2826_v36, %s2456_s19  ;;  %2157 = vset.pattern.permute.xlu1 %v2463_v49  ;;  %v2839_v38 = vpop.eup %2294 }
 0x502   : > { %1526 = vperm.xlu1 %2157, %v701_v35   ;;  %2158 = vset.pattern.permute.xlu2 %v2459_v32  ;;  %v2297_v34 = vpop.eup %2296 }
 0x503   : > { %v921_v46 = vmul.f32 %v2297_v34, %v2810_v52 }
 0x505   : > { %v922_v47 = vmul.f32 %v2297_v34, %v921_v46 }
 0x507   : > { %v923_v62 = vmul.f32 0.5, %v922_v47 }
 0x509   : > { %1633 = vrot.lane.b32.xlu2 %v2826_v36, %s2455_s18  ;;  %v924_v51 = vsub.f32 1.5, %v923_v62 }
 0x50a   : > { %1503 = vrot.lane.b32.xlu1 %v2813_v5, %s2455_s18 }
 0x50b   : > { %2164 = vset.pattern.permute.xlu1 %v2458_v25  ;;  %v925_v13 = vmul.f32 %v2297_v34, %v924_v51 }
 0x50d   : > { %v926_v44 = vmul.f32 %v925_v13, %v2810_v52 }
 0x50f   : > { %v928_v9 = vsel %vm927_vm6, %v2810_v52, %v926_v44  ;;  %v163_v52 = vld [vmem:[%s2498_s15 + $0x30] sm:$0xff] }
 0x510   : > { %v931_v2 = vsel %vm929_vm7, %v930_v57, %v928_v9  ;;  %197 = vperm.xlu0 %2161, %v163_v52   ;;  %v1631_v57 = vmul.f32 %v2826_v36, %v2786_v16 }
 0x511   : > { %v973_v37 = vmul.f32 %v2860_v63, %v931_v2 }
 0x513   : > { %v981_v24 = vmax.f32 %v973_v37, 1e-08 }
 0x515   : > { %v1056_v23 = vand.u32 2147483648, %v981_v24  ;;  %vm1050_vm9 = vweird.f32 %v981_v24  ;;  %v1054_v40 = vand.u32 2147483647, %v981_v24 }
 0x517   : > { %v1057_v31 = vor.u32 1.1754944e-38, %v1056_v23  ;;  %vm1055_vm11 = vcmp.eq.f32.partialorder %v1054_v40, 8.507059e+37 }
 0x518   : > { %2162 = vset.pattern.permute.xlu0 %v2459_v32 }
 0x534   : > { %1623 = vadd.xlane.f32.xlu1 %v2826_v36 }
 0x54d   : > { %601 = vrot.lane.b32.xlu1 %v2839_v38, %s2460_s4 }
 0x553   : > { %v2873_v34 = vpop.permute.xlu2 %1462 }
 0x55b   : > { %v1629_v3 = vpop.permute.xlu2 %1628 }
 0x563   : > { %v1634_v9 = vpop.permute.xlu2 %1633 }
 0x564   : > { %v1635_v2 = vmul.f32 %v1634_v9, %v2780_v7  ;;  %v2891_v7 = vpop.permute.xlu0 %1391 }
 0x56b   : > { %v2844_v54 = vpop.permute.xlu1 %1418 }
 0x56c   : > { %v2893_v23 = vpop.permute.xlu0 %1681 }
 0x574   : > { %v2847_v14 = vpop.permute.xlu1 %1526 }
 0x57c   : > { %v2849_v55 = vpop.permute.xlu1 %1503 }
 0x582   : > { %v198_v33 = vpop.permute.xlu0 %197 }
 0x5a7   : > { %v1624_v53 = vpop.xlane.xlu1 %1623 }
 0x5a8   : > { %v1625_v58 = vmax.f32 %v1624_v53, 1e-12 }
 0x5aa   : > { %2298 = vrcp.f32 %v1625_v58 }
 0x5ab   : > { %2300 = vrcp.f32 %v981_v24 }
 0x5ac   : > { %2302 = vpow2.f32 %v400_v6 }
 0x5b0   : > { %v2863_v11 = vpop.eup %2298 }
 0x5b1   : > { %v1627_v12 = vmul.f32 %v2863_v11, %v1331_v59  ;;  %v2301_v17 = vpop.eup %2300 }
 0x5b2   : > { %v1046_v18 = vmul.f32 %v2301_v17, %v981_v24  ;;  %vm1051_vm8 = vweird.f32 %v2301_v17  ;;  %v2303_v50 = vpop.eup %2302 }
 0x5b3   : > { %1639 = vperm.xlu2 %2158, %v1627_v12   ;;  %vm1052_vm10 = vmor %vm1050_vm9, %vm1051_vm8  ;;  %v412_v8 = vadd.f32 1.0, %v2303_v50 }
 0x5b4   : > { %v1047_v27 = vsub.f32 1.0, %v1046_v18 }
 0x5b5   : > { %2304 = vrcp.f32 %v412_v8  ;;  %vm481_vm12 = vweird.f32 %v412_v8  ;;  %v485_v13 = vand.u32 2147483647, %v412_v8 }
 0x5b6   : > { %v1048_v20 = vmul.f32 %v2301_v17, %v1047_v27 }
 0x5b7   : > { %vm486_vm15 = vcmp.eq.f32.partialorder %v485_v13, 8.507059e+37 }
 0x5b8   : > { %v1049_v29 = vadd.f32 %v2301_v17, %v1048_v20 }
 0x5ba   : > { %v1053_v26 = vsel %vm1052_vm10, %v2301_v17, %v1049_v29 }
 0x5bb   : > { %2159 = vset.pattern.permute.xlu2 %v2454_v1  ;;  %v1058_v39 = vsel %vm1055_vm11, %v1057_v31, %v1053_v26  ;;  %v2305_v42 = vpop.eup %2304  ;;  %v2905_v26 = vld [vmem:[%s3275_s1 + $0x18] ss:$0 sm:$0xff] }
 0x5bc   : > { %v1059_v28 = vmul.f32 %v1058_v39, %v828_v21  ;;  %v477_v46 = vmul.f32 %v2305_v42, %v412_v8  ;;  %vm482_vm13 = vweird.f32 %v2305_v42  ;;  %v2911_v21 = vld [vmem:[%s3275_s1 + $0x19] ss:$0 sm:$0xff] }
 0x5bd   : > { %vm483_vm14 = vmor %vm481_vm12, %vm482_vm13 }
 0x5be   : > { %v2870_v35 = vmul.f32 %v1128_v41, %v1059_v28  ;;  %v478_v47 = vsub.f32 1.0, %v477_v46  ;;  %v487_v41 = vand.u32 2147483648, %v412_v8 }
 0x5c0   : > { %v479_v62 = vmul.f32 %v2305_v42, %v478_v47  ;;  %v488_v44 = vor.u32 1.1754944e-38, %v487_v41 }
 0x5c2   : > { %v480_v51 = vadd.f32 %v2305_v42, %v479_v62 }
 0x5c4   : > { %v484_v53 = vsel %vm483_vm14, %v2305_v42, %v480_v51 }
 0x5c5   : > { %v2877_v58 = vsel %vm486_vm15, %v488_v44, %v484_v53 }
 0x5dc   : > { %1161 = vmax.xlane.f32.xlu2 %v2870_v35 }
 0x5f4   : > { %235 = vperm.xlu2 %2159, %v2796_v30   ;;  %v1630_v30 = vmul.f32 %v1629_v3, %v2777_v4 }
 0x5f6   : > { %v1632_v59 = vadd.f32 %v1631_v57, %v1630_v30 }
 0x5f8   : > { %v1636_v37 = vadd.f32 %v1635_v2, %v1632_v59 }
 0x5fc   : > { %239 = vperm.xlu2 %2159, %v163_v52  }
 0x604   : > { %2163 = vset.pattern.permute.xlu2 %v2459_v32 }
 0x605   : > { %1359 = vperm.xlu2 %2163, %v2877_v58  }
 0x60d   : > { %v1640_v12 = vpop.permute.xlu2 %1639  ;;  %2167 = vset.pattern.permute.xlu2 %v2463_v49 }
 0x60e   : > { %v1642_v24 = vmul.f32 %v1640_v12, %v1636_v37 }
 0x610   : > { %v1643_v52 = vadd.f32 %v1642_v24, %v2793_v22  ;;  %v2898_v22 = vld [vmem:[%s3275_s1 + $0x17] ss:$0 sm:$0xff] }
 0x611   : > { %v212_v6 = vmul.f32 %v2898_v22, %v198_v33 }
 0x612   : > { %v1644_v17 = vmax.f32 %v1643_v52, 1e-30  ;;  %v602_v52 = vpop.permute.xlu1 %601 }
 0x614   : > { %2306 = vlog2.f32 %v1644_v17 }
 0x61a   : > { %v2307_v18 = vpop.eup %2306 }
 0x61b   : > { %v1646_v27 = vmul.f32 0.6931472, %v2307_v18 }
 0x61d   : > { %v1652_v20 = vmul.f32 %v2819_v60, %v1646_v27  ;;  %v211_v60 = vmul.f32 %v2898_v22, %v2821_v19 }
 0x61f   : > { %v1653_v4 = vmul.f32 1.442695, %v1652_v20  ;;  %v1332_v20 = vsub.f32 1.0, %v2803_v45 }
 0x621   : > { %2308 = vpow2.f32 %v1653_v4 }
 0x627   : > { %v2887_v29 = vpop.eup %2308 }
 0x628   : > { %1665 = vrot.lane.b32.xlu0 %v2887_v29, %s2455_s18 }
 0x64f   : > { %v1162_v16 = vpop.xlane.xlu2 %1161 }
 0x650   : > { %v1173_v3 = vsub.f32 %v2870_v35, %v1162_v16 }
 0x652   : > { %v1185_v51 = vmul.f32 1.442695, %v1173_v3 }
 0x654   : > { %2310 = vpow2.f32 %v1185_v51 }
 0x657   : > { %v236_v40 = vpop.permute.xlu2 %235 }
 0x658   : > { %v252_v31 = vmul.f32 %v2905_v26, %v236_v40  ;;  %v630_v40 = vsel %vm617_vm3, %v602_v52, 0.0 }
 0x65a   : > { %v260_v39 = vadd.f32 %v252_v31, %v211_v60  ;;  %v2935_v44 = vpop.eup %2310 }
 0x65c   : > { %v2914_v28 = vadd.f32 %v2911_v21, %v260_v39 }
 0x65e   : > { %2093 = vmatmul.msk.f32.gmra.mxu2 %vm770_vm1, %v2914_v28  ;;  %v552_v19 = vsel %vm536_vm2, %v2914_v28, -inf  ;;  %v845_v50 = vmul.f32 %v2914_v28, %v2914_v28  ;;  %v285_v41 = vmin.f32 %v2914_v28, 20.0  ;;  %vm277_vm4 = vcmp.gt.f32.partialorder %v2914_v28, 20.0 }
 0x65f   : > { %553 = vmax.xlane.f32.xlu2 %v552_v19  ;;  %v240_v8 = vpop.permute.xlu2 %239 }
 0x660   : > { %v253_v42 = vmul.f32 %v2905_v26, %v240_v8  ;;  %v863_v46 = vsel %vm770_vm1, %v845_v50, 0.0  ;;  %v298_v13 = vmul.f32 1.442695, %v285_v41 }
 0x661   : > { %864 = vadd.xlane.f32.xlu1 %v863_v46 }
 0x662   : > { %v261_v47 = vadd.f32 %v253_v42, %v212_v6  ;;  %2312 = vpow2.f32 %v298_v13 }
 0x664   : > { %v2926_v62 = vadd.f32 %v2911_v21, %v261_v47 }
 0x666   : > { %2094 = vmatmul.msk.f32.vlgmr.msra.gmra.mxu3 %vm770_vm1, %v2926_v62 }
 0x667   : > { %v1360_v46 = vpop.permute.xlu2 %1359 }
 0x668   : > { %v2313_v53 = vpop.eup %2312 }
 0x669   : > { %1655 = vadd.xlane.f32.xlu1 %v2887_v29  ;;  %v349_v9 = vadd.f32 1.0, %v2313_v53  ;;  %v352_v30 = vmul.f32 -0.5, %v2313_v53  ;;  %v355_v59 = vand.u32 2147483647, %v2313_v53 }
 0x66b   : > { %2314 = vlog2.f32 %v349_v9  ;;  %v353_v2 = vadd.f32 1.0, %v352_v30  ;;  %vm356_vm0 = vcmp.lt.f32.partialorder %v355_v59, 0.0004427343 }
 0x66d   : > { %v354_v12 = vmul.f32 %v2313_v53, %v353_v2 }
 0x671   : > { %v2315_v57 = vpop.eup %2314 }
 0x672   : > { %v351_v37 = vmul.f32 0.6931472, %v2315_v57 }
 0x674   : > { %v357_v35 = vsel %vm356_vm0, %v354_v12, %v351_v37 }
 0x675   : > { %v2940_v24 = vsel %vm277_vm4, %v2914_v28, %v357_v35 }
 0x682   : > { %1660 = vrot.lane.b32.xlu1 %v2887_v29, %s2456_s19 }
 0x69a   : > { %v2952_v31 = vpop.permute.xlu0 %1665 }
 0x6ac   : > { %1201 = vadd.xlane.f32.xlu1 %v2935_v44 }
 0x6c5   : > { %1132 = vperm.xlu1 %2164, %v2940_v24  }
 0x6cd   : > { %2166 = vset.pattern.permute.xlu1 %v2462_v15 }
 0x6d2   : > { %v554_v9 = vpop.xlane.xlu2 %553 }
 0x6d3   : > { %v566_v12 = vsub.f32 %v2914_v28, %v554_v9 }
 0x6d4   : > { %v2944_v17 = vpop.xlane.xlu1 %864 }
 0x6d5   : > { %vm939_vm13 = vcmp.eq.f32.partialorder %v2944_v17, inf  ;;  %vm941_vm14 = vcmp.eq.f32.partialorder %v2944_v17, 0.0 }
 0x6dc   : > { %v1656_v18 = vpop.xlane.xlu1 %1655 }
 0x6dd   : > { %v1657_v27 = vmax.f32 %v1656_v18, 1e-12 }
 0x6df   : > { %2316 = vrcp.f32 %v1657_v27 }
 0x6e0   : > { %2318 = vrsqrt.f32 %v2944_v17 }
 0x6e5   : > { %v2947_v4 = vpop.eup %2316 }
 0x6e6   : > { %v1659_v16 = vmul.f32 %v2947_v4, %v1332_v20  ;;  %v2319_v45 = vpop.eup %2318 }
 0x6e7   : > { %v933_v6 = vmul.f32 %v2319_v45, %v2944_v17 }
 0x6e8   : > { %1671 = vperm.xlu0 %2162, %v1659_v16  }
 0x6e9   : > { %v934_v42 = vmul.f32 %v2319_v45, %v933_v6 }
 0x6eb   : > { %v935_v3 = vmul.f32 0.5, %v934_v42 }
 0x6ed   : > { %v936_v53 = vsub.f32 1.5, %v935_v3 }
 0x6ef   : > { %v937_v35 = vmul.f32 %v2319_v45, %v936_v53 }
 0x6f0   : > { %2165 = vset.pattern.permute.xlu0 %v2461_v56 }
 0x6f1   : > { %v938_v42 = vmul.f32 %v937_v35, %v2944_v17 }
 0x6f4   : > { %v1661_v60 = vpop.permute.xlu1 %1660 }
 0x6f5   : > { %v1662_v9 = vmul.f32 %v1661_v60, %v2844_v54 }
 0x712   : > { %631 = vadd.xlane.f32.xlu0 %v630_v40 }
 0x71f   : > { %v1202_v39 = vpop.xlane.xlu1 %1201 }
 0x720   : > { %2320 = vrcp.f32 %v1202_v39  ;;  %vm1274_vm7 = vweird.f32 %v1202_v39  ;;  %v1280_v52 = vand.u32 2147483648, %v1202_v39  ;;  %v1278_v27 = vand.u32 2147483647, %v1202_v39 }
 0x722   : > { %v1281_v45 = vor.u32 1.1754944e-38, %v1280_v52  ;;  %vm1279_vm12 = vcmp.eq.f32.partialorder %v1278_v27, 8.507059e+37 }
 0x726   : > { %v2321_v19 = vpop.eup %2320 }
 0x727   : > { %v1270_v50 = vmul.f32 %v2321_v19, %v1202_v39  ;;  %vm1275_vm5 = vweird.f32 %v2321_v19  ;;  %v940_v39 = vsel %vm939_vm13, %v2944_v17, %v938_v42 }
 0x728   : > { %vm2959_vm8 = vmor %vm1274_vm7, %vm1275_vm5 }
 0x729   : > { %v1271_v47 = vsub.f32 1.0, %v1270_v50  ;;  %v579_v50 = vmul.f32 1.442695, %v566_v12 }
 0x72b   : > { %v1272_v51 = vmul.f32 %v2321_v19, %v1271_v47 }
 0x72d   : > { %v1273_v2 = vadd.f32 %v2321_v19, %v1272_v51 }
 0x72f   : > { %v1277_v6 = vsel %vm2959_vm8, %v2321_v19, %v1273_v2  ;;  %v1484_v2 = vmul.f32 %v2873_v34, %v2813_v5 }
 0x730   : > { %v1282_v51 = vsel %vm1279_vm12, %v1281_v45, %v1277_v6 }
 0x731   : > { %v1283_v19 = vmul.f32 %v2935_v44, %v1282_v51  ;;  %v1663_v44 = vmul.f32 %v2887_v29, %v2873_v34  ;;  %v164_v51 = vld [vmem:[%s2498_s15 + $0x38] sm:$0xff] }
 0x733   : > { %v1664_v60 = vadd.f32 %v1663_v44, %v1662_v9 }
 0x75a   : > { %v2955_v33 = vpop.permute.xlu0 %1671 }
 0x785   : > { %v632_v8 = vpop.xlane.xlu0 %631 }
 0x786   : > { %2322 = vrcp.f32 %v632_v8  ;;  %v713_v57 = vand.u32 2147483648, %v632_v8  ;;  %v711_v37 = vand.u32 2147483647, %v632_v8  ;;  %vm707_vm9 = vweird.f32 %v632_v8 }
 0x787   : > { %2324 = vpow2.f32 %v579_v50  ;;  %v1133_v50 = vpop.permute.xlu1 %1132 }
 0x788   : > { %v714_v16 = vor.u32 1.1754944e-38, %v713_v57  ;;  %vm712_vm11 = vcmp.eq.f32.partialorder %v711_v37, 8.507059e+37  ;;  %v1667_v57 = vmul.f32 %v2952_v31, %v2847_v14 }
 0x78a   : > { %v1668_v37 = vadd.f32 %v1667_v57, %v1664_v60 }
 0x78c   : > { %v2323_v41 = vpop.eup %2322  ;;  %v1674_v35 = vmul.f32 %v2955_v33, %v1668_v37 }
 0x78d   : > { %v703_v13 = vmul.f32 %v2323_v41, %v632_v8  ;;  %vm708_vm6 = vweird.f32 %v2323_v41  ;;  %v942_v8 = vand.u32 2147483648, %v2944_v17  ;;  %v2974_v53 = vpop.eup %2324 }
 0x78e   : > { %vm709_vm10 = vmor %vm707_vm9, %vm708_vm6 }
 0x78f   : > { %v704_v30 = vsub.f32 1.0, %v703_v13  ;;  %v2972_v13 = vmul.f32 %v1360_v46, %v1283_v19  ;;  %v766_v46 = vadd.f32 1.0, %v2771_v48 }
 0x791   : > { %v705_v59 = vmul.f32 %v2323_v41, %v704_v30  ;;  %v1444_v30 = vmul.f32 %v2844_v54, %v2891_v7 }
 0x793   : > { %v706_v20 = vadd.f32 %v2323_v41, %v705_v59  ;;  %v1548_v59 = vmul.f32 %v2847_v14, %v2849_v55  ;;  %v1492_v12 = vadd.f32 %v1484_v2, %v1444_v30 }
 0x795   : > { %v710_v40 = vsel %vm709_vm10, %v2323_v41, %v706_v20  ;;  %v943_v41 = vsel %vm941_vm14, %v942_v8, %v940_v39  ;;  %v1556_v52 = vadd.f32 %v1548_v59, %v1492_v12 }
 0x796   : > { %v715_v47 = vsel %vm712_vm11, %v714_v16, %v710_v40  ;;  %vm278_vm11 = vcmp.gt.f32.partialorder %v2926_v62, 20.0 }
 0x797   : > { %v716_v3 = vmul.f32 %v2839_v38, %v715_v47  ;;  %v974_v38 = vmul.f32 %v2860_v63, %v943_v41  ;;  %v1675_v18 = vadd.f32 %v1674_v35, %v1556_v52 }
 0x799   : > { %1530 = vperm.xlu2 %2167, %v716_v3   ;;  %1466 = vperm.xlu1 %2166, %v716_v3   ;;  %v982_v17 = vmax.f32 %v974_v38, 1e-08  ;;  %v1676_v54 = vmax.f32 %v1675_v18, 1e-30 }
 0x79a   : > { %1423 = vperm.xlu0 %2165, %v716_v3  }
 0x79b   : > { %2326 = vrcp.f32 %v982_v17  ;;  %v1071_v34 = vand.u32 2147483648, %v982_v17  ;;  %vm1065_vm0 = vweird.f32 %v982_v17  ;;  %v1069_v14 = vand.u32 2147483647, %v982_v17 }
 0x79c   : > { %2328 = vlog2.f32 %v1676_v54 }
 0x79d   : > { %v1072_v33 = vor.u32 1.1754944e-38, %v1071_v34  ;;  %vm1070_vm5 = vcmp.eq.f32.partialorder %v1069_v14, 8.507059e+37  ;;  %v1333_v34 = vsub.f32 1.0, %v2877_v58 }
 0x7a1   : > { %603 = vrot.lane.b32.xlu2 %v2974_v53, %s2460_s4  ;;  %1393 = vrot.lane.b32.xlu1 %v2972_v13, %s2456_s19  ;;  %v2327_v48 = vpop.eup %2326 }
 0x7a2   : > { %1505 = vrot.lane.b32.xlu0 %v2972_v13, %s2455_s18  ;;  %2168 = vset.pattern.permute.xlu2 %v2457_v10  ;;  %v1061_v27 = vmul.f32 %v2327_v48, %v982_v17  ;;  %v2329_v20 = vpop.eup %2328  ;;  %vm1066_vm15 = vweird.f32 %v2327_v48 }
 0x7a3   : > { %2172 = vset.pattern.permute.xlu1 %v2459_v32  ;;  %2169 = vset.pattern.permute.xlu0 %v2459_v32  ;;  %vm1067_vm4 = vmor %vm1065_vm0, %vm1066_vm15  ;;  %v1678_v55 = vmul.f32 0.6931472, %v2329_v20 }
 0x7a4   : > { %v1062_v7 = vsub.f32 1.0, %v1061_v27 }
 0x7a5   : > { %v1684_v6 = vmul.f32 %v2893_v23, %v1678_v55  ;;  %v389_v23 = vsub.f32 0.0, %v2914_v28 }
 0x7a6   : > { %v1063_v31 = vmul.f32 %v2327_v48, %v1062_v7 }
 0x7a7   : > { %v1685_v45 = vmul.f32 1.442695, %v1684_v6  ;;  %v402_v39 = vmul.f32 1.442695, %v389_v23 }
 0x7a8   : > { %v1064_v5 = vadd.f32 %v2327_v48, %v1063_v31 }
 0x7a9   : > { %1713 = vperm.xlu2 %2168, %v766_v46   ;;  %2330 = vpow2.f32 %v1685_v45 }
 0x7aa   : > { %v1068_v16 = vsel %vm1067_vm4, %v2327_v48, %v1064_v5  ;;  %2332 = vpow2.f32 %v402_v39 }
 0x7ab   : > { %v1073_v40 = vsel %vm1070_vm5, %v1072_v33, %v1068_v16 }
 0x7af   : > { %v3001_v3 = vpop.eup %2330 }
 0x7b0   : > { %v2333_v41 = vpop.eup %2332 }
 0x7b1   : > { %2170 = vset.pattern.permute.xlu2 %v2453_v0  ;;  %v831_v0 = vpop.f32.mrf.mxu2  ;;  %v413_v28 = vadd.f32 1.0, %v2333_v41 }
 0x7b2   : > { %v1074_v42 = vmul.f32 %v1073_v40, %v831_v0  ;;  %202 = vperm.xlu2 %2170, %v164_v51  }
 0x7b3   : > { %2334 = vrcp.f32 %v413_v28  ;;  %v502_v12 = vand.u32 2147483648, %v413_v28  ;;  %vm496_vm7 = vweird.f32 %v413_v28  ;;  %v500_v35 = vand.u32 2147483647, %v413_v28 }
 0x7b4   : > { %v1150_v47 = vmul.f32 %v1133_v50, %v1074_v42  ;;  %v555_v50 = vsel %vm536_vm2, %v2926_v62, -inf  ;;  %v286_v42 = vmin.f32 %v2926_v62, 20.0 }
 0x7b5   : > { %v503_v52 = vor.u32 1.1754944e-38, %v502_v12  ;;  %vm501_vm9 = vcmp.eq.f32.partialorder %v500_v35, 8.507059e+37 }
 0x7b6   : > { %v300_v45 = vmul.f32 1.442695, %v286_v42 }
 0x7b9   : > { %v2335_v30 = vpop.eup %2334 }
 0x7ba   : > { %2171 = vset.pattern.permute.xlu2 %v2454_v1  ;;  %v492_v57 = vmul.f32 %v2335_v30, %v413_v28  ;;  %vm497_vm6 = vweird.f32 %v2335_v30 }
 0x7bb   : > { %243 = vperm.xlu2 %2171, %v164_v51   ;;  %vm498_vm8 = vmor %vm496_vm7, %vm497_vm6 }
 0x7bc   : > { %v493_v2 = vsub.f32 1.0, %v492_v57 }
 0x7be   : > { %v494_v59 = vmul.f32 %v2335_v30, %v493_v2 }
 0x7c0   : > { %v495_v37 = vadd.f32 %v2335_v30, %v494_v59 }
 0x7c3   : > { %2174 = vset.pattern.permute.xlu2 %v2461_v56 }
 0x7cb   : > { %1163 = vmax.xlane.f32.xlu1 %v1150_v47 }
 0x7d3   : > { %1687 = vadd.xlane.f32.xlu1 %v3001_v3 }
 0x7ec   : > { %1692 = vrot.lane.b32.xlu1 %v3001_v3, %s2456_s19 }
 0x7f3   : > { %v3014_v19 = vpop.permute.xlu2 %1530 }
 0x7f4   : > { %1697 = vrot.lane.b32.xlu1 %v3001_v3, %s2455_s18 }
 0x7fb   : > { %v604_v60 = vpop.permute.xlu2 %603 }
 0x7fc   : > { %v633_v46 = vsel %vm617_vm3, %v604_v60, 0.0 }
 0x803   : > { %v3031_v5 = vpop.permute.xlu2 %1713 }
 0x80b   : > { %v3012_v8 = vpop.permute.xlu1 %1466 }
 0x80c   : > { %v3016_v38 = vpop.permute.xlu0 %1423  ;;  %v1485_v44 = vmul.f32 %v3012_v8, %v2972_v13  ;;  %v499_v13 = vsel %vm498_vm8, %v2335_v30, %v495_v37  ;;  %v203_v16 = vpop.permute.xlu2 %202 }
 0x80d   : > { %v3024_v48 = vsel %vm501_vm9, %v503_v52, %v499_v13  ;;  %v213_v33 = vmul.f32 %v2898_v22, %v203_v16  ;;  %v846_v22 = vmul.f32 %v2926_v62, %v2926_v62 }
 0x813   : > { %v1394_v9 = vpop.permute.xlu1 %1393 }
 0x814   : > { %v1445_v1 = vmul.f32 %v3016_v38, %v1394_v9 }
 0x815   : > { %v244_v40 = vpop.permute.xlu2 %243 }
 0x816   : > { %v3021_v17 = vadd.f32 %v1485_v44, %v1445_v1  ;;  %v254_v6 = vmul.f32 %v2905_v26, %v244_v40  ;;  %v866_v26 = vsel %vm770_vm1, %v846_v22, 0.0 }
 0x818   : > { %v262_v0 = vadd.f32 %v254_v6, %v213_v33 }
 0x81a   : > { %v3043_v58 = vadd.f32 %v2911_v21, %v262_v0 }
 0x81c   : > { %2095 = vmatmul.msk.f32.gmra.mxu3 %vm770_vm1, %v3043_v58 }
 0x81e   : > { %634 = vadd.xlane.f32.xlu1 %v633_v46 }
 0x837   : > { %1364 = vperm.xlu1 %2172, %v3024_v48  }
 0x83e   : > { %v1164_v18 = vpop.xlane.xlu1 %1163 }
 0x83f   : > { %v1174_v27 = vsub.f32 %v1150_v47, %v1164_v18  ;;  %2177 = vset.pattern.permute.xlu1 %v2457_v10 }
 0x841   : > { %v1187_v54 = vmul.f32 1.442695, %v1174_v27 }
 0x843   : > { %2336 = vpow2.f32 %v1187_v54 }
 0x846   : > { %v1688_v7 = vpop.xlane.xlu1 %1687 }
 0x847   : > { %v1689_v31 = vmax.f32 %v1688_v7, 1e-12  ;;  %v1506_v7 = vpop.permute.xlu0 %1505 }
 0x848   : > { %v1549_v33 = vmul.f32 %v3014_v19, %v1506_v7 }
 0x849   : > { %v3028_v20 = vpop.eup %2336  ;;  %2338 = vrcp.f32 %v1689_v31 }
 0x84a   : > { %1203 = vadd.xlane.f32.xlu2 %v3028_v20  ;;  %2340 = vpow2.f32 %v300_v45 }
 0x84f   : > { %v3034_v14 = vpop.eup %2338 }
 0x850   : > { %v1691_v55 = vmul.f32 %v3034_v14, %v1333_v34  ;;  %v2341_v47 = vpop.eup %2340 }
 0x851   : > { %v358_v51 = vadd.f32 1.0, %v2341_v47  ;;  %v361_v39 = vmul.f32 -0.5, %v2341_v47  ;;  %v364_v9 = vand.u32 2147483647, %v2341_v47 }
 0x852   : > { %1703 = vperm.xlu0 %2169, %v1691_v55   ;;  %v1695_v55 = vmul.f32 %v3001_v3, %v3012_v8 }
 0x853   : > { %2342 = vlog2.f32 %v358_v51  ;;  %v362_v41 = vadd.f32 1.0, %v361_v39  ;;  %vm365_vm10 = vcmp.lt.f32.partialorder %v364_v9, 0.0004427343 }
 0x855   : > { %v363_v28 = vmul.f32 %v2341_v47, %v362_v41 }
 0x859   : > { %v2343_v21 = vpop.eup %2342 }
 0x85a   : > { %2173 = vset.pattern.permute.xlu0 %v2458_v25  ;;  %v360_v44 = vmul.f32 0.6931472, %v2343_v21 }
 0x85c   : > { %v366_v60 = vsel %vm365_vm10, %v363_v28, %v360_v44 }
 0x85d   : > { %v3053_v46 = vsel %vm278_vm11, %v2926_v62, %v366_v60 }
 0x85e   : > { %v1693_v23 = vpop.permute.xlu1 %1692 }
 0x85f   : > { %v1694_v31 = vmul.f32 %v1693_v23, %v3016_v38 }
 0x861   : > { %556 = vmax.xlane.f32.xlu1 %v555_v50  ;;  %v1557_v50 = vadd.f32 %v1549_v33, %v3021_v17 }
 0x866   : > { %v1698_v1 = vpop.permute.xlu1 %1697 }
 0x867   : > { %v1699_v16 = vmul.f32 %v1698_v1, %v3014_v19 }
 0x87c   : > { %867 = vadd.xlane.f32.xlu0 %v866_v26 }
 0x890   : > { %1137 = vperm.xlu0 %2173, %v3053_v46  }
 0x891   : > { %v635_v30 = vpop.xlane.xlu1 %634 }
 0x892   : > { %2344 = vrcp.f32 %v635_v30  ;;  %v728_v37 = vand.u32 2147483648, %v635_v30  ;;  %v726_v35 = vand.u32 2147483647, %v635_v30  ;;  %vm722_vm13 = vweird.f32 %v635_v30 }
 0x894   : > { %v729_v52 = vor.u32 1.1754944e-38, %v728_v37  ;;  %vm727_vm15 = vcmp.eq.f32.partialorder %v726_v35, 8.507059e+37 }
 0x898   : > { %v2345_v57 = vpop.eup %2344  ;;  %2175 = vset.pattern.permute.xlu0 %v2462_v15 }
 0x899   : > { %v718_v2 = vmul.f32 %v2345_v57, %v635_v30  ;;  %vm723_vm12 = vweird.f32 %v2345_v57 }
 0x89a   : > { %vm724_vm14 = vmor %vm722_vm13, %vm723_vm12  ;;  %vm279_vm13 = vcmp.gt.f32.partialorder %v3043_v58, 20.0 }
 0x89b   : > { %v719_v59 = vsub.f32 1.0, %v718_v2 }
 0x89d   : > { %v720_v12 = vmul.f32 %v2345_v57, %v719_v59 }
 0x89f   : > { %v721_v13 = vadd.f32 %v2345_v57, %v720_v12 }
 0x8a1   : > { %v725_v18 = vsel %vm724_vm14, %v2345_v57, %v721_v13 }
 0x8a2   : > { %v730_v27 = vsel %vm727_vm15, %v729_v52, %v725_v18  ;;  %v767_v18 = vadd.f32 1.0, %v2940_v24 }
 0x8a3   : > { %v731_v54 = vmul.f32 %v2974_v53, %v730_v27  ;;  %v1696_v53 = vadd.f32 %v1695_v55, %v1694_v31 }
 0x8a5   : > { %1470 = vperm.xlu0 %2175, %v731_v54   ;;  %1428 = vperm.xlu2 %2174, %v731_v54   ;;  %v1700_v40 = vadd.f32 %v1699_v16, %v1696_v53 }
 0x8a9   : > { %v1365_v39 = vpop.permute.xlu1 %1364 }
 0x8ad   : > { %2176 = vset.pattern.permute.xlu0 %v2463_v49  ;;  %2179 = vset.pattern.permute.xlu2 %v2459_v32 }
 0x8ae   : > { %1534 = vperm.xlu0 %2176, %v731_v54  }
 0x8b6   : > { %2178 = vset.pattern.permute.xlu0 %v2459_v32 }
 0x8bd   : > { %v1204_v34 = vpop.xlane.xlu2 %1203 }
 0x8be   : > { %2346 = vrcp.f32 %v1204_v34  ;;  %v1295_v38 = vand.u32 2147483648, %v1204_v34  ;;  %v1293_v51 = vand.u32 2147483647, %v1204_v34  ;;  %vm1289_vm4 = vweird.f32 %v1204_v34 }
 0x8c0   : > { %v1296_v19 = vor.u32 1.1754944e-38, %v1295_v38  ;;  %vm1294_vm6 = vcmp.eq.f32.partialorder %v1293_v51, 8.507059e+37 }
 0x8c4   : > { %v2347_v6 = vpop.eup %2346  ;;  %v1704_v0 = vpop.permute.xlu0 %1703 }
 0x8c5   : > { %v1285_v42 = vmul.f32 %v2347_v6, %v1204_v34  ;;  %v1706_v45 = vmul.f32 %v1704_v0, %v1700_v40  ;;  %vm1290_vm0 = vweird.f32 %v2347_v6 }
 0x8c6   : > { %vm1291_vm5 = vmor %vm1289_vm4, %vm1290_vm0 }
 0x8c7   : > { %v1286_v22 = vsub.f32 1.0, %v1285_v42  ;;  %v1707_v47 = vadd.f32 %v1706_v45, %v1557_v50 }
 0x8c9   : > { %v1287_v26 = vmul.f32 %v2347_v6, %v1286_v22  ;;  %v1708_v23 = vmax.f32 %v1707_v47, 1e-30  ;;  %v834_v22 = vpop.f32.mrf.mxu3 }
 0x8cb   : > { %v1288_v8 = vadd.f32 %v2347_v6, %v1287_v26  ;;  %2348 = vlog2.f32 %v1708_v23 }
 0x8cd   : > { %v1292_v21 = vsel %vm1291_vm5, %v2347_v6, %v1288_v8 }
 0x8ce   : > { %v1297_v41 = vsel %vm1294_vm6, %v1296_v19, %v1292_v21 }
 0x8cf   : > { %v1298_v17 = vmul.f32 %v3028_v20, %v1297_v41  ;;  %v1334_v41 = vsub.f32 1.0, %v3024_v48 }
 0x8d1   : > { %v2349_v9 = vpop.eup %2348  ;;  %v3068_v44 = vmul.f32 %v1365_v39, %v1298_v17 }
 0x8d2   : > { %v1710_v1 = vmul.f32 0.6931472, %v2349_v9  ;;  %v558_v9 = vsel %vm536_vm2, %v3043_v58, -inf }
 0x8d3   : > { %1395 = vrot.lane.b32.xlu2 %v3068_v44, %s2456_s19 }
 0x8d4   : > { %v1716_v28 = vmul.f32 %v3031_v5, %v1710_v1  ;;  %v557_v60 = vpop.xlane.xlu1 %556 }
 0x8d5   : > { %v567_v30 = vsub.f32 %v2926_v62, %v557_v60 }
 0x8d6   : > { %v1717_v57 = vmul.f32 1.442695, %v1716_v28 }
 0x8d7   : > { %v581_v2 = vmul.f32 1.442695, %v567_v30 }
 0x8d8   : > { %2350 = vpow2.f32 %v1717_v57 }
 0x8d9   : > { %2352 = vpow2.f32 %v581_v2 }
 0x8de   : > { %v3074_v59 = vpop.eup %2350 }
 0x8df   : > { %v3076_v37 = vpop.eup %2352  ;;  %1719 = vadd.xlane.f32.xlu1 %v3074_v59 }
 0x8e0   : > { %605 = vrot.lane.b32.xlu0 %v3076_v37, %s2460_s4 }
 0x8ef   : > { %v868_v20 = vpop.xlane.xlu0 %867 }
 0x8f0   : > { %2354 = vrsqrt.f32 %v868_v20  ;;  %vm951_vm7 = vcmp.eq.f32.partialorder %v868_v20, inf  ;;  %v954_v7 = vand.u32 2147483648, %v868_v20  ;;  %vm953_vm8 = vcmp.eq.f32.partialorder %v868_v20, 0.0 }
 0x8f6   : > { %v2355_v12 = vpop.eup %2354 }
 0x8f7   : > { %v945_v5 = vmul.f32 %v2355_v12, %v868_v20 }
 0x8f8   : > { %1507 = vrot.lane.b32.xlu1 %v3068_v44, %s2455_s18 }
 0x8f9   : > { %v946_v35 = vmul.f32 %v2355_v12, %v945_v5  ;;  %v287_v5 = vmin.f32 %v3043_v58, 20.0 }
 0x8fb   : > { %v947_v13 = vmul.f32 0.5, %v946_v35  ;;  %v302_v35 = vmul.f32 1.442695, %v287_v5 }
 0x8fd   : > { %v948_v52 = vsub.f32 1.5, %v947_v13  ;;  %v390_v13 = vsub.f32 0.0, %v2926_v62 }
 0x8ff   : > { %v949_v27 = vmul.f32 %v2355_v12, %v948_v52  ;;  %v3100_v1 = vpop.permute.xlu2 %1428 }
 0x900   : > { %1745 = vperm.xlu1 %2177, %v767_v18   ;;  %v404_v18 = vmul.f32 1.442695, %v390_v13 }
 0x901   : > { %v950_v54 = vmul.f32 %v949_v27, %v868_v20 }
 0x902   : > { %v1138_v38 = vpop.permute.xlu0 %1137 }
 0x903   : > { %v952_v31 = vsel %vm951_vm7, %v868_v20, %v950_v54 }
 0x904   : > { %v955_v34 = vsel %vm953_vm8, %v954_v7, %v952_v31 }
 0x905   : > { %v975_v55 = vmul.f32 %v2860_v63, %v955_v34 }
 0x907   : > { %v983_v16 = vmax.f32 %v975_v55, 1e-08 }
 0x908   : > { %2181 = vset.pattern.permute.xlu1 %v2461_v56 }
 0x909   : > { %2356 = vrcp.f32 %v983_v16  ;;  %v1086_v6 = vand.u32 2147483648, %v983_v16  ;;  %v1084_v24 = vand.u32 2147483647, %v983_v16  ;;  %vm1080_vm10 = vweird.f32 %v983_v16 }
 0x90b   : > { %v1087_v42 = vor.u32 1.1754944e-38, %v1086_v6  ;;  %vm1085_vm12 = vcmp.eq.f32.partialorder %v1084_v24, 8.507059e+37 }
 0x90f   : > { %v2357_v53 = vpop.eup %2356 }
 0x910   : > { %v1076_v33 = vmul.f32 %v2357_v53, %v983_v16  ;;  %vm1081_vm9 = vweird.f32 %v2357_v53 }
 0x911   : > { %vm1082_vm11 = vmor %vm1080_vm10, %vm1081_vm9 }
 0x912   : > { %v1077_v40 = vsub.f32 1.0, %v1076_v33 }
 0x914   : > { %v1078_v0 = vmul.f32 %v2357_v53, %v1077_v40 }
 0x916   : > { %v1079_v50 = vadd.f32 %v2357_v53, %v1078_v0 }
 0x917   : > { %v3090_v51 = vpop.permute.xlu0 %1470 }
 0x918   : > { %v1083_v45 = vsel %vm1082_vm11, %v2357_v53, %v1079_v50  ;;  %v1486_v57 = vmul.f32 %v3090_v51, %v3068_v44 }
 0x919   : > { %v1088_v47 = vsel %vm1085_vm12, %v1087_v42, %v1083_v45 }
 0x91a   : > { %v1089_v63 = vmul.f32 %v1088_v47, %v834_v22 }
 0x91c   : > { %v1151_v26 = vmul.f32 %v1138_v38, %v1089_v63 }
 0x91e   : > { %1165 = vmax.xlane.f32.xlu2 %v1151_v26 }
 0x920   : > { %v3092_v23 = vpop.permute.xlu0 %1534 }
 0x92d   : > { %v1396_v60 = vpop.permute.xlu2 %1395 }
 0x92e   : > { %v1446_v30 = vmul.f32 %v3100_v1, %v1396_v60  ;;  %v1727_v60 = vmul.f32 %v3074_v59, %v3090_v51 }
 0x930   : > { %v1494_v2 = vadd.f32 %v1486_v57, %v1446_v30 }
 0x936   : > { %1724 = vrot.lane.b32.xlu2 %v3074_v59, %s2456_s19 }
 0x93e   : > { %1729 = vrot.lane.b32.xlu2 %v3074_v59, %s2455_s18 }
 0x952   : > { %v606_v8 = vpop.permute.xlu0 %605  ;;  %v1720_v39 = vpop.xlane.xlu1 %1719 }
 0x953   : > { %v1721_v19 = vmax.f32 %v1720_v39, 1e-12  ;;  %v636_v21 = vsel %vm617_vm3, %v606_v8, 0.0 }
 0x954   : > { %637 = vadd.xlane.f32.xlu1 %v636_v21 }
 0x955   : > { %2358 = vrcp.f32 %v1721_v19 }
 0x956   : > { %2360 = vpow2.f32 %v302_v35 }
 0x957   : > { %2362 = vpow2.f32 %v404_v18 }
 0x95b   : > { %v3096_v17 = vpop.eup %2358 }
 0x95c   : > { %559 = vmax.xlane.f32.xlu1 %v558_v9  ;;  %v1723_v28 = vmul.f32 %v3096_v17, %v1334_v41  ;;  %v2361_v52 = vpop.eup %2360 }
 0x95d   : > { %v367_v44 = vadd.f32 1.0, %v2361_v52  ;;  %v370_v54 = vmul.f32 -0.5, %v2361_v52  ;;  %v2363_v7 = vpop.eup %2362  ;;  %v373_v16 = vand.u32 2147483647, %v2361_v52 }
 0x95e   : > { %1735 = vperm.xlu0 %2178, %v1723_v28   ;;  %v414_v6 = vadd.f32 1.0, %v2363_v7 }
 0x95f   : > { %2364 = vlog2.f32 %v367_v44  ;;  %v371_v31 = vadd.f32 1.0, %v370_v54  ;;  %vm374_vm2 = vcmp.lt.f32.partialorder %v373_v16, 0.0004427343 }
 0x960   : > { %v517_v38 = vand.u32 2147483648, %v414_v6  ;;  %vm511_vm14 = vweird.f32 %v414_v6 }
 0x961   : > { %v372_v40 = vmul.f32 %v2361_v52, %v371_v31 }
 0x962   : > { %v518_v39 = vor.u32 1.1754944e-38, %v517_v38  ;;  %v391_v38 = vsub.f32 0.0, %v3043_v58 }
 0x965   : > { %v2365_v34 = vpop.eup %2364 }
 0x966   : > { %2180 = vset.pattern.permute.xlu0 %v2458_v25  ;;  %v847_v25 = vmul.f32 %v3043_v58, %v3043_v58  ;;  %v369_v62 = vmul.f32 0.6931472, %v2365_v34 }
 0x968   : > { %v869_v27 = vsel %vm770_vm1, %v847_v25, 0.0  ;;  %v375_v0 = vsel %vm374_vm2, %v372_v40, %v369_v62 }
 0x969   : > { %v3117_v24 = vsel %vm279_vm13, %v3043_v58, %v375_v0 }
 0x96a   : > { %v1508_v48 = vpop.permute.xlu1 %1507 }
 0x96b   : > { %v1550_v20 = vmul.f32 %v3092_v23, %v1508_v48 }
 0x96d   : > { %v3108_v12 = vadd.f32 %v1550_v20, %v1494_v2 }
 0x972   : > { %v1746_v41 = vpop.permute.xlu1 %1745 }
 0x988   : > { %870 = vadd.xlane.f32.xlu0 %v869_v27 }
 0x991   : > { %v1166_v55 = vpop.xlane.xlu2 %1165 }
 0x992   : > { %v1175_v53 = vsub.f32 %v1151_v26, %v1166_v55  ;;  %v515_v26 = vand.u32 2147483647, %v414_v6 }
 0x994   : > { %v1189_v33 = vmul.f32 1.442695, %v1175_v53  ;;  %vm516_vm0 = vcmp.eq.f32.partialorder %v515_v26, 8.507059e+37 }
 0x996   : > { %2366 = vpow2.f32 %v1189_v33 }
 0x997   : > { %2368 = vrcp.f32 %v414_v6 }
 0x999   : > { %v1725_v21 = vpop.permute.xlu2 %1724 }
 0x99a   : > { %v1726_v28 = vmul.f32 %v1725_v21, %v3100_v1 }
 0x99c   : > { %v3119_v50 = vpop.eup %2366  ;;  %1142 = vperm.xlu0 %2180, %v3117_v24   ;;  %v1728_v57 = vadd.f32 %v1727_v60, %v1726_v28 }
 0x99d   : > { %1205 = vadd.xlane.f32.xlu2 %v3119_v50  ;;  %v2369_v42 = vpop.eup %2368 }
 0x99e   : > { %v507_v45 = vmul.f32 %v2369_v42, %v414_v6  ;;  %vm512_vm1 = vweird.f32 %v2369_v42 }
 0x99f   : > { %vm513_vm15 = vmor %vm511_vm14, %vm512_vm1 }
 0x9a0   : > { %v508_v22 = vsub.f32 1.0, %v507_v45 }
 0x9a1   : > { %v1730_v9 = vpop.permute.xlu2 %1729 }
 0x9a2   : > { %v509_v47 = vmul.f32 %v2369_v42, %v508_v22  ;;  %v1731_v30 = vmul.f32 %v1730_v9, %v3092_v23 }
 0x9a4   : > { %2187 = vset.pattern.permute.xlu0 %v2461_v56  ;;  %v510_v63 = vadd.f32 %v2369_v42, %v509_v47  ;;  %v1732_v20 = vadd.f32 %v1731_v30, %v1728_v57  ;;  %v2444_v47 = vld [vmem:[%s3275_s1 + $0x14] ss:$0 sm:$0xff] }
 0x9a6   : > { %v514_v8 = vsel %vm513_vm15, %v2369_v42, %v510_v63 }
 0x9a7   : > { %v3124_v19 = vsel %vm516_vm0, %v518_v39, %v514_v8  ;;  %v406_v8 = vmul.f32 1.442695, %v391_v38 }
 0x9b5   : > { %1369 = vperm.xlu2 %2179, %v3124_v19  }
 0x9bd   : > { %2182 = vset.pattern.permute.xlu2 %v2462_v15 }
 0x9c7   : > { %v638_v56 = vpop.xlane.xlu1 %637 }
 0x9c8   : > { %2370 = vrcp.f32 %v638_v56  ;;  %v743_v25 = vand.u32 2147483648, %v638_v56  ;;  %v741_v27 = vand.u32 2147483647, %v638_v56  ;;  %vm737_vm5 = vweird.f32 %v638_v56 }
 0x9ca   : > { %v744_v54 = vor.u32 1.1754944e-38, %v743_v25  ;;  %vm742_vm7 = vcmp.eq.f32.partialorder %v741_v27, 8.507059e+37 }
 0x9ce   : > { %v2371_v48 = vpop.eup %2370 }
 0x9cf   : > { %v733_v2 = vmul.f32 %v2371_v48, %v638_v56  ;;  %vm738_vm4 = vweird.f32 %v2371_v48  ;;  %v560_v60 = vpop.xlane.xlu1 %559 }
 0x9d0   : > { %v1736_v5 = vpop.permute.xlu0 %1735  ;;  %vm739_vm6 = vmor %vm737_vm5, %vm738_vm4 }
 0x9d1   : > { %v734_v35 = vsub.f32 1.0, %v733_v2  ;;  %v1738_v13 = vmul.f32 %v1736_v5, %v1732_v20  ;;  %v568_v5 = vsub.f32 %v3043_v58, %v560_v60 }
 0x9d3   : > { %v735_v52 = vmul.f32 %v2371_v48, %v734_v35  ;;  %v1739_v18 = vadd.f32 %v1738_v13, %v3108_v12 }
 0x9d5   : > { %v1740_v1 = vmax.f32 %v1739_v18, 1e-30  ;;  %v736_v44 = vadd.f32 %v2371_v48, %v735_v52 }
 0x9d7   : > { %2372 = vlog2.f32 %v1740_v1  ;;  %v740_v51 = vsel %vm739_vm6, %v2371_v48, %v736_v44 }
 0x9d8   : > { %v745_v23 = vsel %vm742_vm7, %v744_v54, %v740_v51  ;;  %v583_v51 = vmul.f32 1.442695, %v568_v5  ;;  %v1335_v5 = vsub.f32 1.0, %v3124_v19 }
 0x9d9   : > { %v746_v7 = vmul.f32 %v3076_v37, %v745_v23 }
 0x9db   : > { %1474 = vperm.xlu2 %2182, %v746_v7   ;;  %1433 = vperm.xlu1 %2181, %v746_v7  }
 0x9dd   : > { %v2373_v31 = vpop.eup %2372 }
 0x9de   : > { %v1742_v34 = vmul.f32 0.6931472, %v2373_v31 }
 0x9e0   : > { %v3134_v55 = vmul.f32 %v1746_v41, %v1742_v34  ;;  %v837_v34 = vpop.f32.mrf.mxu3 }
 0x9e2   : > { %v1749_v38 = vmul.f32 1.442695, %v3134_v55 }
 0x9e3   : > { %2183 = vset.pattern.permute.xlu1 %v2463_v49  ;;  %2184 = vset.pattern.permute.xlu2 %v2459_v32 }
 0x9e4   : > { %1538 = vperm.xlu1 %2183, %v746_v7  }
 0x9ec   : > { %2186 = vset.pattern.permute.xlu1 %v2459_v32 }
 0x9fb   : > { %v871_v12 = vpop.xlane.xlu0 %870 }
 0x9fc   : > { %2374 = vrsqrt.f32 %v871_v12  ;;  %vm963_vm8 = vcmp.eq.f32.partialorder %v871_v12, inf  ;;  %v966_v0 = vand.u32 2147483648, %v871_v12  ;;  %vm965_vm9 = vcmp.eq.f32.partialorder %v871_v12, 0.0 }
 0xa02   : > { %v2375_v16 = vpop.eup %2374 }
 0xa03   : > { %v957_v53 = vmul.f32 %v2375_v16, %v871_v12 }
 0xa05   : > { %v958_v33 = vmul.f32 %v2375_v16, %v957_v53 }
 0xa07   : > { %v959_v62 = vmul.f32 0.5, %v958_v33 }
 0xa09   : > { %v960_v37 = vsub.f32 1.5, %v959_v62 }
 0xa0b   : > { %v961_v40 = vmul.f32 %v2375_v16, %v960_v37 }
 0xa0d   : > { %v962_v6 = vmul.f32 %v961_v40, %v871_v12 }
 0xa0e   : > { %v1143_v53 = vpop.permute.xlu0 %1142 }
 0xa0f   : > { %v964_v42 = vsel %vm963_vm8, %v871_v12, %v962_v6 }
 0xa10   : > { %v967_v45 = vsel %vm965_vm9, %v966_v0, %v964_v42  ;;  %v1206_v22 = vpop.xlane.xlu2 %1205 }
 0xa11   : > { %v976_v63 = vmul.f32 %v2444_v47, %v967_v45  ;;  %2376 = vrcp.f32 %v1206_v22  ;;  %v1308_v9 = vand.u32 2147483647, %v1206_v22  ;;  %v1310_v28 = vand.u32 2147483648, %v1206_v22 }
 0xa12   : > { %vm1304_vm11 = vweird.f32 %v1206_v22 }
 0xa13   : > { %v984_v26 = vmax.f32 %v976_v63, 1e-08  ;;  %vm1309_vm2 = vcmp.eq.f32.partialorder %v1308_v9, 8.507059e+37  ;;  %v1311_v13 = vor.u32 1.1754944e-38, %v1310_v28 }
 0xa15   : > { %2378 = vrcp.f32 %v984_v26  ;;  %v1101_v35 = vand.u32 2147483648, %v984_v26  ;;  %v1099_v52 = vand.u32 2147483647, %v984_v26  ;;  %vm1095_vm1 = vweird.f32 %v984_v26 }
 0xa16   : > { %2380 = vpow2.f32 %v406_v8 }
 0xa17   : > { %v2377_v39 = vpop.eup %2376  ;;  %v1102_v23 = vor.u32 1.1754944e-38, %v1101_v35  ;;  %vm1100_vm15 = vcmp.eq.f32.partialorder %v1099_v52, 8.507059e+37 }
 0xa18   : > { %v1300_v21 = vmul.f32 %v2377_v39, %v1206_v22  ;;  %vm1305_vm10 = vweird.f32 %v2377_v39  ;;  %v1370_v7 = vpop.permute.xlu2 %1369 }
 0xa19   : > { %vm1306_vm12 = vmor %vm1304_vm11, %vm1305_vm10 }
 0xa1a   : > { %v1301_v41 = vsub.f32 1.0, %v1300_v21 }
 0xa1b   : > { %v2379_v56 = vpop.eup %2378 }
 0xa1c   : > { %v1091_v30 = vmul.f32 %v2379_v56, %v984_v26  ;;  %v1302_v57 = vmul.f32 %v2377_v39, %v1301_v41  ;;  %v2381_v20 = vpop.eup %2380  ;;  %vm1096_vm13 = vweird.f32 %v2379_v56 }
 0xa1d   : > { %v415_v54 = vadd.f32 1.0, %v2381_v20  ;;  %vm1097_vm14 = vmor %vm1095_vm1, %vm1096_vm13 }
 0xa1e   : > { %v1092_v48 = vsub.f32 1.0, %v1091_v30  ;;  %v1303_v2 = vadd.f32 %v2377_v39, %v1302_v57 }
 0xa1f   : > { %2382 = vrcp.f32 %v415_v54  ;;  %vm526_vm0 = vweird.f32 %v415_v54  ;;  %v532_v0 = vand.u32 2147483648, %v415_v54  ;;  %v530_v45 = vand.u32 2147483647, %v415_v54 }
 0xa20   : > { %v1093_v25 = vmul.f32 %v2379_v56, %v1092_v48  ;;  %v1307_v18 = vsel %vm1306_vm12, %v2377_v39, %v1303_v2  ;;  %2384 = vpow2.f32 %v583_v51 }
 0xa21   : > { %v1312_v27 = vsel %vm1309_vm2, %v1311_v13, %v1307_v18  ;;  %v533_v22 = vor.u32 1.1754944e-38, %v532_v0  ;;  %vm531_vm6 = vcmp.eq.f32.partialorder %v530_v45, 8.507059e+37  ;;  %2386 = vpow2.f32 %v1749_v38 }
 0xa22   : > { %v1094_v1 = vadd.f32 %v2379_v56, %v1093_v25  ;;  %v1313_v44 = vmul.f32 %v3119_v50, %v1312_v27  ;;  %v768_v25 = vadd.f32 1.0, %v3053_v46 }
 0xa24   : > { %v1098_v31 = vsel %vm1097_vm14, %v2379_v56, %v1094_v1  ;;  %v1383_v58 = vmul.f32 %v1370_v7, %v1313_v44  ;;  %vm2013_vm14 = vcmask 7168  }
 0xa25   : > { %v1103_v12 = vsel %vm1100_vm15, %v1102_v23, %v1098_v31  ;;  %v2383_v50 = vpop.eup %2382 }
 0xa26   : > { %v1104_v16 = vmul.f32 %v1103_v12, %v837_v34  ;;  %1509 = vrot.lane.b32.xlu0 %v1383_v58, %s2455_s18  ;;  %1397 = vrot.lane.b32.xlu2 %v1383_v58, %s2456_s19  ;;  %v3147_v62 = vpop.eup %2384  ;;  %v522_v37 = vmul.f32 %v2383_v50, %v415_v54  ;;  %vm527_vm4 = vweird.f32 %v2383_v50 }
 0xa27   : > { %vm528_vm5 = vmor %vm526_vm0, %vm527_vm4  ;;  %v3156_v26 = vpop.eup %2386 }
 0xa28   : > { %v1152_v33 = vmul.f32 %v1143_v53, %v1104_v16  ;;  %v523_v40 = vsub.f32 1.0, %v522_v37 }
 0xa2a   : > { %1167 = vmax.xlane.f32.xlu1 %v1152_v33  ;;  %v524_v6 = vmul.f32 %v2383_v50, %v523_v40 }
 0xa2c   : > { %v525_v42 = vadd.f32 %v2383_v50, %v524_v6 }
 0xa2e   : > { %607 = vrot.lane.b32.xlu0 %v3147_v62, %s2460_s4  ;;  %v529_v47 = vsel %vm528_vm5, %v2383_v50, %v525_v42 }
 0xa2f   : > { %v3151_v63 = vsel %vm531_vm6, %v533_v22, %v529_v47 }
 0xa35   : > { %v1475_v8 = vpop.permute.xlu2 %1474 }
 0xa36   : > { %v1487_v56 = vmul.f32 %v1475_v8, %v1383_v58 }
 0xa43   : > { %1374 = vperm.xlu1 %2186, %v3151_v63  }
 0xa4b   : > { %2191 = vset.pattern.permute.xlu1 %v2457_v10 }
 0xa4d   : > { %v1434_v39 = vpop.permute.xlu1 %1433 }
 0xa4f   : > { %1751 = vadd.xlane.f32.xlu2 %v3156_v26 }
 0xa56   : > { %v1539_v9 = vpop.permute.xlu1 %1538 }
 0xa67   : > { %1756 = vrot.lane.b32.xlu2 %v3156_v26, %s2456_s19 }
 0xa6f   : > { %1761 = vrot.lane.b32.xlu2 %v3156_v26, %s2455_s18 }
 0xa80   : > { %v1398_v21 = vpop.permute.xlu2 %1397 }
 0xa81   : > { %v1447_v41 = vmul.f32 %v1434_v39, %v1398_v21 }
 0xa83   : > { %v1495_v28 = vadd.f32 %v1487_v56, %v1447_v41 }
 0xa98   : > { %v1510_v55 = vpop.permute.xlu0 %1509 }
 0xa99   : > { %v1551_v60 = vmul.f32 %v1539_v9, %v1510_v55 }
 0xa9b   : > { %v1559_v30 = vadd.f32 %v1551_v60, %v1495_v28 }
 0xa9d   : > { %v1168_v52 = vpop.xlane.xlu1 %1167 }
 0xa9e   : > { %v1176_v18 = vsub.f32 %v1152_v33, %v1168_v52 }
 0xaa0   : > { %v608_v57 = vpop.permute.xlu0 %607  ;;  %v1191_v27 = vmul.f32 1.442695, %v1176_v18 }
 0xaa1   : > { %v639_v48 = vsel %vm617_vm3, %v608_v57, 0.0 }
 0xaa2   : > { %640 = vadd.xlane.f32.xlu0 %v639_v48 }
 0xac2   : > { %v1752_v2 = vpop.xlane.xlu2 %1751 }
 0xac3   : > { %v1753_v20 = vmax.f32 %v1752_v2, 1e-12 }
 0xac5   : > { %2388 = vrcp.f32 %v1753_v20 }
 0xac6   : > { %2390 = vpow2.f32 %v1191_v27  ;;  %v769_v27 = vadd.f32 1.0, %v3117_v24 }
 0xaca   : > { %v1757_v19 = vpop.permute.xlu2 %1756 }
 0xacb   : > { %v3165_v35 = vpop.eup %2388  ;;  %v1758_v46 = vmul.f32 %v1757_v19, %v1434_v39 }
 0xacc   : > { %v1755_v13 = vmul.f32 %v3165_v35, %v1335_v5  ;;  %v2391_v1 = vpop.eup %2390 }
 0xace   : > { %1767 = vperm.xlu2 %2184, %v1755_v13  }
 0xad2   : > { %v1762_v7 = vpop.permute.xlu2 %1761 }
 0xad3   : > { %v1763_v12 = vmul.f32 %v1762_v7, %v1539_v9 }
 0xad6   : > { %2185 = vset.pattern.permute.xlu2 %v2457_v10 }
 0xad7   : > { %1777 = vperm.xlu2 %2185, %v768_v25   ;;  %v3183_v25 = vld [vmem:[%s3275_s1 + $0x15] ss:$0 sm:$0xff] }
 0xad8   : > { %v1822_v52 = vmul.f32 %v2887_v29, %v3183_v25 }
 0xadf   : > { %2188 = vset.pattern.permute.xlu2 %v2462_v15  ;;  %v1759_v15 = vmul.f32 %v3156_v26, %v1475_v8 }
 0xae1   : > { %v1760_v33 = vadd.f32 %v1759_v15, %v1758_v46 }
 0xae3   : > { %v1764_v40 = vadd.f32 %v1763_v12, %v1760_v33 }
 0xb00   : > { %1207 = vadd.xlane.f32.xlu2 %v2391_v1 }
 0xb15   : > { %v641_v44 = vpop.xlane.xlu0 %640 }
 0xb16   : > { %2392 = vrcp.f32 %v641_v44  ;;  %v758_v31 = vand.u32 2147483648, %v641_v44  ;;  %v756_v34 = vand.u32 2147483647, %v641_v44  ;;  %vm752_vm7 = vweird.f32 %v641_v44 }
 0xb18   : > { %v759_v53 = vor.u32 1.1754944e-38, %v758_v31  ;;  %vm757_vm9 = vcmp.eq.f32.partialorder %v756_v34, 8.507059e+37  ;;  %v3213_v31 = vld [vmem:[%s3275_s1 + $0x1a] ss:$0 sm:$0xff] }
 0xb1c   : > { %v2393_v54 = vpop.eup %2392 }
 0xb1d   : > { %v748_v51 = vmul.f32 %v2393_v54, %v641_v44  ;;  %vm753_vm3 = vweird.f32 %v2393_v54 }
 0xb1e   : > { %vm754_vm8 = vmor %vm752_vm7, %vm753_vm3 }
 0xb1f   : > { %v749_v23 = vsub.f32 1.0, %v748_v51  ;;  %v1823_v51 = vmul.f32 %v3001_v3, %v3183_v25 }
 0xb21   : > { %v750_v58 = vmul.f32 %v2393_v54, %v749_v23 }
 0xb23   : > { %v751_v16 = vadd.f32 %v2393_v54, %v750_v58 }
 0xb25   : > { %v755_v50 = vsel %vm754_vm8, %v2393_v54, %v751_v16  ;;  %v1820_v54 = vmul.f32 %v2733_v61, %v3183_v25  ;;  %v1336_v16 = vsub.f32 1.0, %v3151_v63 }
 0xb26   : > { %v760_v37 = vsel %vm757_vm9, %v759_v53, %v755_v50 }
 0xb27   : > { %v761_v6 = vmul.f32 %v3147_v62, %v760_v37 }
 0xb28   : > { %v1768_v0 = vpop.permute.xlu2 %1767 }
 0xb29   : > { %v1770_v42 = vmul.f32 %v1768_v0, %v1764_v40  ;;  %1438 = vperm.xlu0 %2187, %v761_v6   ;;  %1478 = vperm.xlu2 %2188, %v761_v6  }
 0xb2b   : > { %v1771_v45 = vadd.f32 %v1770_v42, %v1559_v30 }
 0xb2d   : > { %v1772_v48 = vmax.f32 %v1771_v45, 1e-30 }
 0xb31   : > { %2189 = vset.pattern.permute.xlu2 %v2463_v49  ;;  %2190 = vset.pattern.permute.xlu0 %v2459_v32  ;;  %v1778_v22 = vpop.permute.xlu2 %1777  ;;  %v1375_v32 = vpop.permute.xlu1 %1374 }
 0xb32   : > { %1542 = vperm.xlu2 %2189, %v761_v6  }
 0xb73   : > { %v1208_v47 = vpop.xlane.xlu2 %1207 }
 0xb74   : > { %2394 = vrcp.f32 %v1208_v47  ;;  %v1325_v21 = vand.u32 2147483648, %v1208_v47  ;;  %v1323_v62 = vand.u32 2147483647, %v1208_v47  ;;  %vm1319_vm11 = vweird.f32 %v1208_v47 }
 0xb75   : > { %2396 = vlog2.f32 %v1772_v48 }
 0xb76   : > { %v1326_v9 = vor.u32 1.1754944e-38, %v1325_v21  ;;  %vm1324_vm2 = vcmp.eq.f32.partialorder %v1323_v62, 8.507059e+37 }
 0xb7a   : > { %v2395_v38 = vpop.eup %2394 }
 0xb7b   : > { %v1315_v8 = vmul.f32 %v2395_v38, %v1208_v47  ;;  %vm1320_vm10 = vweird.f32 %v2395_v38  ;;  %v2397_v2 = vpop.eup %2396 }
 0xb7c   : > { %vm1321_vm12 = vmor %vm1319_vm11, %vm1320_vm10  ;;  %v1774_v20 = vmul.f32 0.6931472, %v2397_v2 }
 0xb7d   : > { %v1316_v39 = vsub.f32 1.0, %v1315_v8 }
 0xb7e   : > { %v1780_v5 = vmul.f32 %v1778_v22, %v1774_v20 }
 0xb7f   : > { %v1317_v41 = vmul.f32 %v2395_v38, %v1316_v39  ;;  %v1825_v39 = vmul.f32 %v3156_v26, %v3183_v25 }
 0xb80   : > { %v1781_v13 = vmul.f32 1.442695, %v1780_v5 }
 0xb81   : > { %v1318_v56 = vadd.f32 %v2395_v38, %v1317_v41 }
 0xb82   : > { %2398 = vpow2.f32 %v1781_v13 }
 0xb83   : > { %v1322_v55 = vsel %vm1321_vm12, %v2395_v38, %v1318_v56  ;;  %v3175_v30 = vpop.permute.xlu2 %1478  ;;  %v1821_v38 = vmul.f32 %v2826_v36, %v3183_v25 }
 0xb84   : > { %v1327_v49 = vsel %vm1324_vm2, %v1326_v9, %v1322_v55 }
 0xb85   : > { %v1328_v28 = vmul.f32 %v2391_v1, %v1327_v49 }
 0xb87   : > { %v1384_v60 = vmul.f32 %v1375_v32, %v1328_v28 }
 0xb88   : > { %v3187_v18 = vpop.eup %2398 }
 0xb89   : > { %v1488_v57 = vmul.f32 %v3175_v30, %v1384_v60  ;;  %1511 = vrot.lane.b32.xlu2 %v1384_v60, %s2455_s18  ;;  %1399 = vrot.lane.b32.xlu1 %v1384_v60, %s2456_s19  ;;  %v1826_v23 = vmul.f32 %v3187_v18, %v3183_v25 }
 0xb8c   : > { %v3206_v24 = vpop.permute.xlu2 %1542 }
 0xb9b   : > { %v3195_v1 = vpop.permute.xlu0 %1438 }
 0xbb2   : > { %1832 = vadd.xlane.f32.xlu2 %v1822_v52 }
 0xbb3   : > { %1783 = vadd.xlane.f32.xlu1 %v3187_v18 }
 0xbcc   : > { %1788 = vrot.lane.b32.xlu1 %v3187_v18, %s2456_s19 }
 0xbd4   : > { %1793 = vrot.lane.b32.xlu1 %v3187_v18, %s2455_s18 }
 0xbdc   : > { %1809 = vperm.xlu1 %2191, %v769_v27  }
 0xbe3   : > { %v3208_v7 = vpop.permute.xlu2 %1511 }
 0xbfb   : > { %v1400_v44 = vpop.permute.xlu1 %1399 }
 0xbfc   : > { %v1448_v19 = vmul.f32 %v3195_v1, %v1400_v44 }
 0xbfe   : > { %v3198_v29 = vadd.f32 %v1488_v57, %v1448_v19 }
 0xc06   : > { %1828 = vadd.xlane.f32.xlu1 %v1820_v54 }
 0xc0e   : > { %1834 = vadd.xlane.f32.xlu1 %v1823_v51 }
 0xc16   : > { %1840 = vadd.xlane.f32.xlu1 %v1826_v23 }
 0xc25   : > { %v1833_v46 = vpop.xlane.xlu2 %1832 }
 0xc26   : > { %v1846_v61 = vmul.f32 %v2947_v4, %v1833_v46  ;;  %v1784_v58 = vpop.xlane.xlu1 %1783 }
 0xc27   : > { %v1785_v34 = vmax.f32 %v1784_v58, 1e-12 }
 0xc28   : > { %v1855_v3 = vadd.f32 %v3213_v31, %v1846_v61 }
 0xc29   : > { %2400 = vrcp.f32 %v1785_v34 }
 0xc2a   : > { %v1863_v15 = vsub.f32 0.0, %v1855_v3 }
 0xc2c   : > { %v1873_v12 = vmul.f32 1.442695, %v1863_v15 }
 0xc2e   : > { %2402 = vpow2.f32 %v1873_v12 }
 0xc2f   : > { %v2401_v53 = vpop.eup %2400 }
 0xc30   : > { %v1787_v33 = vmul.f32 %v2401_v53, %v1336_v16 }
 0xc32   : > { %1799 = vperm.xlu0 %2190, %v1787_v33  }
 0xc34   : > { %v2403_v50 = vpop.eup %2402 }
 0xc35   : > { %v1887_v37 = vadd.f32 1.0, %v2403_v50 }
 0xc37   : > { %2404 = vrcp.f32 %v1887_v37  ;;  %v1934_v0 = vand.u32 2147483648, %v1887_v37  ;;  %v1932_v45 = vand.u32 2147483647, %v1887_v37  ;;  %vm1928_vm1 = vweird.f32 %v1887_v37 }
 0xc39   : > { %v1935_v63 = vor.u32 1.1754944e-38, %v1934_v0  ;;  %vm1933_vm0 = vcmp.eq.f32.partialorder %v1932_v45, 8.507059e+37 }
 0xc3a   : > { %2192 = vset.pattern.permute.xlu0 %v2457_v10 }
 0xc3d   : > { %v2405_v4 = vpop.eup %2404 }
 0xc3e   : > { %v1924_v40 = vmul.f32 %v2405_v4, %v1887_v37  ;;  %vm1929_vm13 = vweird.f32 %v2405_v4  ;;  %v1789_v8 = vpop.permute.xlu1 %1788 }
 0xc3f   : > { %vm1930_vm15 = vmor %vm1928_vm1, %vm1929_vm13  ;;  %v1790_v33 = vmul.f32 %v1789_v8, %v3195_v1  ;;  %v1552_v1 = vmul.f32 %v3206_v24, %v3208_v7 }
 0xc40   : > { %v1925_v6 = vsub.f32 1.0, %v1924_v40  ;;  %v1791_v40 = vmul.f32 %v3187_v18, %v3175_v30 }
 0xc42   : > { %v1926_v42 = vmul.f32 %v2405_v4, %v1925_v6  ;;  %v1792_v45 = vadd.f32 %v1791_v40, %v1790_v33 }
 0xc44   : > { %v1927_v22 = vadd.f32 %v2405_v4, %v1926_v42 }
 0xc46   : > { %v1931_v10 = vsel %vm1930_vm15, %v2405_v4, %v1927_v22  ;;  %v1794_v21 = vpop.permute.xlu1 %1793 }
 0xc47   : > { %v1936_v47 = vsel %vm1933_vm0, %v1935_v63, %v1931_v10  ;;  %v1795_v6 = vmul.f32 %v1794_v21, %v3206_v24 }
 0xc48   : > { %2016 = vst.msk [vmem:[%s3224_s28 + $0x10] sm:$0xff] %vm2013_vm14, %v1936_v47 }
 0xc4e   : > { %v3232_v41 = vpop.permute.xlu1 %1809 }
 0xc5c   : > { %1830 = vadd.xlane.f32.xlu0 %v1821_v38  ;;  %v1796_v38 = vadd.f32 %v1795_v6, %v1792_v45 }
 0xc64   : > { %1838 = vadd.xlane.f32.xlu0 %v1825_v39  ;;  %v1560_v39 = vadd.f32 %v1552_v1, %v3198_v29 }
 0xc79   : > { %v1829_v62 = vpop.xlane.xlu1 %1828 }
 0xc7a   : > { %v1844_v56 = vmul.f32 %v2758_v43, %v1829_v62 }
 0xc7c   : > { %v1853_v9 = vadd.f32 %v3213_v31, %v1844_v56 }
 0xc7e   : > { %v1861_v55 = vsub.f32 0.0, %v1853_v9 }
 0xc80   : > { %v1869_v49 = vmul.f32 1.442695, %v1861_v55 }
 0xc81   : > { %v1835_v28 = vpop.xlane.xlu1 %1834 }
 0xc82   : > { %2406 = vpow2.f32 %v1869_v49  ;;  %v1847_v36 = vmul.f32 %v3034_v14, %v1835_v28 }
 0xc84   : > { %v1856_v32 = vadd.f32 %v3213_v31, %v1847_v36 }
 0xc86   : > { %v1864_v60 = vsub.f32 0.0, %v1856_v32 }
 0xc88   : > { %v2407_v57 = vpop.eup %2406  ;;  %v1875_v26 = vmul.f32 1.442695, %v1864_v60 }
 0xc89   : > { %v1885_v48 = vadd.f32 1.0, %v2407_v57  ;;  %v1841_v2 = vpop.xlane.xlu1 %1840 }
 0xc8a   : > { %2408 = vpow2.f32 %v1875_v26  ;;  %v1850_v20 = vmul.f32 %v2401_v53, %v1841_v2  ;;  %v1824_v26 = vmul.f32 %v3074_v59, %v3183_v25 }
 0xc8b   : > { %2410 = vrcp.f32 %v1885_v48  ;;  %v1904_v54 = vand.u32 2147483648, %v1885_v48  ;;  %v1902_v23 = vand.u32 2147483647, %v1885_v48  ;;  %vm1898_vm5 = vweird.f32 %v1885_v48 }
 0xc8c   : > { %v1859_v43 = vadd.f32 %v3213_v31, %v1850_v20 }
 0xc8d   : > { %v1905_v34 = vor.u32 1.1754944e-38, %v1904_v54  ;;  %vm1903_vm3 = vcmp.eq.f32.partialorder %v1902_v23, 8.507059e+37 }
 0xc8e   : > { %v1867_v5 = vsub.f32 0.0, %v1859_v43 }
 0xc90   : > { %v2409_v13 = vpop.eup %2408  ;;  %v1881_v52 = vmul.f32 1.442695, %v1867_v5 }
 0xc91   : > { %v2411_v27 = vpop.eup %2410  ;;  %v1888_v44 = vadd.f32 1.0, %v2409_v13 }
 0xc92   : > { %v1894_v19 = vmul.f32 %v2411_v27, %v1885_v48  ;;  %2412 = vpow2.f32 %v1881_v52  ;;  %vm1899_vm4 = vweird.f32 %v2411_v27 }
 0xc93   : > { %2414 = vrcp.f32 %v1888_v44  ;;  %vm1900_vm6 = vmor %vm1898_vm5, %vm1899_vm4  ;;  %v1949_v50 = vand.u32 2147483648, %v1888_v44  ;;  %v1947_v4 = vand.u32 2147483647, %v1888_v44  ;;  %vm1943_vm8 = vweird.f32 %v1888_v44 }
 0xc94   : > { %v1895_v14 = vsub.f32 1.0, %v1894_v19 }
 0xc95   : > { %v1950_v22 = vor.u32 1.1754944e-38, %v1949_v50  ;;  %vm1948_vm10 = vcmp.eq.f32.partialorder %v1947_v4, 8.507059e+37 }
 0xc96   : > { %v1896_v51 = vmul.f32 %v2411_v27, %v1895_v14 }
 0xc98   : > { %v2413_v46 = vpop.eup %2412  ;;  %v1897_v61 = vadd.f32 %v2411_v27, %v1896_v51 }
 0xc99   : > { %v2415_v58 = vpop.eup %2414  ;;  %v1891_v3 = vadd.f32 1.0, %v2413_v46 }
 0xc9a   : > { %v1901_v15 = vsel %vm1900_vm6, %v2411_v27, %v1897_v61  ;;  %v1939_v12 = vmul.f32 %v2415_v58, %v1888_v44  ;;  %vm1944_vm7 = vweird.f32 %v2415_v58 }
 0xc9b   : > { %v1906_v16 = vsel %vm1903_vm3, %v1905_v34, %v1901_v15  ;;  %2416 = vrcp.f32 %v1891_v3  ;;  %vm1945_vm9 = vmor %vm1943_vm8, %vm1944_vm7  ;;  %v1994_v18 = vand.u32 2147483648, %v1891_v3  ;;  %v1992_v56 = vand.u32 2147483647, %v1891_v3 }
 0xc9c   : > { %2014 = vst.msk [vmem:[%s3224_s28] sm:$0xff] %vm2013_vm14, %v1906_v16  ;;  %v1940_v53 = vsub.f32 1.0, %v1939_v12  ;;  %vm1988_vm12 = vweird.f32 %v1891_v3 }
 0xc9d   : > { %v1995_v49 = vor.u32 1.1754944e-38, %v1994_v18  ;;  %vm1993_vm13 = vcmp.eq.f32.partialorder %v1992_v56, 8.507059e+37 }
 0xc9e   : > { %v1941_v37 = vmul.f32 %v2415_v58, %v1940_v53 }
 0xca0   : > { %v1942_v0 = vadd.f32 %v2415_v58, %v1941_v37 }
 0xca1   : > { %v2417_v42 = vpop.eup %2416 }
 0xca2   : > { %v1946_v63 = vsel %vm1945_vm9, %v2415_v58, %v1942_v0  ;;  %v1984_v10 = vmul.f32 %v2417_v42, %v1891_v3  ;;  %vm1989_vm11 = vweird.f32 %v2417_v42 }
 0xca3   : > { %v1951_v47 = vsel %vm1948_vm10, %v1950_v22, %v1946_v63  ;;  %vm1990_vm2 = vmor %vm1988_vm12, %vm1989_vm11 }
 0xca4   : > { %2017 = vst.msk [vmem:[%s3224_s28 + $0x18] sm:$0xff] %vm2013_vm14, %v1951_v47  ;;  %v1985_v8 = vsub.f32 1.0, %v1984_v10  ;;  %v1800_v30 = vpop.permute.xlu0 %1799 }
 0xca5   : > { %v1802_v21 = vmul.f32 %v1800_v30, %v1796_v38 }
 0xca6   : > { %v1986_v62 = vmul.f32 %v2417_v42, %v1985_v8 }
 0xca7   : > { %v1803_v9 = vadd.f32 %v1802_v21, %v1560_v39 }
 0xca8   : > { %v1987_v55 = vadd.f32 %v2417_v42, %v1986_v62 }
 0xca9   : > { %v1804_v24 = vmax.f32 %v1803_v9, 1e-30 }
 0xcaa   : > { %v1991_v7 = vsel %vm1990_vm2, %v2417_v42, %v1987_v55 }
 0xcab   : > { %v1996_v28 = vsel %vm1993_vm13, %v1995_v49, %v1991_v7  ;;  %2418 = vlog2.f32 %v1804_v24 }
 0xcac   : > { %2020 = vst.msk [vmem:[%s3224_s28 + $0x30] sm:$0xff] %vm2013_vm14, %v1996_v28 }
 0xcb1   : > { %v2419_v36 = vpop.eup %2418 }
 0xcb2   : > { %v1806_v32 = vmul.f32 0.6931472, %v2419_v36 }
 0xcb4   : > { %v1812_v29 = vmul.f32 %v3232_v41, %v1806_v32 }
 0xcb6   : > { %v1813_v60 = vmul.f32 1.442695, %v1812_v29 }
 0xcb8   : > { %2420 = vpow2.f32 %v1813_v60 }
 0xcbe   : > { %v2421_v57 = vpop.eup %2420 }
 0xcbf   : > { %1815 = vadd.xlane.f32.xlu2 %v2421_v57  ;;  %v1827_v48 = vmul.f32 %v2421_v57, %v3183_v25 }
 0xcc7   : > { %1836 = vadd.xlane.f32.xlu2 %v1824_v26 }
 0xccf   : > { %v1831_v2 = vpop.xlane.xlu0 %1830  ;;  %1842 = vadd.xlane.f32.xlu2 %v1827_v48 }
 0xcd0   : > { %v1845_v20 = vmul.f32 %v2863_v11, %v1831_v2 }
 0xcd2   : > { %v1854_v43 = vadd.f32 %v3213_v31, %v1845_v20 }
 0xcd4   : > { %v1862_v5 = vsub.f32 0.0, %v1854_v43 }
 0xcd6   : > { %v1871_v13 = vmul.f32 1.442695, %v1862_v5 }
 0xcd7   : > { %v1839_v52 = vpop.xlane.xlu0 %1838 }
 0xcd8   : > { %2422 = vpow2.f32 %v1871_v13  ;;  %v1849_v41 = vmul.f32 %v3165_v35, %v1839_v52 }
 0xcda   : > { %v1858_v27 = vadd.f32 %v3213_v31, %v1849_v41 }
 0xcdc   : > { %v1866_v44 = vsub.f32 0.0, %v1858_v27 }
 0xcde   : > { %v2423_v19 = vpop.eup %2422  ;;  %v1879_v59 = vmul.f32 1.442695, %v1866_v44 }
 0xcdf   : > { %v1886_v14 = vadd.f32 1.0, %v2423_v19 }
 0xce0   : > { %2424 = vpow2.f32 %v1879_v59 }
 0xce1   : > { %2426 = vrcp.f32 %v1886_v14  ;;  %v1919_v46 = vand.u32 2147483648, %v1886_v14  ;;  %v1917_v58 = vand.u32 2147483647, %v1886_v14  ;;  %vm1913_vm15 = vweird.f32 %v1886_v14 }
 0xce3   : > { %v1920_v3 = vor.u32 1.1754944e-38, %v1919_v46  ;;  %vm1918_vm4 = vcmp.eq.f32.partialorder %v1917_v58, 8.507059e+37 }
 0xce6   : > { %v2425_v25 = vpop.eup %2424 }
 0xce7   : > { %v2427_v54 = vpop.eup %2426  ;;  %v1890_v51 = vadd.f32 1.0, %v2425_v25 }
 0xce8   : > { %v1909_v11 = vmul.f32 %v2427_v54, %v1886_v14  ;;  %vm1914_vm1 = vweird.f32 %v2427_v54 }
 0xce9   : > { %2428 = vrcp.f32 %v1890_v51  ;;  %vm1915_vm0 = vmor %vm1913_vm15, %vm1914_vm1  ;;  %v1979_v33 = vand.u32 2147483648, %v1890_v51  ;;  %v1977_v37 = vand.u32 2147483647, %v1890_v51  ;;  %vm1973_vm6 = vweird.f32 %v1890_v51 }
 0xcea   : > { %v1910_v23 = vsub.f32 1.0, %v1909_v11 }
 0xceb   : > { %v1980_v40 = vor.u32 1.1754944e-38, %v1979_v33  ;;  %vm1978_vm7 = vcmp.eq.f32.partialorder %v1977_v37, 8.507059e+37 }
 0xcec   : > { %v1911_v61 = vmul.f32 %v2427_v54, %v1910_v23 }
 0xcee   : > { %v1912_v35 = vadd.f32 %v2427_v54, %v1911_v61 }
 0xcef   : > { %v2429_v34 = vpop.eup %2428 }
 0xcf0   : > { %v1916_v15 = vsel %vm1915_vm0, %v2427_v54, %v1912_v35  ;;  %v1969_v12 = vmul.f32 %v2429_v34, %v1890_v51  ;;  %vm1974_vm5 = vweird.f32 %v2429_v34 }
 0xcf1   : > { %v1921_v16 = vsel %vm1918_vm4, %v1920_v3, %v1916_v15  ;;  %vm1975_vm3 = vmor %vm1973_vm6, %vm1974_vm5 }
 0xcf2   : > { %2015 = vst.msk [vmem:[%s3224_s28 + $0x8] sm:$0xff] %vm2013_vm14, %v1921_v16  ;;  %v1970_v53 = vsub.f32 1.0, %v1969_v12 }
 0xcf4   : > { %v1971_v50 = vmul.f32 %v2429_v34, %v1970_v53 }
 0xcf6   : > { %v1972_v4 = vadd.f32 %v2429_v34, %v1971_v50 }
 0xcf8   : > { %v1976_v6 = vsel %vm1975_vm3, %v2429_v34, %v1972_v4 }
 0xcf9   : > { %v1981_v0 = vsel %vm1978_vm7, %v1980_v40, %v1976_v6 }
 0xcfa   : > { %2019 = vst.msk [vmem:[%s3224_s28 + $0x28] sm:$0xff] %vm2013_vm14, %v1981_v0 }
 0xd32   : > { %v1816_v42 = vpop.xlane.xlu2 %1815 }
 0xd33   : > { %v1817_v45 = vmax.f32 %v1816_v42, 1e-12 }
 0xd35   : > { %2430 = vrcp.f32 %v1817_v45 }
 0xd3a   : > { %v1837_v22 = vpop.xlane.xlu2 %1836 }
 0xd3b   : > { %v1848_v63 = vmul.f32 %v3096_v17, %v1837_v22  ;;  %v2431_v38 = vpop.eup %2430 }
 0xd3d   : > { %v1857_v10 = vadd.f32 %v3213_v31, %v1848_v63 }
 0xd3f   : > { %v1865_v1 = vsub.f32 0.0, %v1857_v10 }
 0xd41   : > { %v1877_v47 = vmul.f32 1.442695, %v1865_v1 }
 0xd42   : > { %v1843_v8 = vpop.xlane.xlu2 %1842 }
 0xd43   : > { %2432 = vpow2.f32 %v1877_v47  ;;  %v1851_v30 = vmul.f32 %v2431_v38, %v1843_v8 }
 0xd45   : > { %v1860_v18 = vadd.f32 %v3213_v31, %v1851_v30 }
 0xd47   : > { %v1868_v39 = vsub.f32 0.0, %v1860_v18 }
 0xd49   : > { %v2433_v21 = vpop.eup %2432  ;;  %v1883_v62 = vmul.f32 1.442695, %v1868_v39 }
 0xd4a   : > { %v1889_v56 = vadd.f32 1.0, %v2433_v21 }
 0xd4b   : > { %2434 = vpow2.f32 %v1883_v62 }
 0xd4c   : > { %2436 = vrcp.f32 %v1889_v56  ;;  %v1964_v7 = vand.u32 2147483648, %v1889_v56  ;;  %v1962_v36 = vand.u32 2147483647, %v1889_v56  ;;  %vm1958_vm9 = vweird.f32 %v1889_v56 }
 0xd4e   : > { %v1965_v29 = vor.u32 1.1754944e-38, %v1964_v7  ;;  %vm1963_vm11 = vcmp.eq.f32.partialorder %v1962_v36, 8.507059e+37 }
 0xd51   : > { %v2435_v9 = vpop.eup %2434 }
 0xd52   : > { %v2437_v55 = vpop.eup %2436  ;;  %v1892_v17 = vadd.f32 1.0, %v2435_v9 }
 0xd53   : > { %v1954_v49 = vmul.f32 %v2437_v55, %v1889_v56  ;;  %vm1959_vm8 = vweird.f32 %v2437_v55 }
 0xd54   : > { %2438 = vrcp.f32 %v1892_v17  ;;  %vm1960_vm10 = vmor %vm1958_vm9, %vm1959_vm8  ;;  %v2009_v2 = vand.u32 2147483648, %v1892_v17  ;;  %v2007_v43 = vand.u32 2147483647, %v1892_v17  ;;  %vm2003_vm2 = vweird.f32 %v1892_v17 }
 0xd55   : > { %v1955_v24 = vsub.f32 1.0, %v1954_v49 }
 0xd56   : > { %v2010_v13 = vor.u32 1.1754944e-38, %v2009_v2  ;;  %vm2008_vm1 = vcmp.eq.f32.partialorder %v2007_v43, 8.507059e+37 }
 0xd57   : > { %v1956_v28 = vmul.f32 %v2437_v55, %v1955_v24 }
 0xd59   : > { %v1957_v32 = vadd.f32 %v2437_v55, %v1956_v28 }
 0xd5a   : > { %v2439_v31 = vpop.eup %2438 }
 0xd5b   : > { %v1961_v60 = vsel %vm1960_vm10, %v2437_v55, %v1957_v32  ;;  %v1999_v57 = vmul.f32 %v2439_v31, %v1892_v17  ;;  %vm2004_vm12 = vweird.f32 %v2439_v31 }
 0xd5c   : > { %v1966_v26 = vsel %vm1963_vm11, %v1965_v29, %v1961_v60  ;;  %vm2005_vm13 = vmor %vm2003_vm2, %vm2004_vm12 }
 0xd5d   : > { %2018 = vst.msk [vmem:[%s3224_s28 + $0x20] sm:$0xff] %vm2013_vm14, %v1966_v26  ;;  %v2000_v48 = vsub.f32 1.0, %v1999_v57 }
 0xd5f   : > { %v2001_v20 = vmul.f32 %v2439_v31, %v2000_v48 }
 0xd61   : > { %v2002_v5 = vadd.f32 %v2439_v31, %v2001_v20 }
 0xd63   : > { %v2006_v52 = vsel %vm2005_vm13, %v2439_v31, %v2002_v5 }
 0xd64   : > { %v2011_v41 = vsel %vm2008_vm1, %v2010_v13, %v2006_v52 }
 0xd65   : > { %2021 = vst.msk [vmem:[%s3224_s28 + $0x38] sm:$0xff] %vm2013_vm14, %v2011_v41 }
 0xd66 PF: > { %s12_s9 = sadd.s32 1, %s2451_s9  }
 0xd67   : > { %p9_p4 = scmp.ge.s32.totalorder %s12_s9, 4  }
 0xd69   :  { %11 = sbr.rel (!%p9_p4) target bundleno = 1 (0x1), region = 58 }

</bundles_post_ra>
